<compile_context>
chip_gen: v5e
topology: v5e:2x2
jax: 0.10.0
libtpu: 0.0.40
codegen_flags: <defaults>
</compile_context>

<pallas_src>
import functools

import jax
import jax.numpy as jnp
from jax.experimental import pallas as pl
from jax.experimental.pallas import tpu as pltpu


def _round_up(n, m):
    return ((n + m - 1) // m) * m


def _apply_act(y, act):
    if act == "relu":
        return jnp.maximum(y, 0.0)
    if act == "sigmoid":
        return jax.nn.sigmoid(y)
    if act == "tanh":
        return jnp.tanh(y)
    if act == "gelu":
        # Match torch.nn.GELU default (exact erf form, not tanh approx).
        return jax.nn.gelu(y, approximate=False)
    return y


def _fused_mlp_kernel(x_ref, *refs, n_layers, acts, out_pads):
    """refs = (w_0..w_{L-1}, b_packed, out). Whole MLP for one batch tile."""
    w_refs = refs[:n_layers]
    b_ref = refs[n_layers]          # (16, 1024) f32, row li = bias of layer li
    o_ref = refs[n_layers + 1]

    h = x_ref[...]                  # already bf16 (cast on host)
    for li in range(n_layers):
        out_p = out_pads[li]
        # MXU matmul, f32 accumulate.
        y = jnp.dot(h, w_refs[li][...], preferred_element_type=jnp.float32)
        y = y + b_ref[li:li + 1, :out_p]   # static ref slice = free view
        y = _apply_act(y, acts[li])        # elementwise math stays f32
        if li + 1 < n_layers:
            h = y.astype(jnp.bfloat16)     # next layer's MXU operand
        else:
            o_ref[...] = y.astype(o_ref.dtype)  # lane-dense (128-wide) store


def make_linear_bn_params(key, in_dim, out_dim):
    """Deterministic init mirroring PyTorch defaults (uniform +/- 1/sqrt(in))."""
    kw, kb = jax.random.split(key)
    bound = 1.0 / (in_dim ** 0.5)
    w = jax.random.uniform(kw, (in_dim, out_dim), jnp.float32, -bound, bound)
    b = jax.random.uniform(kb, (out_dim,), jnp.float32, -bound, bound)
    return {
        "w": w,
        "b": b,
        "gamma": jnp.ones((out_dim,), jnp.float32),
        "beta": jnp.zeros((out_dim,), jnp.float32),
        "running_mean": jnp.zeros((out_dim,), jnp.float32),
        "running_var": jnp.ones((out_dim,), jnp.float32),
    }


def build_bp_model_params(key, in_dim=38, base_channel=64, depth=8):
    """Layer dims exactly as BPModel.__init__ builds them."""
    dims = [(in_dim, base_channel)]
    for i in range(0, depth // 2):
        dims.append((base_channel * 2 ** i, base_channel * 2 ** (i + 1)))
    for i in range(depth // 2, 0, -1):
        dims.append((base_channel * 2 ** i, base_channel * 2 ** (i - 1)))
    dims.append((base_channel, 1))

    keys = jax.random.split(key, len(dims))
    return [make_linear_bn_params(k, di, do) for k, (di, do) in zip(keys, dims)]


def fold_and_pad_params(params, act="relu", eps=1e-5, weight_dtype=jnp.bfloat16):
    """Fold eval-mode BN into W/b, zero-pad features to 128 lanes, pack biases.

    Done once at build time (not per forward call). Layout matches the
    PyTorch block: Linear -> BatchNorm1d -> activation; final block has no act.
    """
    n = len(params)
    acts = tuple([act] * (n - 1) + [None])  # final LinearBN has act=None
    ws, out_pads, folded_biases = [], [], []
    for p in params:
        w, b = p["w"], p["b"]
        in_dim, out_dim = w.shape
        scale = p["gamma"] / jnp.sqrt(p["running_var"] + eps)   # keep eps!
        w_f = w * scale[None, :]
        b_f = (b - p["running_mean"]) * scale + p["beta"]
        in_p, out_p = _round_up(in_dim, 128), _round_up(out_dim, 128)
        w_pad = jnp.zeros((in_p, out_p), jnp.float32).at[:in_dim, :out_dim].set(w_f)
        ws.append(w_pad.astype(weight_dtype))   # bf16 weights, f32 accumulate
        out_pads.append(out_p)
        folded_biases.append((b_f, out_dim))

    # Pack all biases into one (rows, max_out_p) f32 operand: row li = layer li.
    max_out_p = max(out_pads)
    n_rows = _round_up(n, 8)
    b_packed = jnp.zeros((n_rows, max_out_p), jnp.float32)
    for li, (b_f, out_dim) in enumerate(folded_biases):
        b_packed = b_packed.at[li, :out_dim].set(b_f)

    return {
        "w": ws,
        "b_packed": b_packed,
        "acts": acts,
        "out_pads": tuple(out_pads),
        "in_dim": params[0]["w"].shape[0],
        "out_dim": params[-1]["w"].shape[1],
    }


def bp_model_forward(x, fused):
    """Fused forward: one pallas_call (batch-tiled grid) for eval-mode BPModel."""
    ws, b_packed = fused["w"], fused["b_packed"]
    acts, out_pads = fused["acts"], fused["out_pads"]
    n = len(ws)
    batch, in_dim = x.shape
    assert in_dim == fused["in_dim"], (in_dim, fused["in_dim"])

    in_p = ws[0].shape[0]
    out_p_last = ws[-1].shape[1]

    # bf16 activations pack [16,128] per vreg -> round batch up to 16 minimum.
    batch_p = _round_up(batch, 16)
    if batch_p <= 256:
        tm = batch_p                       # single tile for small batches
    else:
        tm = 256                           # MXU-friendly M tile (v6e/v7x 256^2)
        batch_p = _round_up(batch_p, tm)
    grid = (batch_p // tm,)

    # Pad AND cast x to bf16 in one fused host op; padded columns meet
    # zero-padded weight rows, so the math stays exact.
    x_pad = (jnp.zeros((batch_p, in_p), jnp.bfloat16)
             .at[:batch, :in_dim].set(x.astype(jnp.bfloat16)))

    kernel = functools.partial(_fused_mlp_kernel, n_layers=n, acts=acts,
                               out_pads=out_pads)

    # x/out tiled on batch; weights + packed bias resident (constant index_map).
    in_specs = [pl.BlockSpec((tm, in_p), lambda i: (i, 0))]
    in_specs += [pl.BlockSpec(w.shape, lambda i: (0, 0)) for w in ws]
    in_specs += [pl.BlockSpec(b_packed.shape, lambda i: (0, 0))]
    out_spec = pl.BlockSpec((tm, out_p_last), lambda i: (i, 0))

    # Advisory cost estimate so XLA can overlap the (weight-DMA-dominated) call.
    flops = 2 * batch_p * sum(w.shape[0] * w.shape[1] for w in ws)
    transcendentals = 0
    if acts[0] in ("sigmoid", "tanh", "gelu"):
        transcendentals = batch_p * sum(out_pads[:-1])
    bytes_accessed = (sum(w.size * w.dtype.itemsize for w in ws)
                      + b_packed.size * 4
                      + x_pad.size * 2
                      + batch_p * out_p_last * 4)

    out_pad = pl.pallas_call(
        kernel,
        out_shape=jax.ShapeDtypeStruct((batch_p, out_p_last), jnp.float32),
        grid=grid,
        in_specs=in_specs,
        out_specs=out_spec,
        compiler_params=pltpu.CompilerParams(
            dimension_semantics=("parallel",),      # megacore-shard batch tiles
            vmem_limit_bytes=32 * 1024 * 1024,      # ~4 MB working set; explicit
        ),
        cost_estimate=pl.CostEstimate(
            flops=flops,
            transcendentals=transcendentals,
            bytes_accessed=bytes_accessed,
        ),
    )(x_pad, *ws, b_packed)

    return out_pad[:batch, :fused["out_dim"]]


if __name__ == "__main__":
    key = jax.random.PRNGKey(0)
    k_x, k_params = jax.random.split(key)

    batch, in_dim = 8, 38
    x = jax.random.normal(k_x, (batch, in_dim), jnp.float32)

    raw_params = build_bp_model_params(k_params, in_dim=in_dim,
                                       base_channel=64, depth=8)
    fused_params = fold_and_pad_params(raw_params, act="relu")

    out = bp_model_forward(x, fused_params)
    out = jax.block_until_ready(out)
    assert out.shape == (batch, 1), out.shape
    assert bool(jnp.all(jnp.isfinite(out))), "non-finite output"
    print("KERNEL_OK")
</pallas_src>

<mosaic_0001>
module attributes {stable_mosaic.version = 11 : i64} {
  func.func @_fused_mlp_kernel(%arg0: i32, %arg1: memref<16x128xbf16, #tpu.memory_space<vmem>>, %arg2: memref<128x128xbf16, #tpu.memory_space<vmem>>, %arg3: memref<128x128xbf16, #tpu.memory_space<vmem>>, %arg4: memref<128x256xbf16, #tpu.memory_space<vmem>>, %arg5: memref<256x512xbf16, #tpu.memory_space<vmem>>, %arg6: memref<512x1024xbf16, #tpu.memory_space<vmem>>, %arg7: memref<1024x512xbf16, #tpu.memory_space<vmem>>, %arg8: memref<512x256xbf16, #tpu.memory_space<vmem>>, %arg9: memref<256x128xbf16, #tpu.memory_space<vmem>>, %arg10: memref<128x128xbf16, #tpu.memory_space<vmem>>, %arg11: memref<128x128xbf16, #tpu.memory_space<vmem>>, %arg12: memref<16x1024xf32, #tpu.memory_space<vmem>>, %arg13: memref<16x128xf32, #tpu.memory_space<vmem>>) attributes {dimension_semantics = [#tpu.dimension_semantics<parallel>], iteration_bounds = array<i64: 1>, scalar_prefetch = 0 : i64, scratch_operands = 0 : i64, tpu.core_type = #tpu.core_type<tc>, window_params = [{transform_indices = @transform_0, window_bounds = array<i64: 16, 128>}, {pipeline_mode = #tpu.pipeline_mode<synchronous>, transform_indices = @transform_1, window_bounds = array<i64: 128, 128>}, {pipeline_mode = #tpu.pipeline_mode<synchronous>, transform_indices = @transform_2, window_bounds = array<i64: 128, 128>}, {pipeline_mode = #tpu.pipeline_mode<synchronous>, transform_indices = @transform_3, window_bounds = array<i64: 128, 256>}, {pipeline_mode = #tpu.pipeline_mode<synchronous>, transform_indices = @transform_4, window_bounds = array<i64: 256, 512>}, {pipeline_mode = #tpu.pipeline_mode<synchronous>, transform_indices = @transform_5, window_bounds = array<i64: 512, 1024>}, {pipeline_mode = #tpu.pipeline_mode<synchronous>, transform_indices = @transform_6, window_bounds = array<i64: 1024, 512>}, {pipeline_mode = #tpu.pipeline_mode<synchronous>, transform_indices = @transform_7, window_bounds = array<i64: 512, 256>}, {pipeline_mode = #tpu.pipeline_mode<synchronous>, transform_indices = @transform_8, window_bounds = array<i64: 256, 128>}, {pipeline_mode = #tpu.pipeline_mode<synchronous>, transform_indices = @transform_9, window_bounds = array<i64: 128, 128>}, {pipeline_mode = #tpu.pipeline_mode<synchronous>, transform_indices = @transform_10, window_bounds = array<i64: 128, 128>}, {pipeline_mode = #tpu.pipeline_mode<synchronous>, transform_indices = @transform_11, window_bounds = array<i64: 16, 1024>}, {transform_indices = @transform_12, window_bounds = array<i64: 16, 128>}]} {
    %c0 = arith.constant 0 : index
    %c0_0 = arith.constant 0 : index
    %0 = vector.load %arg1[%c0, %c0_0] : memref<16x128xbf16, #tpu.memory_space<vmem>>, vector<16x128xbf16>
    %c0_1 = arith.constant 0 : index
    %c0_2 = arith.constant 0 : index
    %1 = vector.load %arg2[%c0_1, %c0_2] : memref<128x128xbf16, #tpu.memory_space<vmem>>, vector<128x128xbf16>
    %cst = arith.constant dense<0.000000e+00> : vector<16x128xf32>
    %2 = tpu.matmul %0, %1, %cst {dimension_numbers = #tpu.dot_dimension_numbers<[1], [0], [0], [1], [0, 0, 1, 1], [], []>} : vector<16x128xbf16>, vector<128x128xbf16>, vector<16x128xf32> -> vector<16x128xf32>
    %c0_3 = arith.constant 0 : index
    %c0_4 = arith.constant 0 : index
    %3 = vector.load %arg12[%c0_3, %c0_4] : memref<16x1024xf32, #tpu.memory_space<vmem>>, vector<1x128xf32>
    %4 = vector.broadcast %3 : vector<1x128xf32> to vector<16x128xf32>
    %5 = arith.addf %2, %4 : vector<16x128xf32>
    %cst_5 = arith.constant 0.000000e+00 : f32
    %6 = vector.broadcast %cst_5 : f32 to vector<16x128xf32>
    %7 = arith.maximumf %5, %6 : vector<16x128xf32>
    %8 = arith.truncf %7 : vector<16x128xf32> to vector<16x128xbf16>
    %c0_6 = arith.constant 0 : index
    %c0_7 = arith.constant 0 : index
    %9 = vector.load %arg3[%c0_6, %c0_7] : memref<128x128xbf16, #tpu.memory_space<vmem>>, vector<128x128xbf16>
    %cst_8 = arith.constant dense<0.000000e+00> : vector<16x128xf32>
    %10 = tpu.matmul %8, %9, %cst_8 {dimension_numbers = #tpu.dot_dimension_numbers<[1], [0], [0], [1], [0, 0, 1, 1], [], []>} : vector<16x128xbf16>, vector<128x128xbf16>, vector<16x128xf32> -> vector<16x128xf32>
    %c1 = arith.constant 1 : index
    %c0_9 = arith.constant 0 : index
    %11 = vector.load %arg12[%c1, %c0_9] : memref<16x1024xf32, #tpu.memory_space<vmem>>, vector<1x128xf32>
    %12 = vector.broadcast %11 : vector<1x128xf32> to vector<16x128xf32>
    %13 = arith.addf %10, %12 : vector<16x128xf32>
    %cst_10 = arith.constant 0.000000e+00 : f32
    %14 = vector.broadcast %cst_10 : f32 to vector<16x128xf32>
    %15 = arith.maximumf %13, %14 : vector<16x128xf32>
    %16 = arith.truncf %15 : vector<16x128xf32> to vector<16x128xbf16>
    %c0_11 = arith.constant 0 : index
    %c0_12 = arith.constant 0 : index
    %17 = vector.load %arg4[%c0_11, %c0_12] : memref<128x256xbf16, #tpu.memory_space<vmem>>, vector<128x256xbf16>
    %cst_13 = arith.constant dense<0.000000e+00> : vector<16x256xf32>
    %18 = tpu.matmul %16, %17, %cst_13 {dimension_numbers = #tpu.dot_dimension_numbers<[1], [0], [0], [1], [0, 0, 1, 1], [], []>} : vector<16x128xbf16>, vector<128x256xbf16>, vector<16x256xf32> -> vector<16x256xf32>
    %c2 = arith.constant 2 : index
    %c0_14 = arith.constant 0 : index
    %19 = vector.load %arg12[%c2, %c0_14] : memref<16x1024xf32, #tpu.memory_space<vmem>>, vector<1x256xf32>
    %20 = vector.broadcast %19 : vector<1x256xf32> to vector<16x256xf32>
    %21 = arith.addf %18, %20 : vector<16x256xf32>
    %cst_15 = arith.constant 0.000000e+00 : f32
    %22 = vector.broadcast %cst_15 : f32 to vector<16x256xf32>
    %23 = arith.maximumf %21, %22 : vector<16x256xf32>
    %24 = arith.truncf %23 : vector<16x256xf32> to vector<16x256xbf16>
    %c0_16 = arith.constant 0 : index
    %c0_17 = arith.constant 0 : index
    %25 = vector.load %arg5[%c0_16, %c0_17] : memref<256x512xbf16, #tpu.memory_space<vmem>>, vector<256x512xbf16>
    %cst_18 = arith.constant dense<0.000000e+00> : vector<16x512xf32>
    %26 = tpu.matmul %24, %25, %cst_18 {dimension_numbers = #tpu.dot_dimension_numbers<[1], [0], [0], [1], [0, 0, 1, 1], [], []>} : vector<16x256xbf16>, vector<256x512xbf16>, vector<16x512xf32> -> vector<16x512xf32>
    %c3 = arith.constant 3 : index
    %c0_19 = arith.constant 0 : index
    %27 = vector.load %arg12[%c3, %c0_19] : memref<16x1024xf32, #tpu.memory_space<vmem>>, vector<1x512xf32>
    %28 = vector.broadcast %27 : vector<1x512xf32> to vector<16x512xf32>
    %29 = arith.addf %26, %28 : vector<16x512xf32>
    %cst_20 = arith.constant 0.000000e+00 : f32
    %30 = vector.broadcast %cst_20 : f32 to vector<16x512xf32>
    %31 = arith.maximumf %29, %30 : vector<16x512xf32>
    %32 = arith.truncf %31 : vector<16x512xf32> to vector<16x512xbf16>
    %c0_21 = arith.constant 0 : index
    %c0_22 = arith.constant 0 : index
    %33 = vector.load %arg6[%c0_21, %c0_22] : memref<512x1024xbf16, #tpu.memory_space<vmem>>, vector<512x1024xbf16>
    %cst_23 = arith.constant dense<0.000000e+00> : vector<16x1024xf32>
    %34 = tpu.matmul %32, %33, %cst_23 {dimension_numbers = #tpu.dot_dimension_numbers<[1], [0], [0], [1], [0, 0, 1, 1], [], []>} : vector<16x512xbf16>, vector<512x1024xbf16>, vector<16x1024xf32> -> vector<16x1024xf32>
    %c4 = arith.constant 4 : index
    %c0_24 = arith.constant 0 : index
    %35 = vector.load %arg12[%c4, %c0_24] : memref<16x1024xf32, #tpu.memory_space<vmem>>, vector<1x1024xf32>
    %36 = vector.broadcast %35 : vector<1x1024xf32> to vector<16x1024xf32>
    %37 = arith.addf %34, %36 : vector<16x1024xf32>
    %cst_25 = arith.constant 0.000000e+00 : f32
    %38 = vector.broadcast %cst_25 : f32 to vector<16x1024xf32>
    %39 = arith.maximumf %37, %38 : vector<16x1024xf32>
    %40 = arith.truncf %39 : vector<16x1024xf32> to vector<16x1024xbf16>
    %c0_26 = arith.constant 0 : index
    %c0_27 = arith.constant 0 : index
    %41 = vector.load %arg7[%c0_26, %c0_27] : memref<1024x512xbf16, #tpu.memory_space<vmem>>, vector<1024x512xbf16>
    %cst_28 = arith.constant dense<0.000000e+00> : vector<16x512xf32>
    %42 = tpu.matmul %40, %41, %cst_28 {dimension_numbers = #tpu.dot_dimension_numbers<[1], [0], [0], [1], [0, 0, 1, 1], [], []>} : vector<16x1024xbf16>, vector<1024x512xbf16>, vector<16x512xf32> -> vector<16x512xf32>
    %c5 = arith.constant 5 : index
    %c0_29 = arith.constant 0 : index
    %43 = vector.load %arg12[%c5, %c0_29] : memref<16x1024xf32, #tpu.memory_space<vmem>>, vector<1x512xf32>
    %44 = vector.broadcast %43 : vector<1x512xf32> to vector<16x512xf32>
    %45 = arith.addf %42, %44 : vector<16x512xf32>
    %cst_30 = arith.constant 0.000000e+00 : f32
    %46 = vector.broadcast %cst_30 : f32 to vector<16x512xf32>
    %47 = arith.maximumf %45, %46 : vector<16x512xf32>
    %48 = arith.truncf %47 : vector<16x512xf32> to vector<16x512xbf16>
    %c0_31 = arith.constant 0 : index
    %c0_32 = arith.constant 0 : index
    %49 = vector.load %arg8[%c0_31, %c0_32] : memref<512x256xbf16, #tpu.memory_space<vmem>>, vector<512x256xbf16>
    %cst_33 = arith.constant dense<0.000000e+00> : vector<16x256xf32>
    %50 = tpu.matmul %48, %49, %cst_33 {dimension_numbers = #tpu.dot_dimension_numbers<[1], [0], [0], [1], [0, 0, 1, 1], [], []>} : vector<16x512xbf16>, vector<512x256xbf16>, vector<16x256xf32> -> vector<16x256xf32>
    %c6 = arith.constant 6 : index
    %c0_34 = arith.constant 0 : index
    %51 = vector.load %arg12[%c6, %c0_34] : memref<16x1024xf32, #tpu.memory_space<vmem>>, vector<1x256xf32>
    %52 = vector.broadcast %51 : vector<1x256xf32> to vector<16x256xf32>
    %53 = arith.addf %50, %52 : vector<16x256xf32>
    %cst_35 = arith.constant 0.000000e+00 : f32
    %54 = vector.broadcast %cst_35 : f32 to vector<16x256xf32>
    %55 = arith.maximumf %53, %54 : vector<16x256xf32>
    %56 = arith.truncf %55 : vector<16x256xf32> to vector<16x256xbf16>
    %c0_36 = arith.constant 0 : index
    %c0_37 = arith.constant 0 : index
    %57 = vector.load %arg9[%c0_36, %c0_37] : memref<256x128xbf16, #tpu.memory_space<vmem>>, vector<256x128xbf16>
    %cst_38 = arith.constant dense<0.000000e+00> : vector<16x128xf32>
    %58 = tpu.matmul %56, %57, %cst_38 {dimension_numbers = #tpu.dot_dimension_numbers<[1], [0], [0], [1], [0, 0, 1, 1], [], []>} : vector<16x256xbf16>, vector<256x128xbf16>, vector<16x128xf32> -> vector<16x128xf32>
    %c7 = arith.constant 7 : index
    %c0_39 = arith.constant 0 : index
    %59 = vector.load %arg12[%c7, %c0_39] : memref<16x1024xf32, #tpu.memory_space<vmem>>, vector<1x128xf32>
    %60 = vector.broadcast %59 : vector<1x128xf32> to vector<16x128xf32>
    %61 = arith.addf %58, %60 : vector<16x128xf32>
    %cst_40 = arith.constant 0.000000e+00 : f32
    %62 = vector.broadcast %cst_40 : f32 to vector<16x128xf32>
    %63 = arith.maximumf %61, %62 : vector<16x128xf32>
    %64 = arith.truncf %63 : vector<16x128xf32> to vector<16x128xbf16>
    %c0_41 = arith.constant 0 : index
    %c0_42 = arith.constant 0 : index
    %65 = vector.load %arg10[%c0_41, %c0_42] : memref<128x128xbf16, #tpu.memory_space<vmem>>, vector<128x128xbf16>
    %cst_43 = arith.constant dense<0.000000e+00> : vector<16x128xf32>
    %66 = tpu.matmul %64, %65, %cst_43 {dimension_numbers = #tpu.dot_dimension_numbers<[1], [0], [0], [1], [0, 0, 1, 1], [], []>} : vector<16x128xbf16>, vector<128x128xbf16>, vector<16x128xf32> -> vector<16x128xf32>
    %c8 = arith.constant 8 : index
    %c0_44 = arith.constant 0 : index
    %67 = vector.load %arg12[%c8, %c0_44] : memref<16x1024xf32, #tpu.memory_space<vmem>>, vector<1x128xf32>
    %68 = vector.broadcast %67 : vector<1x128xf32> to vector<16x128xf32>
    %69 = arith.addf %66, %68 : vector<16x128xf32>
    %cst_45 = arith.constant 0.000000e+00 : f32
    %70 = vector.broadcast %cst_45 : f32 to vector<16x128xf32>
    %71 = arith.maximumf %69, %70 : vector<16x128xf32>
    %72 = arith.truncf %71 : vector<16x128xf32> to vector<16x128xbf16>
    %c0_46 = arith.constant 0 : index
    %c0_47 = arith.constant 0 : index
    %73 = vector.load %arg11[%c0_46, %c0_47] : memref<128x128xbf16, #tpu.memory_space<vmem>>, vector<128x128xbf16>
    %cst_48 = arith.constant dense<0.000000e+00> : vector<16x128xf32>
    %74 = tpu.matmul %72, %73, %cst_48 {dimension_numbers = #tpu.dot_dimension_numbers<[1], [0], [0], [1], [0, 0, 1, 1], [], []>} : vector<16x128xbf16>, vector<128x128xbf16>, vector<16x128xf32> -> vector<16x128xf32>
    %c9 = arith.constant 9 : index
    %c0_49 = arith.constant 0 : index
    %75 = vector.load %arg12[%c9, %c0_49] : memref<16x1024xf32, #tpu.memory_space<vmem>>, vector<1x128xf32>
    %76 = vector.broadcast %75 : vector<1x128xf32> to vector<16x128xf32>
    %77 = arith.addf %74, %76 : vector<16x128xf32>
    %c0_50 = arith.constant 0 : index
    %c0_51 = arith.constant 0 : index
    %78 = vector.load %arg13[%c0_50, %c0_51] : memref<16x128xf32, #tpu.memory_space<vmem>>, vector<16x128xf32>
    tpu.vector_store %arg13[%c0_50, %c0_51], %77 {strides = array<i32>} : memref<16x128xf32, #tpu.memory_space<vmem>>, vector<16x128xf32>,
    return
  }
  func.func @transform_0(%arg0: i32) -> (i32, i32) {
    %c0_i32 = arith.constant 0 : i32
    %c0_i32_0 = arith.constant 0 : i32
    return %arg0, %c0_i32 : i32, i32
  }
  func.func @transform_1(%arg0: i32) -> (i32, i32) {
    %c0_i32 = arith.constant 0 : i32
    %c0_i32_0 = arith.constant 0 : i32
    %c0_i32_1 = arith.constant 0 : i32
    return %c0_i32, %c0_i32_0 : i32, i32
  }
  func.func @transform_2(%arg0: i32) -> (i32, i32) {
    %c0_i32 = arith.constant 0 : i32
    %c0_i32_0 = arith.constant 0 : i32
    %c0_i32_1 = arith.constant 0 : i32
    return %c0_i32, %c0_i32_0 : i32, i32
  }
  func.func @transform_3(%arg0: i32) -> (i32, i32) {
    %c0_i32 = arith.constant 0 : i32
    %c0_i32_0 = arith.constant 0 : i32
    %c0_i32_1 = arith.constant 0 : i32
    return %c0_i32, %c0_i32_0 : i32, i32
  }
  func.func @transform_4(%arg0: i32) -> (i32, i32) {
    %c0_i32 = arith.constant 0 : i32
    %c0_i32_0 = arith.constant 0 : i32
    %c0_i32_1 = arith.constant 0 : i32
    return %c0_i32, %c0_i32_0 : i32, i32
  }
  func.func @transform_5(%arg0: i32) -> (i32, i32) {
    %c0_i32 = arith.constant 0 : i32
    %c0_i32_0 = arith.constant 0 : i32
    %c0_i32_1 = arith.constant 0 : i32
    return %c0_i32, %c0_i32_0 : i32, i32
  }
  func.func @transform_6(%arg0: i32) -> (i32, i32) {
    %c0_i32 = arith.constant 0 : i32
    %c0_i32_0 = arith.constant 0 : i32
    %c0_i32_1 = arith.constant 0 : i32
    return %c0_i32, %c0_i32_0 : i32, i32
  }
  func.func @transform_7(%arg0: i32) -> (i32, i32) {
    %c0_i32 = arith.constant 0 : i32
    %c0_i32_0 = arith.constant 0 : i32
    %c0_i32_1 = arith.constant 0 : i32
    return %c0_i32, %c0_i32_0 : i32, i32
  }
  func.func @transform_8(%arg0: i32) -> (i32, i32) {
    %c0_i32 = arith.constant 0 : i32
    %c0_i32_0 = arith.constant 0 : i32
    %c0_i32_1 = arith.constant 0 : i32
    return %c0_i32, %c0_i32_0 : i32, i32
  }
  func.func @transform_9(%arg0: i32) -> (i32, i32) {
    %c0_i32 = arith.constant 0 : i32
    %c0_i32_0 = arith.constant 0 : i32
    %c0_i32_1 = arith.constant 0 : i32
    return %c0_i32, %c0_i32_0 : i32, i32
  }
  func.func @transform_10(%arg0: i32) -> (i32, i32) {
    %c0_i32 = arith.constant 0 : i32
    %c0_i32_0 = arith.constant 0 : i32
    %c0_i32_1 = arith.constant 0 : i32
    return %c0_i32, %c0_i32_0 : i32, i32
  }
  func.func @transform_11(%arg0: i32) -> (i32, i32) {
    %c0_i32 = arith.constant 0 : i32
    %c0_i32_0 = arith.constant 0 : i32
    %c0_i32_1 = arith.constant 0 : i32
    return %c0_i32, %c0_i32_0 : i32, i32
  }
  func.func @transform_12(%arg0: i32) -> (i32, i32) {
    %c0_i32 = arith.constant 0 : i32
    %c0_i32_0 = arith.constant 0 : i32
    return %arg0, %c0_i32 : i32, i32
  }
}

</mosaic_0001>

<bundles_post_ra>
// kernel: tpu_custom_call.1
= control target key start
LH: loop header
LB: loop body
LE: loop exit
PB: predicated region body
PF: predicated region fallthrough
CT: control target
= control target key end

     0   :  { %17 = vsyncpa [#allocation3], 0  ;;  %s10215_s0 = inlined_call_operand.hbm [shape: bf16[16,128], index: 0, kind: input, shape index: {}]   ;;  %s10216_s1 = inlined_call_operand.hbm [shape: bf16[128,128], index: 1, kind: input, shape index: {}]   ;;  %s10217_s2 = inlined_call_operand.hbm [shape: bf16[128,128], index: 2, kind: input, shape index: {}]   ;;  %s10218_s3 = inlined_call_operand.hbm [shape: bf16[128,256], index: 3, kind: input, shape index: {}]   ;;  %s10219_s4 = inlined_call_operand.hbm [shape: bf16[256,512], index: 4, kind: input, shape index: {}]   ;;  %s10220_s5 = inlined_call_operand.hbm [shape: bf16[512,1024], index: 5, kind: input, shape index: {}]   ;;  %s10221_s6 = inlined_call_operand.hbm [shape: bf16[1024,512], index: 6, kind: input, shape index: {}]   ;;  %s10222_s7 = inlined_call_operand.hbm [shape: bf16[512,256], index: 7, kind: input, shape index: {}]   ;;  %s10223_s8 = inlined_call_operand.hbm [shape: bf16[256,128], index: 8, kind: input, shape index: {}]   ;;  %s10224_s9 = inlined_call_operand.hbm [shape: bf16[128,128], index: 9, kind: input, shape index: {}]   ;;  %s10225_s10 = inlined_call_operand.hbm [shape: bf16[128,128], index: 10, kind: input, shape index: {}]   ;;  %s10226_s11 = inlined_call_operand.hbm [shape: f32[16,1024], index: 11, kind: input, shape index: {}]   ;;  %s10227_s12 = inlined_call_operand.hbm [shape: f32[16,128], index: 12, kind: output, shape index: {}]  }
   0x1   :  { %18 = vsyncpa [#allocation6], 0 }
   0x2   :  { %19 = vsyncpa [#allocation9], 0 }
   0x3   :  { %20 = vsyncpa [#allocation12], 0 }
   0x4   :  { %21 = vsyncpa [#allocation15], 0 }
   0x5   :  { %22 = vsyncpa [#allocation18], 0 }
   0x6   :  { %23 = vsyncpa [#allocation21], 0 }
   0x7   :  { %24 = vsyncpa [#allocation4], 0  ;;  %s42_s23 = sshll.u32 %s10216_s1, 4  ;;  %s9825_s24 = smov [#allocation5]   ;;  %s43_s23 = int_to_ptr.hbm [resolvable:$true] %s42_s23 }
   0x8   :  { %s44_s25 = sshll.u32 %s9825_s24, 4  ;;  %s68_s28 = sshll.u32 %s10218_s3, 4  ;;  %s45_s25 = int_to_ptr.vmem [resolvable:$true] %s44_s25  ;;  %s69_s28 = int_to_ptr.hbm [resolvable:$true] %s68_s28 }
   0x9   :  { %s9826_s29 = smov 64   ;;  %s9827_s30 = smov 4  }
   0xa   :  { %50 = dma.hbm_to_vmem [thread:$0]  %s43_s23, 1024, %s45_s25, [#allocation6], %s9826_s29, %s9826_s29, %s9827_s30  }
   0xb   :  { %s9828_s13 = smov [#allocation8]   ;;  %s9829_s15 = smov 128  }
   0xc   :  { %s70_s14 = sshll.u32 %s9828_s13, 4  ;;  %s9830_s1 = smov 8   ;;  %s71_s14 = int_to_ptr.vmem [resolvable:$true] %s70_s14 }
   0xd   :  { %76 = dma.hbm_to_vmem [thread:$0]  %s69_s28, 2048, %s71_s14, [#allocation9], %s9829_s15, %s9829_s15, %s9830_s1  }
   0xe   :  { %s94_s3 = sshll.u32 %s10220_s5, 4  ;;  %s9831_s18 = smov [#allocation11]   ;;  %s95_s3 = int_to_ptr.hbm [resolvable:$true] %s94_s3 }
   0xf   :  { %s96_s19 = sshll.u32 %s9831_s18, 4  ;;  %s120_s22 = sshll.u32 %s10222_s7, 4  ;;  %s97_s19 = int_to_ptr.vmem [resolvable:$true] %s96_s19  ;;  %s121_s22 = int_to_ptr.hbm [resolvable:$true] %s120_s22 }
  0x10   :  { %s9832_s23 = smov 512   ;;  %s9833_s24 = smov 32  }
  0x11   :  { %102 = dma.hbm_to_vmem [thread:$0]  %s95_s3, 32768, %s97_s19, [#allocation12], %s9832_s23, %s9832_s23, %s9833_s24  }
  0x12   :  { %s9834_s25 = smov [#allocation14]   ;;  %s146_s13 = sshll.u32 %s10224_s9, 4  ;;  %s147_s13 = int_to_ptr.hbm [resolvable:$true] %s146_s13 }
  0x13   :  { %s122_s26 = sshll.u32 %s9834_s25, 4  ;;  %s29_s7 = sshll.u32 %s10215_s0, 4  ;;  %s123_s26 = int_to_ptr.vmem [resolvable:$true] %s122_s26  ;;  %s30_s7 = int_to_ptr.hbm [resolvable:$true] %s29_s7 }
  0x14   :  { %128 = dma.hbm_to_vmem [thread:$0]  %s121_s22, 8192, %s123_s26, [#allocation15], %s9829_s15, %s9829_s15, %s9830_s1  }
  0x15   :  { %s9835_s16 = smov [#allocation17]   ;;  %s9836_s3 = smov [#allocation2]  }
  0x16   :  { %s148_s17 = sshll.u32 %s9835_s16, 4  ;;  %s31_s9 = sshll.u32 %s9836_s3, 4  ;;  %s149_s17 = int_to_ptr.vmem [resolvable:$true] %s148_s17  ;;  %s32_s9 = int_to_ptr.vmem [resolvable:$true] %s31_s9 }
  0x17   :  { %154 = dma.hbm_to_vmem [thread:$0]  %s147_s13, 1024, %s149_s17, [#allocation18], %s9826_s29, %s9826_s29, %s9827_s30  }
  0x18   :  { %s55_s20 = sshll.u32 %s10217_s2, 4  ;;  %s81_s22 = sshll.u32 %s10219_s4, 4  ;;  %s56_s20 = int_to_ptr.hbm [resolvable:$true] %s55_s20  ;;  %s82_s22 = int_to_ptr.hbm [resolvable:$true] %s81_s22 }
  0x19   :  { %37 = dma.hbm_to_vmem [thread:$0]  %s30_s7, 128, %s32_s9, [#allocation3], %s9826_s29, %s9826_s29, %s9827_s30  }
  0x1a   :  { %s9837_s23 = smov [#allocation7]   ;;  %s9838_s25 = smov [#allocation10]  }
  0x1b   :  { %s57_s24 = sshll.u32 %s9837_s23, 4  ;;  %s83_s2 = sshll.u32 %s9838_s25, 4  ;;  %s58_s24 = int_to_ptr.vmem [resolvable:$true] %s57_s24  ;;  %s84_s2 = int_to_ptr.vmem [resolvable:$true] %s83_s2 }
  0x1c   :  { %63 = dma.hbm_to_vmem [thread:$0]  %s56_s20, 1024, %s58_s24, [#allocation6], %s9826_s29, %s9826_s29, %s9827_s30  }
  0x1d   :  { %s9839_s26 = smov 256   ;;  %s9840_s27 = smov 16  }
  0x1e   :  { %89 = dma.hbm_to_vmem [thread:$0]  %s82_s22, 8192, %s84_s2, [#allocation9], %s9839_s26, %s9839_s26, %s9840_s27  }
  0x1f   :  { %s107_s5 = sshll.u32 %s10221_s6, 4  ;;  %s9841_s4 = smov [#allocation13]   ;;  %s108_s5 = int_to_ptr.hbm [resolvable:$true] %s107_s5 }
  0x20   :  { %s109_s14 = sshll.u32 %s9841_s4, 4  ;;  %s133_s17 = sshll.u32 %s10223_s8, 4  ;;  %s110_s14 = int_to_ptr.vmem [resolvable:$true] %s109_s14  ;;  %s134_s17 = int_to_ptr.hbm [resolvable:$true] %s133_s17 }
  0x21   :  { %115 = dma.hbm_to_vmem [thread:$0]  %s108_s5, 32768, %s110_s14, [#allocation12], %s9839_s26, %s9839_s26, %s9840_s27  }
  0x22   :  { %s9842_s3 = smov [#allocation16]   ;;  %s159_s20 = sshll.u32 %s10225_s10, 4  ;;  %s160_s20 = int_to_ptr.hbm [resolvable:$true] %s159_s20 }
  0x23   :  { %s135_s9 = sshll.u32 %s9842_s3, 4  ;;  %s172_s21 = sshll.u32 %s10226_s11, 4  ;;  %s136_s9 = int_to_ptr.vmem [resolvable:$true] %s135_s9  ;;  %s173_s21 = int_to_ptr.hbm [resolvable:$true] %s172_s21 }
  0x24   :  { %141 = dma.hbm_to_vmem [thread:$0]  %s134_s17, 2048, %s136_s9, [#allocation15], %s9826_s29, %s9826_s29, %s9827_s30  }
  0x25   :  { %s9843_s22 = smov [#allocation19]   ;;  %s9844_s23 = smov [#allocation20]  }
  0x26   :  { %s161_s8 = sshll.u32 %s9843_s22, 4  ;;  %s174_s10 = sshll.u32 %s9844_s23, 4  ;;  %s162_s8 = int_to_ptr.vmem [resolvable:$true] %s161_s8  ;;  %s175_s10 = int_to_ptr.vmem [resolvable:$true] %s174_s10 }
  0x27   :  { %167 = dma.hbm_to_vmem [thread:$0]  %s160_s20, 1024, %s162_s8, [#allocation18], %s9826_s29, %s9826_s29, %s9827_s30  }
  0x28   :  { %s9845_s24 = smov 1024  }
  0x29   :  { %180 = dma.hbm_to_vmem [thread:$0]  %s173_s21, 2048, %s175_s10, [#allocation21], %s9845_s24, %s9845_s24, %s9826_s29  }
  0x2a   :  { %9809 = dma.done.wait [#allocation3], 128  }
  0x2b   :  { %9810 = vsyncadd [#allocation3], 4294967168 }
  0x2c   :  { %9811 = dma.done.wait [#allocation6], 2048  }
  0x2d   :  { %9812 = vsyncadd [#allocation6], 4294965248 }
  0x2e   :  { %9813 = dma.done.wait [#allocation9], 10240  }
  0x2f   :  { %9814 = vsyncadd [#allocation9], 4294957056 }
  0x30   :  { %9815 = dma.done.wait [#allocation12], 65536  }
  0x31   :  { %9816 = vsyncadd [#allocation12], 4294901760 }
  0x32   :  { %9817 = dma.done.wait [#allocation15], 10240  }
  0x33   :  { %9818 = vsyncadd [#allocation15], 4294957056 }
  0x34   :  { %9819 = dma.done.wait [#allocation18], 2048  }
  0x35   :  { %9820 = vsyncadd [#allocation18], 4294965248 }
  0x36   :  { %9821 = dma.done.wait [#allocation21], 2048  }
  0x37   :  { %9822 = vsyncadd [#allocation21], 4294965248  ;;  %v8778_v0 = vld [vmem:[#allocation5 + $0x38] sm:$0xff]  ;;  %v8777_v1 = vld [vmem:[#allocation5 + $0x30] sm:$0xff]  ;;  %s9846_s11 = smov [#allocation22]   ;;  %s5931_s2 = sshll.u32 %s10227_s12, 4  ;;  %s5932_s2 = int_to_ptr.hbm [resolvable:$true] %s5931_s2 }
  0x38   :  { %302 = vmatpush.bf16.msra.mxu0 %v8778_v0  ;;  %v8786_v2 = vld [vmem:[#allocation7 + $0x38] sm:$0xff]  ;;  %v8785_v3 = vld [vmem:[#allocation7 + $0x30] sm:$0xff]  ;;  %v8776_v4 = vld [vmem:[#allocation5 + $0x28] sm:$0xff]  ;;  %s5929_s29 = sshll.u32 %s9846_s11, 4  ;;  %s5930_s29 = int_to_ptr.vmem [resolvable:$true] %s5929_s29 }
  0x39   :  { %384 = vmatpush.bf16.msra.mxu1 %v8786_v2  ;;  %v8784_v5 = vld [vmem:[#allocation7 + $0x28] sm:$0xff]  ;;  %v8775_v6 = vld [vmem:[#allocation5 + $0x20] sm:$0xff]  ;;  %v8774_v8 = vld [vmem:[#allocation5 + $0x18] sm:$0xff] }
  0x3a   :  { %v8783_v7 = vld [vmem:[#allocation7 + $0x20] sm:$0xff]  ;;  %v8773_v9 = vld [vmem:[#allocation5 + $0x10] sm:$0xff]  ;;  %v8772_v10 = vld [vmem:[#allocation5 + $0x8] sm:$0xff] }
  0x3b   :  { %v8771_v11 = vld [vmem:[#allocation5] sm:$0xff]  ;;  %v8770_v12 = vld [vmem:[#allocation2] sm:$0xff]  ;;  %v8781_v14 = vld [vmem:[#allocation7 + $0x10] sm:$0xff] }
  0x3c   :  { %303 = vmatpush.bf16.msra.mxu0 %v8777_v1  ;;  %v8782_v13 = vld [vmem:[#allocation7 + $0x18] sm:$0xff]  ;;  %v8780_v15 = vld [vmem:[#allocation7 + $0x8] sm:$0xff]  ;;  %v8779_v16 = vld [vmem:[#allocation7] sm:$0xff] }
  0x3d   :  { %385 = vmatpush.bf16.msra.mxu1 %v8785_v3  ;;  %v6076_v17 = vld [vmem:[#allocation8 + $0x70] sm:$0xf]  ;;  %v8802_v18 = vld [vmem:[#allocation8 + $0x74] sm:$0xf0]  ;;  %v8801_v19 = vld [vmem:[#allocation8 + $0x74] sm:$0xf] }
  0x3e   :  { %v6077_v20 = vor.u32 %v8802_v18, %v6076_v17  ;;  %v6078_v21 = vld [vmem:[#allocation8 + $0x78] sm:$0xf0]  ;;  %v6068_v22 = vld [vmem:[#allocation8 + $0x60] sm:$0xf]  ;;  %v8800_v23 = vld [vmem:[#allocation8 + $0x64] sm:$0xf0] }
  0x3f   :  { %v6081_v24 = vor.u32 %v8801_v19, %v6078_v21  ;;  %v8799_v25 = vld [vmem:[#allocation8 + $0x64] sm:$0xf]  ;;  %v6070_v26 = vld [vmem:[#allocation8 + $0x68] sm:$0xf0]  ;;  %v6069_v27 = vor.u32 %v8800_v23, %v6068_v22  ;;  %v6060_v29 = vld [vmem:[#allocation8 + $0x50] sm:$0xf] }
  0x40   :  { %304 = vmatpush.bf16.msra.mxu0 %v8776_v4  ;;  %504 = vmatpush.bf16.msra.mxu2 %v6077_v20  ;;  %v6073_v28 = vor.u32 %v8799_v25, %v6070_v26  ;;  %v8798_v30 = vld [vmem:[#allocation8 + $0x54] sm:$0xf0]  ;;  %v8797_v31 = vld [vmem:[#allocation8 + $0x54] sm:$0xf]  ;;  %v6062_v32 = vld [vmem:[#allocation8 + $0x58] sm:$0xf0] }
  0x41   :  { %386 = vmatpush.bf16.msra.mxu1 %v8784_v5  ;;  %518 = vmatpush.bf16.msra.mxu3 %v6081_v24  ;;  %v6061_v33 = vor.u32 %v8798_v30, %v6060_v29  ;;  %v6065_v34 = vor.u32 %v8797_v31, %v6062_v32  ;;  %v6052_v35 = vld [vmem:[#allocation8 + $0x40] sm:$0xf]  ;;  %v8796_v36 = vld [vmem:[#allocation8 + $0x44] sm:$0xf0]  ;;  %v8795_v37 = vld [vmem:[#allocation8 + $0x44] sm:$0xf] }
  0x42   :  { %v6054_v38 = vld [vmem:[#allocation8 + $0x48] sm:$0xf0]  ;;  %v6053_v39 = vor.u32 %v8796_v36, %v6052_v35  ;;  %v247_v42 = vld [vmem:[#allocation20] ss:$0 sm:$0xff]  ;;  %v6044_v49 = vld [vmem:[#allocation8 + $0x30] sm:$0xf] }
  0x43   :  { %v6057_v40 = vor.u32 %v8795_v37, %v6054_v38  ;;  %v8794_v50 = vld [vmem:[#allocation8 + $0x34] sm:$0xf0]  ;;  %v8793_v51 = vld [vmem:[#allocation8 + $0x34] sm:$0xf]  ;;  %v6046_v53 = vld [vmem:[#allocation8 + $0x38] sm:$0xf0] }
  0x44   :  { %305 = vmatpush.bf16.msra.mxu0 %v8775_v6  ;;  %505 = vmatpush.bf16.msra.mxu2 %v6069_v27  ;;  %v6045_v52 = vor.u32 %v8794_v50, %v6044_v49  ;;  %v6049_v54 = vor.u32 %v8793_v51, %v6046_v53  ;;  %v6036_v55 = vld [vmem:[#allocation8 + $0x20] sm:$0xf]  ;;  %v8792_v56 = vld [vmem:[#allocation8 + $0x24] sm:$0xf0]  ;;  %v8791_v57 = vld [vmem:[#allocation8 + $0x24] sm:$0xf] }
  0x45   :  { %387 = vmatpush.bf16.msra.mxu1 %v8783_v7  ;;  %519 = vmatpush.bf16.msra.mxu3 %v6073_v28  ;;  %v6037_v58 = vor.u32 %v8792_v56, %v6036_v55  ;;  %v6038_v59 = vld [vmem:[#allocation8 + $0x28] sm:$0xf0]  ;;  %v6028_v61 = vld [vmem:[#allocation8 + $0x10] sm:$0xf]  ;;  %v8790_v62 = vld [vmem:[#allocation8 + $0x14] sm:$0xf0] }
  0x46   :  { %v6041_v60 = vor.u32 %v8791_v57, %v6038_v59  ;;  %v8789_v63 = vld [vmem:[#allocation8 + $0x14] sm:$0xf]  ;;  %v6029_v0 = vor.u32 %v8790_v62, %v6028_v61  ;;  %v6030_v1 = vld [vmem:[#allocation8 + $0x18] sm:$0xf0]  ;;  %v6020_v3 = vld [vmem:[#allocation8] sm:$0xf] }
  0x47   :  { %v6033_v2 = vor.u32 %v8789_v63, %v6030_v1  ;;  %v8788_v4 = vld [vmem:[#allocation8 + $0x4] sm:$0xf0]  ;;  %v8787_v5 = vld [vmem:[#allocation8 + $0x4] sm:$0xf]  ;;  %v6022_v7 = vld [vmem:[#allocation8 + $0x8] sm:$0xf0] }
  0x48   :  { %306 = vmatpush.bf16.msra.mxu0 %v8774_v8  ;;  %506 = vmatpush.bf16.msra.mxu2 %v6061_v33  ;;  %v6021_v6 = vor.u32 %v8788_v4, %v6020_v3  ;;  %v6025_v8 = vor.u32 %v8787_v5, %v6022_v7  ;;  %v8863_v18 = vld [vmem:[#allocation10 + $0x1e4] sm:$0xf]  ;;  %v6326_v19 = vld [vmem:[#allocation10 + $0x1f0] sm:$0xf0]  ;;  %v6180_v20 = vld [vmem:[#allocation10 + $0xc0] sm:$0xf] }
  0x49   :  { %388 = vmatpush.bf16.msra.mxu1 %v8782_v13  ;;  %520 = vmatpush.bf16.msra.mxu3 %v6065_v34  ;;  %v8865_v13 = vld [vmem:[#allocation10 + $0x1ec] sm:$0xf0]  ;;  %v6329_v21 = vor.u32 %v8863_v18, %v6326_v19  ;;  %v6308_v23 = vld [vmem:[#allocation10 + $0x1c0] sm:$0xf]  ;;  %v8827_v27 = vld [vmem:[#allocation10 + $0xc4] sm:$0xf] }
  0x4a   :  { %v8829_v22 = vld [vmem:[#allocation10 + $0xcc] sm:$0xf0]  ;;  %v6182_v28 = vld [vmem:[#allocation10 + $0xd0] sm:$0xf0]  ;;  %v8859_v29 = vld [vmem:[#allocation10 + $0x1c4] sm:$0xf] }
  0x4b   :  { %v8861_v24 = vld [vmem:[#allocation10 + $0x1cc] sm:$0xf0]  ;;  %v6181_v25 = vor.u32 %v8829_v22, %v6180_v20  ;;  %v6185_v30 = vor.u32 %v8827_v27, %v6182_v28  ;;  %v6310_v31 = vld [vmem:[#allocation10 + $0x1d0] sm:$0xf0]  ;;  %v6164_v32 = vld [vmem:[#allocation10 + $0xa0] sm:$0xf] }
  0x4c   :  { %307 = vmatpush.bf16.msra.mxu0 %v8773_v9  ;;  %507 = vmatpush.bf16.msra.mxu2 %v6053_v39  ;;  %v6196_v9 = vld [vmem:[#allocation10 + $0xe0] sm:$0xf]  ;;  %v6309_v26 = vor.u32 %v8861_v24, %v6308_v23  ;;  %v8825_v33 = vld [vmem:[#allocation10 + $0xac] sm:$0xf0]  ;;  %v6313_v34 = vor.u32 %v8859_v29, %v6310_v31  ;;  %v8823_v37 = vld [vmem:[#allocation10 + $0xa4] sm:$0xf] }
  0x4d   :  { %389 = vmatpush.bf16.msra.mxu1 %v8781_v14  ;;  %521 = vmatpush.bf16.msra.mxu3 %v6057_v40  ;;  %v8831_v14 = vld [vmem:[#allocation10 + $0xe4] sm:$0xf]  ;;  %v6292_v35 = vld [vmem:[#allocation10 + $0x1a0] sm:$0xf]  ;;  %v8857_v36 = vld [vmem:[#allocation10 + $0x1ac] sm:$0xf0]  ;;  %v6165_v38 = vor.u32 %v8825_v33, %v6164_v32 }
  0x4e   :  { %v6166_v39 = vld [vmem:[#allocation10 + $0xb0] sm:$0xf0]  ;;  %v8855_v40 = vld [vmem:[#allocation10 + $0x1a4] sm:$0xf]  ;;  %v6132_v56 = vld [vmem:[#allocation10 + $0x60] sm:$0xf] }
  0x4f   :  { %v8819_v49 = vld [vmem:[#allocation10 + $0x84] sm:$0xf]  ;;  %v6150_v50 = vld [vmem:[#allocation10 + $0x90] sm:$0xf0]  ;;  %v8817_v57 = vld [vmem:[#allocation10 + $0x6c] sm:$0xf0] }
  0x50   :  { %308 = vmatpush.bf16.msra.mxu0 %v8772_v10  ;;  %508 = vmatpush.bf16.msra.mxu2 %v6045_v52  ;;  %v8833_v10 = vld [vmem:[#allocation10 + $0xec] sm:$0xf0]  ;;  %v8851_v51 = vld [vmem:[#allocation10 + $0x184] sm:$0xf]  ;;  %v6278_v52 = vld [vmem:[#allocation10 + $0x190] sm:$0xf0]  ;;  %v6153_v55 = vor.u32 %v8819_v49, %v6150_v50  ;;  %v6133_v1 = vor.u32 %v8817_v57, %v6132_v56 }
  0x51   :  { %390 = vmatpush.bf16.msra.mxu1 %v8780_v15  ;;  %522 = vmatpush.bf16.msra.mxu3 %v6049_v54  ;;  %v6198_v15 = vld [vmem:[#allocation10 + $0xf0] sm:$0xf0]  ;;  %v6281_v59 = vor.u32 %v8851_v51, %v6278_v52  ;;  %v8815_v61 = vld [vmem:[#allocation10 + $0x64] sm:$0xf]  ;;  %v6116_v4 = vld [vmem:[#allocation10 + $0x40] sm:$0xf] }
  0x52   :  { %v6201_v17 = vor.u32 %v8831_v14, %v6198_v15  ;;  %v6134_v62 = vld [vmem:[#allocation10 + $0x70] sm:$0xf0]  ;;  %v8847_v63 = vld [vmem:[#allocation10 + $0x164] sm:$0xf]  ;;  %v8813_v5 = vld [vmem:[#allocation10 + $0x4c] sm:$0xf0] }
  0x53   :  { %v6137_v3 = vor.u32 %v8815_v61, %v6134_v62  ;;  %v335_v14 = vld [vmem:[#allocation20 + $0x1] ss:$0 sm:$0xff]  ;;  %v6117_v15 = vor.u32 %v8813_v5, %v6116_v4  ;;  %v8809_v19 = vld [vmem:[#allocation10 + $0x2c] sm:$0xf0]  ;;  %v8807_v23 = vld [vmem:[#allocation10 + $0x24] sm:$0xf] }
  0x54   :  { %309 = vmatpush.bf16.msra.mxu0 %v8771_v11  ;;  %509 = vmatpush.bf16.msra.mxu2 %v6037_v58  ;;  %v6324_v11 = vld [vmem:[#allocation10 + $0x1e0] sm:$0xf]  ;;  %v8841_v22 = vld [vmem:[#allocation10 + $0x12c] sm:$0xf0]  ;;  %v6102_v24 = vld [vmem:[#allocation10 + $0x30] sm:$0xf0] }
  0x55   :  { %391 = vmatpush.bf16.msra.mxu1 %v8779_v16  ;;  %523 = vmatpush.bf16.msra.mxu3 %v6041_v60  ;;  %v6325_v16 = vor.u32 %v8865_v13, %v6324_v11  ;;  %v6260_v58 = vld [vmem:[#allocation10 + $0x160] sm:$0xf]  ;;  %v8849_v60 = vld [vmem:[#allocation10 + $0x16c] sm:$0xf0]  ;;  %v6118_v11 = vld [vmem:[#allocation10 + $0x50] sm:$0xf0] }
  0x56   :  { %v6246_v13 = vld [vmem:[#allocation10 + $0x150] sm:$0xf0]  ;;  %v6100_v18 = vld [vmem:[#allocation10 + $0x20] sm:$0xf]  ;;  %v8805_v32 = vld [vmem:[#allocation10 + $0xc] sm:$0xf0] }
  0x57   :  { %310 = vmatmul.bf16.vlgmr.msra.gmra.mxu0 %v8770_v12  ;;  %v6197_v12 = vor.u32 %v8833_v10, %v6196_v9  ;;  %v8845_v9 = vld [vmem:[#allocation10 + $0x14c] sm:$0xf0]  ;;  %v8811_v10 = vld [vmem:[#allocation10 + $0x44] sm:$0xf]  ;;  %v6228_v20 = vld [vmem:[#allocation10 + $0x120] sm:$0xf]  ;;  %v6101_v27 = vor.u32 %v8809_v19, %v6100_v18 }
  0x58   :  { %510 = vmatpush.bf16.msra.mxu2 %v6029_v0  ;;  %v6262_v0 = vld [vmem:[#allocation10 + $0x170] sm:$0xf0]  ;;  %v6229_v29 = vor.u32 %v8841_v22, %v6228_v20  ;;  %v6084_v31 = vld [vmem:[#allocation10] sm:$0xf]  ;;  %v6204_v49 = vld [vmem:[#allocation10 + $0xe8] sm:$0xf] }
  0x59   :  { %524 = vmatpush.bf16.msra.mxu3 %v6033_v2  ;;  %933 = vmatpush.bf16.msrb.mxu0 %v6197_v12  ;;  %v6261_v2 = vor.u32 %v8849_v60, %v6260_v58  ;;  %v8843_v12 = vld [vmem:[#allocation10 + $0x144] sm:$0xf]  ;;  %v8834_v50 = vld [vmem:[#allocation10 + $0xf4] sm:$0xf0]  ;;  %v6332_v51 = vld [vmem:[#allocation10 + $0x1e8] sm:$0xf] }
  0x5a   :  { %947 = vmatpush.bf16.msrb.mxu1 %v6325_v16  ;;  %v6205_v52 = vor.u32 %v8834_v50, %v6204_v49  ;;  %v8864_v58 = vld [vmem:[#allocation10 + $0x1ec] sm:$0xf]  ;;  %v6188_v61 = vld [vmem:[#allocation10 + $0xc8] sm:$0xf]  ;;  %v8830_v62 = vld [vmem:[#allocation10 + $0xd4] sm:$0xf0] }
  0x5b   :  { %v8856_v18 = vld [vmem:[#allocation10 + $0x1ac] sm:$0xf]  ;;  %v6302_v19 = vld [vmem:[#allocation10 + $0x1b8] sm:$0xf0]  ;;  %v8822_v22 = vld [vmem:[#allocation10 + $0x94] sm:$0xf0] }
  0x5c   :  { %511 = vmatpush.bf16.msra.mxu2 %v6021_v6  ;;  %v6244_v6 = vld [vmem:[#allocation10 + $0x140] sm:$0xf]  ;;  %v6305_v20 = vor.u32 %v8856_v18, %v6302_v19 }
  0x5d   :  { %525 = vmatpush.bf16.msra.mxu3 %v6025_v8  ;;  %934 = vmatpush.bf16.msrb.mxu0 %v6181_v25  ;;  %v6265_v8 = vor.u32 %v8847_v63, %v6262_v0  ;;  %v6245_v16 = vor.u32 %v8845_v9, %v6244_v6  ;;  %v8839_v25 = vld [vmem:[#allocation10 + $0x124] sm:$0xf]  ;;  %v6316_v63 = vld [vmem:[#allocation10 + $0x1c8] sm:$0xf]  ;;  %v6189_v0 = vor.u32 %v8830_v62, %v6188_v61  ;;  %v8860_v6 = vld [vmem:[#allocation10 + $0x1cc] sm:$0xf] }
  0x5e   :  { %948 = vmatpush.bf16.msrb.mxu1 %v6309_v26  ;;  %v6230_v26 = vld [vmem:[#allocation10 + $0x130] sm:$0xf0]  ;;  %v6172_v9 = vld [vmem:[#allocation10 + $0xa8] sm:$0xf]  ;;  %v8808_v61 = vld [vmem:[#allocation10 + $0x2c] sm:$0xf] }
  0x60   :  { %961 = vmatpush.bf16.msrb.mxu2 %v6201_v17  ;;  %v6121_v17 = vor.u32 %v8811_v10, %v6118_v11  ;;  %v8826_v10 = vld [vmem:[#allocation10 + $0xb4] sm:$0xf0]  ;;  %v6300_v11 = vld [vmem:[#allocation10 + $0x1a8] sm:$0xf] }
  0x61   :  { %975 = vmatpush.bf16.msrb.mxu3 %v6329_v21  ;;  %935 = vmatpush.bf16.msrb.mxu0 %v6165_v38  ;;  %v6249_v21 = vor.u32 %v8843_v12, %v6246_v13  ;;  %v8803_v38 = vld [vmem:[#allocation10 + $0x4] sm:$0xf]  ;;  %v6173_v12 = vor.u32 %v8826_v10, %v6172_v9  ;;  %v8858_v13 = vld [vmem:[#allocation10 + $0x1b4] sm:$0xf0]  ;;  %v8804_v9 = vld [vmem:[#allocation10 + $0xc] sm:$0xf] }
  0x62   :  { %v6094_v10 = vld [vmem:[#allocation10 + $0x18] sm:$0xf0] }
  0x64   :  { %962 = vmatpush.bf16.msrb.mxu2 %v6185_v30  ;;  %v6105_v30 = vor.u32 %v8807_v23, %v6102_v24  ;;  %v6284_v23 = vld [vmem:[#allocation10 + $0x188] sm:$0xf] }
  0x65   :  { %976 = vmatpush.bf16.msrb.mxu3 %v6313_v34  ;;  %v6233_v34 = vor.u32 %v8839_v25, %v6230_v26  ;;  %v8854_v25 = vld [vmem:[#allocation10 + $0x194] sm:$0xf0]  ;;  %v8820_v26 = vld [vmem:[#allocation10 + $0x8c] sm:$0xf] }
  0xd4   :  { %v311_v41 = vpop.f32.mrf.mxu0 }
  0xd5   :  { %v312_v43 = vadd.f32 %v311_v41, %v247_v42  ;;  %v6294_v41 = vld [vmem:[#allocation10 + $0x1b0] sm:$0xf0] }
  0xd7   :  { %v316_v46 = vmax.f32 %v312_v43, 0.0  ;;  %v6169_v43 = vor.u32 %v8823_v37, %v6166_v39  ;;  %v8837_v37 = vld [vmem:[#allocation10 + $0x10c] sm:$0xf0]  ;;  %v6086_v39 = vld [vmem:[#allocation10 + $0x10] sm:$0xf0] }
  0xd9   :  { %963 = vmatpush.bf16.msrb.mxu2 %v6169_v43 }
  0xdc   :  { %v313_v44 = vpop.f32.mrf.mxu0 }
  0xdd   :  { %v314_v45 = vadd.f32 %v313_v44, %v247_v42  ;;  %v6293_v42 = vor.u32 %v8857_v36, %v6292_v35  ;;  %v6148_v44 = vld [vmem:[#allocation10 + $0x80] sm:$0xf]  ;;  %964 = vmatpush.bf16.msrb.mxu2 %v6153_v55  ;;  %v6206_v55 = vld [vmem:[#allocation10 + $0xf8] sm:$0xf0] }
  0xde   :  { %v6212_v35 = vld [vmem:[#allocation10 + $0x100] sm:$0xf] }
  0xdf   :  { %v317_v47 = vmax.f32 %v314_v45, 0.0  ;;  %v8821_v45 = vld [vmem:[#allocation10 + $0x8c] sm:$0xf0]  ;;  %949 = vmatpush.bf16.msrb.mxu1 %v6293_v42  ;;  %v6214_v42 = vld [vmem:[#allocation10 + $0x110] sm:$0xf0] }
  0xe0   :  { %v6149_v53 = vor.u32 %v8821_v45, %v6148_v44  ;;  %v6213_v45 = vor.u32 %v8837_v37, %v6212_v35  ;;  %v6268_v35 = vld [vmem:[#allocation10 + $0x168] sm:$0xf]  ;;  %v8850_v37 = vld [vmem:[#allocation10 + $0x174] sm:$0xf0] }
  0xe1   :  { %v318_v48 = vpack.c.bf16 %v317_v47, %v316_v46  ;;  %v6276_v46 = vld [vmem:[#allocation10 + $0x180] sm:$0xf]  ;;  %v6297_v47 = vor.u32 %v8855_v40, %v6294_v41  ;;  %965 = vmatpush.bf16.msrb.mxu2 %v6137_v3  ;;  %v6085_v40 = vor.u32 %v8805_v32, %v6084_v31  ;;  %v8835_v41 = vld [vmem:[#allocation10 + $0x104] sm:$0xf]  ;;  %v6190_v3 = vld [vmem:[#allocation10 + $0xd8] sm:$0xf0] }
  0xe2   :  { %936 = vmatpush.bf16.msrb.mxu0 %v6149_v53  ;;  %v8866_v53 = vld [vmem:[#allocation10 + $0x1f4] sm:$0xf0]  ;;  %v6286_v31 = vld [vmem:[#allocation10 + $0x198] sm:$0xf0] }
  0xe3   :  { %392 = vmatmul.bf16.vlgmr.msra.gmra.mxu1 %v318_v48  ;;  %v8853_v48 = vld [vmem:[#allocation10 + $0x18c] sm:$0xf0]  ;;  %977 = vmatpush.bf16.msrb.mxu3 %v6297_v47  ;;  %v6333_v56 = vor.u32 %v8866_v53, %v6332_v51  ;;  %v8812_v51 = vld [vmem:[#allocation10 + $0x4c] sm:$0xf] }
  0xe4   :  { %v6277_v54 = vor.u32 %v8853_v48, %v6276_v46  ;;  %v6089_v46 = vor.u32 %v8803_v38, %v6086_v39  ;;  %v6217_v48 = vor.u32 %v8835_v41, %v6214_v42  ;;  %v8816_v38 = vld [vmem:[#allocation10 + $0x6c] sm:$0xf]  ;;  %v6142_v39 = vld [vmem:[#allocation10 + $0x78] sm:$0xf0] }
  0xe5   :  { %966 = vmatpush.bf16.msrb.mxu2 %v6121_v17  ;;  %v6145_v41 = vor.u32 %v8816_v38, %v6142_v39  ;;  %v8848_v42 = vld [vmem:[#allocation10 + $0x16c] sm:$0xf]  ;;  %v7332_v38 = vld [vmem:[#allocation11 + $0x7c0] sm:$0xf] }
  0xe6   :  { %950 = vmatpush.bf16.msrb.mxu1 %v6277_v54  ;;  %937 = vmatpush.bf16.msrb.mxu0 %v6133_v1  ;;  %v8832_v54 = vld [vmem:[#allocation10 + $0xec] sm:$0xf]  ;;  %v8862_v1 = vld [vmem:[#allocation10 + $0x1d4] sm:$0xf0]  ;;  %v9119_v39 = vld [vmem:[#allocation11 + $0x7dc] sm:$0xf0] }
  0xe7   :  { %978 = vmatpush.bf16.msrb.mxu3 %v6281_v59  ;;  %v6209_v57 = vor.u32 %v8832_v54, %v6206_v55  ;;  %v6334_v59 = vld [vmem:[#allocation10 + $0x1f8] sm:$0xf0]  ;;  %v6317_v4 = vor.u32 %v8862_v1, %v6316_v63  ;;  %v8844_v53 = vld [vmem:[#allocation10 + $0x14c] sm:$0xf] }
  0xe8   :  { %v6337_v60 = vor.u32 %v8864_v58, %v6334_v59  ;;  %v6254_v55 = vld [vmem:[#allocation10 + $0x158] sm:$0xf0]  ;;  %v6236_v59 = vld [vmem:[#allocation10 + $0x128] sm:$0xf] }
  0xe9   :  { %967 = vmatpush.bf16.msrb.mxu2 %v6105_v30  ;;  %v8852_v30 = vld [vmem:[#allocation10 + $0x18c] sm:$0xf]  ;;  %v6257_v58 = vor.u32 %v8844_v53, %v6254_v55  ;;  %v6110_v63 = vld [vmem:[#allocation10 + $0x38] sm:$0xf0]  ;;  %v9111_v53 = vld [vmem:[#allocation11 + $0x79c] sm:$0xf0] }
  0xea   :  { %951 = vmatpush.bf16.msrb.mxu1 %v6261_v2  ;;  %938 = vmatpush.bf16.msrb.mxu0 %v6117_v15  ;;  %v8828_v2 = vld [vmem:[#allocation10 + $0xcc] sm:$0xf]  ;;  %v6174_v15 = vld [vmem:[#allocation10 + $0xb8] sm:$0xf0]  ;;  %v6289_v32 = vor.u32 %v8852_v30, %v6286_v31  ;;  %v6820_v30 = vld [vmem:[#allocation11 + $0x3c0] sm:$0xf] }
  0xeb   :  { %979 = vmatpush.bf16.msrb.mxu3 %v6265_v8  ;;  %v6193_v5 = vor.u32 %v8828_v2, %v6190_v3  ;;  %v6238_v1 = vld [vmem:[#allocation10 + $0x138] sm:$0xf0]  ;;  %v6113_v3 = vor.u32 %v8808_v61, %v6110_v63  ;;  %v8991_v31 = vld [vmem:[#allocation11 + $0x3dc] sm:$0xf0] }
  0xec   :  { %v6500_v55 = vld [vmem:[#allocation11 + $0x140] sm:$0xf] }
  0xed   :  { %968 = vmatpush.bf16.msrb.mxu2 %v6089_v46  ;;  %v8814_v46 = vld [vmem:[#allocation10 + $0x54] sm:$0xf0]  ;;  %v7012_v61 = vld [vmem:[#allocation11 + $0x540] sm:$0xf] }
  0xee   :  { %952 = vmatpush.bf16.msrb.mxu1 %v6245_v16  ;;  %939 = vmatpush.bf16.msrb.mxu0 %v6101_v27  ;;  %v6301_v16 = vor.u32 %v8858_v13, %v6300_v11  ;;  %v6158_v27 = vld [vmem:[#allocation10 + $0x98] sm:$0xf0]  ;;  %v8836_v11 = vld [vmem:[#allocation10 + $0x10c] sm:$0xf]  ;;  %v9039_v63 = vld [vmem:[#allocation11 + $0x55c] sm:$0xf0] }
  0xef   :  { %980 = vmatpush.bf16.msrb.mxu3 %v6249_v21  ;;  %v6156_v21 = vld [vmem:[#allocation10 + $0x88] sm:$0xf] }
  0xf0   :  { %v6157_v24 = vor.u32 %v8822_v22, %v6156_v21 }
  0xf2   :  { %953 = vmatpush.bf16.msrb.mxu1 %v6229_v29  ;;  %940 = vmatpush.bf16.msrb.mxu0 %v6085_v40  ;;  %v6161_v29 = vor.u32 %v8820_v26, %v6158_v27  ;;  %v6269_v40 = vor.u32 %v8850_v37, %v6268_v35  ;;  %v6564_v26 = vld [vmem:[#allocation11 + $0x1c0] sm:$0xf] }
  0xf3   :  { %981 = vmatpush.bf16.msrb.mxu3 %v6233_v34  ;;  %v8818_v34 = vld [vmem:[#allocation10 + $0x74] sm:$0xf0]  ;;  %v9055_v35 = vld [vmem:[#allocation11 + $0x5dc] sm:$0xf0] }
  0xf6   :  { %954 = vmatpush.bf16.msrb.mxu1 %v6213_v45  ;;  %989 = vmatpush.bf16.msra.mxu0 %v6205_v52  ;;  %v6126_v52 = vld [vmem:[#allocation10 + $0x58] sm:$0xf0] }
  0xf7   :  { %982 = vmatpush.bf16.msrb.mxu3 %v6217_v48  ;;  %v8846_v48 = vld [vmem:[#allocation10 + $0x154] sm:$0xf0]  ;;  %v6129_v54 = vor.u32 %v8812_v51, %v6126_v52  ;;  %v9047_v51 = vld [vmem:[#allocation11 + $0x59c] sm:$0xf0] }
  0xf8   :  { %v7300_v52 = vld [vmem:[#allocation11 + $0x780] sm:$0xf] }
  0xfa   :  { %1003 = vmatpush.bf16.msra.mxu1 %v6333_v56  ;;  %990 = vmatpush.bf16.msra.mxu0 %v6189_v0  ;;  %v6108_v56 = vld [vmem:[#allocation10 + $0x28] sm:$0xf]  ;;  %v8840_v0 = vld [vmem:[#allocation10 + $0x12c] sm:$0xf] }
  0xfe   :  { %1004 = vmatpush.bf16.msra.mxu1 %v6317_v4  ;;  %991 = vmatpush.bf16.msra.mxu0 %v6173_v12  ;;  %v6092_v4 = vld [vmem:[#allocation10 + $0x8] sm:$0xf]  ;;  %v6222_v12 = vld [vmem:[#allocation10 + $0x118] sm:$0xf0] }
 0x102   :  { %1005 = vmatpush.bf16.msra.mxu1 %v6301_v16  ;;  %992 = vmatpush.bf16.msra.mxu0 %v6157_v24  ;;  %v6225_v16 = vor.u32 %v8836_v11, %v6222_v12  ;;  %v9031_v11 = vld [vmem:[#allocation11 + $0x51c] sm:$0xf0] }
 0x103   :  { %v7236_v12 = vld [vmem:[#allocation11 + $0x700] sm:$0xf] }
 0x160   :  { %v393_v7 = vpop.f32.mrf.mxu1 }
 0x161   :  { %v394_v28 = vadd.f32 %v393_v7, %v335_v14  ;;  %v6318_v7 = vld [vmem:[#allocation10 + $0x1d8] sm:$0xf0] }
 0x162   :  { %v6321_v8 = vor.u32 %v8860_v6, %v6318_v7  ;;  %v6220_v6 = vld [vmem:[#allocation10 + $0x108] sm:$0xf]  ;;  %v6241_v7 = vor.u32 %v8840_v0, %v6238_v1  ;;  %v7268_v0 = vld [vmem:[#allocation11 + $0x740] sm:$0xf] }
 0x163   :  { %v398_v43 = vmax.f32 %v394_v28, 0.0  ;;  %v6285_v28 = vor.u32 %v8854_v25, %v6284_v23  ;;  %v9103_v1 = vld [vmem:[#allocation11 + $0x75c] sm:$0xf0] }
 0x165   :  { %1006 = vmatpush.bf16.msra.mxu1 %v6285_v28 }
 0x168   :  { %v395_v33 = vpop.f32.mrf.mxu1 }
 0x169   :  { %v396_v36 = vadd.f32 %v395_v33, %v335_v14  ;;  %v8824_v14 = vld [vmem:[#allocation10 + $0xac] sm:$0xf]  ;;  %v6140_v33 = vld [vmem:[#allocation10 + $0x68] sm:$0xf]  ;;  %1007 = vmatpush.bf16.msra.mxu1 %v6269_v40 }
 0x16a   :  { %v6177_v17 = vor.u32 %v8824_v14, %v6174_v15  ;;  %v6097_v15 = vor.u32 %v8804_v9, %v6094_v10  ;;  %v6980_v9 = vld [vmem:[#allocation11 + $0x500] sm:$0xf]  ;;  %v7269_v10 = vor.u32 %v9103_v1, %v7268_v0 }
 0x16b   :  { %v399_v44 = vmax.f32 %v396_v36, 0.0  ;;  %v6141_v36 = vor.u32 %v8818_v34, %v6140_v33  ;;  %v7076_v34 = vld [vmem:[#allocation11 + $0x5c0] sm:$0xf] }
 0x16d   :  { %v400_v47 = vpack.c.bf16 %v399_v44, %v398_v43  ;;  %v6270_v43 = vld [vmem:[#allocation10 + $0x178] sm:$0xf0]  ;;  %v6124_v44 = vld [vmem:[#allocation10 + $0x48] sm:$0xf]  ;;  %993 = vmatpush.bf16.msra.mxu0 %v6141_v36 }
 0x16e   :  { %v6273_v45 = vor.u32 %v8848_v42, %v6270_v43  ;;  %v6125_v49 = vor.u32 %v8814_v46, %v6124_v44  ;;  %v6532_v43 = vld [vmem:[#allocation11 + $0x180] sm:$0xf] }
 0x16f   :  { %512 = vmatmul.bf16.vlgmr.msra.gmra.mxu2 %v400_v47  ;;  %526 = vmatmul.bf16.vlgmr.msra.gmra.mxu3 %v400_v47  ;;  %v6252_v47 = vld [vmem:[#allocation10 + $0x148] sm:$0xf]  ;;  %v8919_v44 = vld [vmem:[#allocation11 + $0x19c] sm:$0xf0] }
 0x170   :  { %1017 = vmatpush.bf16.msra.mxu2 %v6209_v57  ;;  %1031 = vmatpush.bf16.msra.mxu3 %v6337_v60  ;;  %v6253_v50 = vor.u32 %v8846_v48, %v6252_v47  ;;  %v8810_v57 = vld [vmem:[#allocation10 + $0x34] sm:$0xf0]  ;;  %v6788_v46 = vld [vmem:[#allocation11 + $0x380] sm:$0xf]  ;;  %v7077_v48 = vor.u32 %v9055_v35, %v7076_v34 }
 0x171   :  { %v8842_v60 = vld [vmem:[#allocation10 + $0x134] sm:$0xf0]  ;;  %994 = vmatpush.bf16.msra.mxu0 %v6125_v49  ;;  %v6109_v62 = vor.u32 %v8810_v57, %v6108_v56  ;;  %v8983_v47 = vld [vmem:[#allocation11 + $0x39c] sm:$0xf0] }
 0x172   :  { %1008 = vmatpush.bf16.msra.mxu1 %v6253_v50  ;;  %v6237_v2 = vor.u32 %v8842_v60, %v6236_v59  ;;  %v7044_v49 = vld [vmem:[#allocation11 + $0x580] sm:$0xf]  ;;  %v7333_v50 = vor.u32 %v9119_v39, %v7332_v38  ;;  %v6789_v57 = vor.u32 %v8983_v47, %v6788_v46 }
 0x173   :  { %v8911_v56 = vld [vmem:[#allocation11 + $0x15c] sm:$0xf0]  ;;  %v7045_v60 = vor.u32 %v9047_v51, %v7044_v49 }
 0x174   :  { %1018 = vmatpush.bf16.msra.mxu2 %v6193_v5  ;;  %1032 = vmatpush.bf16.msra.mxu3 %v6321_v8  ;;  %v8806_v5 = vld [vmem:[#allocation10 + $0x14] sm:$0xf0]  ;;  %v8975_v59 = vld [vmem:[#allocation11 + $0x35c] sm:$0xf0] }
 0x175   :  { %v8838_v8 = vld [vmem:[#allocation10 + $0x114] sm:$0xf0]  ;;  %995 = vmatpush.bf16.msra.mxu0 %v6109_v62  ;;  %v6093_v13 = vor.u32 %v8806_v5, %v6092_v4  ;;  %v7301_v62 = vor.u32 %v9111_v53, %v7300_v52  ;;  %v8903_v4 = vld [vmem:[#allocation11 + $0x11c] sm:$0xf0]  ;;  %v6566_v53 = vld [vmem:[#allocation11 + $0x1e0] sm:$0xf0] }
 0x176   :  { %1009 = vmatpush.bf16.msra.mxu1 %v6237_v2  ;;  %v6221_v14 = vor.u32 %v8838_v8, %v6220_v6  ;;  %v6501_v2 = vor.u32 %v8911_v56, %v6500_v55  ;;  %v6724_v6 = vld [vmem:[#allocation11 + $0x300] sm:$0xf]  ;;  %v7013_v8 = vor.u32 %v9039_v63, %v7012_v61  ;;  %v6822_v55 = vld [vmem:[#allocation11 + $0x3e0] sm:$0xf0] }
 0x177   :  { %v6916_v34 = vld [vmem:[#allocation11 + $0x480] sm:$0xf]  ;;  %v6534_v61 = vld [vmem:[#allocation11 + $0x1a0] sm:$0xf0] }
 0x178   :  { %1019 = vmatpush.bf16.msra.mxu2 %v6177_v17  ;;  %1033 = vmatpush.bf16.msra.mxu3 %v6305_v20  ;;  %v418_v17 = vld [vmem:[#allocation20 + $0x2] ss:$8 sm:$0x3]  ;;  %v6790_v63 = vld [vmem:[#allocation11 + $0x3a0] sm:$0xf0] }
 0x179   :  { %996 = vmatpush.bf16.msra.mxu0 %v6093_v13  ;;  %v420_v20 = vperm.slane %v418_v17, 0  ;;  %v421_v21 = vperm.slane %v418_v17, 1  ;;  %v9095_v13 = vld [vmem:[#allocation11 + $0x71c] sm:$0xf0] }
 0x17a   :  { %1010 = vmatpush.bf16.msra.mxu1 %v6221_v14  ;;  %v9015_v35 = vld [vmem:[#allocation11 + $0x49c] sm:$0xf0] }
 0x17b   :  { %v8879_v39 = vld [vmem:[#allocation11 + $0x5c] sm:$0xf0] }
 0x17c   :  { %1020 = vmatpush.bf16.msra.mxu2 %v6161_v29  ;;  %1034 = vmatpush.bf16.msra.mxu3 %v6289_v32  ;;  %v8927_v29 = vld [vmem:[#allocation11 + $0x1dc] sm:$0xf0] }
 0x17d   :  { %v6565_v42 = vor.u32 %v8927_v29, %v6564_v26  ;;  %v8887_v29 = vld [vmem:[#allocation11 + $0x9c] sm:$0xf0] }
 0x17e   :  { %v9007_v46 = vld [vmem:[#allocation11 + $0x45c] sm:$0xf0] }
 0x17f   :  { %v8935_v51 = vld [vmem:[#allocation11 + $0x21c] sm:$0xf0] }
 0x180   :  { %1021 = vmatpush.bf16.msra.mxu2 %v6145_v41  ;;  %1035 = vmatpush.bf16.msra.mxu3 %v6273_v45  ;;  %v6821_v45 = vor.u32 %v8991_v31, %v6820_v30  ;;  %v6660_v30 = vld [vmem:[#allocation11 + $0x280] sm:$0xf] }
 0x181   :  { %v8951_v31 = vld [vmem:[#allocation11 + $0x29c] sm:$0xf0] }
 0x182   :  { %v6661_v38 = vor.u32 %v8951_v31, %v6660_v30  ;;  %v6406_v30 = vld [vmem:[#allocation11 + $0xa0] sm:$0xf0] }
 0x183   :  { %v9043_v31 = vld [vmem:[#allocation11 + $0x584] sm:$0xf] }
 0x184   :  { %1022 = vmatpush.bf16.msra.mxu2 %v6129_v54  ;;  %1036 = vmatpush.bf16.msra.mxu3 %v6257_v58  ;;  %v6533_v54 = vor.u32 %v8919_v44, %v6532_v43  ;;  %v6756_v58 = vld [vmem:[#allocation11 + $0x340] sm:$0xf]  ;;  %v6917_v44 = vor.u32 %v9015_v35, %v6916_v34 }
 0x185   :  { %v6757_v5 = vor.u32 %v8975_v59, %v6756_v58  ;;  %v8943_v43 = vld [vmem:[#allocation11 + $0x25c] sm:$0xf0]  ;;  %v8915_v59 = vld [vmem:[#allocation11 + $0x184] sm:$0xf] }
 0x186   :  { %v6537_v0 = vor.u32 %v8915_v59, %v6534_v61  ;;  %v7108_v34 = vld [vmem:[#allocation11 + $0x600] sm:$0xf] }
 0x187   :  { %v9063_v35 = vld [vmem:[#allocation11 + $0x61c] sm:$0xf0] }
 0x188   :  { %1023 = vmatpush.bf16.msra.mxu2 %v6113_v3  ;;  %1037 = vmatpush.bf16.msra.mxu3 %v6241_v7  ;;  %v6468_v3 = vld [vmem:[#allocation11 + $0x100] sm:$0xf] }
 0x189   :  { %v8967_v7 = vld [vmem:[#allocation11 + $0x31c] sm:$0xf0]  ;;  %v6469_v14 = vor.u32 %v8903_v4, %v6468_v3  ;;  %v6502_v3 = vld [vmem:[#allocation11 + $0x160] sm:$0xf0] }
 0x18a   :  { %v6725_v17 = vor.u32 %v8967_v7, %v6724_v6  ;;  %v6470_v6 = vld [vmem:[#allocation11 + $0x120] sm:$0xf0] }
 0x18c   :  { %1024 = vmatpush.bf16.msra.mxu2 %v6097_v15  ;;  %1038 = vmatpush.bf16.msra.mxu3 %v6225_v16  ;;  %v6436_v15 = vld [vmem:[#allocation11 + $0xc0] sm:$0xf] }
 0x18d   :  { %v8895_v16 = vld [vmem:[#allocation11 + $0xdc] sm:$0xf0] }
 0x18e   :  { %v6437_v26 = vor.u32 %v8895_v16, %v6436_v15  ;;  %v8999_v15 = vld [vmem:[#allocation11 + $0x41c] sm:$0xf0] }
 0x1f2   :  { %v513_v18 = vpop.f32.mrf.mxu2  ;;  %v527_v19 = vpop.f32.mrf.mxu3 }
 0x1f3   :  { %v514_v22 = vadd.f32 %v513_v18, %v420_v20  ;;  %v528_v23 = vadd.f32 %v527_v19, %v421_v21  ;;  %v6692_v18 = vld [vmem:[#allocation11 + $0x2c0] sm:$0xf] }
 0x1f4   :  { %v8959_v19 = vld [vmem:[#allocation11 + $0x2dc] sm:$0xf0] }
 0x1f5   :  { %v532_v32 = vmax.f32 %v514_v22, 0.0  ;;  %v533_v33 = vmax.f32 %v528_v23, 0.0  ;;  %v7237_v22 = vor.u32 %v9095_v13, %v7236_v12  ;;  %v9023_v23 = vld [vmem:[#allocation11 + $0x4dc] sm:$0xf0]  ;;  %v6758_v12 = vld [vmem:[#allocation11 + $0x360] sm:$0xf0] }
 0x1fa   :  { %v515_v24 = vpop.f32.mrf.mxu2  ;;  %v529_v25 = vpop.f32.mrf.mxu3 }
 0x1fb   :  { %v516_v27 = vadd.f32 %v515_v24, %v420_v20  ;;  %v530_v28 = vadd.f32 %v529_v25, %v421_v21  ;;  %v6981_v20 = vor.u32 %v9031_v11, %v6980_v9  ;;  %v6948_v21 = vld [vmem:[#allocation11 + $0x4c0] sm:$0xf]  ;;  %v8971_v11 = vld [vmem:[#allocation11 + $0x344] sm:$0xf] }
 0x1fc   :  { %v7204_v24 = vld [vmem:[#allocation11 + $0x6c0] sm:$0xf]  ;;  %v6761_v13 = vor.u32 %v8971_v11, %v6758_v12  ;;  %v7238_v11 = vld [vmem:[#allocation11 + $0x720] sm:$0xf0] }
 0x1fd   :  { %v534_v36 = vmax.f32 %v516_v27, 0.0  ;;  %v535_v37 = vmax.f32 %v530_v28, 0.0  ;;  %v9087_v25 = vld [vmem:[#allocation11 + $0x6dc] sm:$0xf0]  ;;  %v6693_v28 = vor.u32 %v8959_v19, %v6692_v18  ;;  %v6438_v18 = vld [vmem:[#allocation11 + $0xe0] sm:$0xf0] }
 0x1fe   :  { %v6404_v27 = vld [vmem:[#allocation11 + $0x80] sm:$0xf]  ;;  %v9051_v19 = vld [vmem:[#allocation11 + $0x5c4] sm:$0xf] }
 0x1ff   :  { %v9973_v40 = vpack.c.bf16 %v534_v36, %v532_v32  ;;  %v9975_v41 = vpack.c.bf16 %v535_v37, %v533_v33  ;;  %v6949_v32 = vor.u32 %v9023_v23, %v6948_v21  ;;  %v7205_v33 = vor.u32 %v9087_v25, %v7204_v24  ;;  %v6372_v37 = vld [vmem:[#allocation11 + $0x40] sm:$0xf]  ;;  %v7078_v21 = vld [vmem:[#allocation11 + $0x5e0] sm:$0xf0] }
 0x200   :  { %v6405_v36 = vor.u32 %v8887_v29, %v6404_v27  ;;  %v6373_v47 = vor.u32 %v8879_v39, %v6372_v37  ;;  %v9079_v9 = vld [vmem:[#allocation11 + $0x69c] sm:$0xf0]  ;;  %v7081_v24 = vor.u32 %v9051_v19, %v7078_v21  ;;  %v6726_v27 = vld [vmem:[#allocation11 + $0x320] sm:$0xf0]  ;;  %v7109_v37 = vor.u32 %v9063_v35, %v7108_v34 }
 0x201   :  { %941 = vmatmul.bf16.vlgmr.msrb.gmra.mxu0 %v9973_v40  ;;  %955 = vmatmul.bf16.vlgmr.msrb.gmra.mxu1 %v9975_v41  ;;  %v9071_v23 = vld [vmem:[#allocation11 + $0x65c] sm:$0xf0]  ;;  %v8883_v29 = vld [vmem:[#allocation11 + $0x84] sm:$0xf] }
 0x202   :  { %969 = vmatmul.bf16.vlgmr.msrb.gmra.mxu2 %v9973_v40  ;;  %983 = vmatmul.bf16.vlgmr.msrb.gmra.mxu3 %v9975_v41  ;;  %v6694_v39 = vld [vmem:[#allocation11 + $0x2e0] sm:$0xf0] }
 0x203   :  { %2614 = vmatpush.bf16.msrb.mxu0 %v6565_v42  ;;  %2628 = vmatpush.bf16.msrb.mxu1 %v6821_v45  ;;  %v6628_v42 = vld [vmem:[#allocation11 + $0x240] sm:$0xf]  ;;  %v9003_v19 = vld [vmem:[#allocation11 + $0x444] sm:$0xf] }
 0x204   :  { %2642 = vmatpush.bf16.msrb.mxu2 %v7077_v48  ;;  %2656 = vmatpush.bf16.msrb.mxu3 %v7333_v50  ;;  %v6884_v45 = vld [vmem:[#allocation11 + $0x440] sm:$0xf]  ;;  %v6629_v49 = vor.u32 %v8943_v43, %v6628_v42  ;;  %v9115_v42 = vld [vmem:[#allocation11 + $0x7c4] sm:$0xf] }
 0x205   :  { %v6340_v48 = vld [vmem:[#allocation11] sm:$0xf]  ;;  %v6885_v52 = vor.u32 %v9007_v46, %v6884_v45  ;;  %v8875_v46 = vld [vmem:[#allocation11 + $0x44] sm:$0xf] }
 0x206   :  { %v6596_v50 = vld [vmem:[#allocation11 + $0x200] sm:$0xf] }
 0x207   :  { %2615 = vmatpush.bf16.msrb.mxu0 %v6533_v54  ;;  %2629 = vmatpush.bf16.msrb.mxu1 %v6789_v57  ;;  %v8987_v54 = vld [vmem:[#allocation11 + $0x3c4] sm:$0xf]  ;;  %v6597_v57 = vor.u32 %v8935_v51, %v6596_v50 }
 0x208   :  { %2643 = vmatpush.bf16.msrb.mxu2 %v7045_v60  ;;  %2657 = vmatpush.bf16.msrb.mxu3 %v7301_v62  ;;  %v6825_v60 = vor.u32 %v8987_v54, %v6822_v55  ;;  %v8979_v62 = vld [vmem:[#allocation11 + $0x384] sm:$0xf] }
 0x209   :  { %v6793_v1 = vor.u32 %v8979_v62, %v6790_v63  ;;  %v8947_v50 = vld [vmem:[#allocation11 + $0x284] sm:$0xf] }
 0x20a   :  { %v6662_v51 = vld [vmem:[#allocation11 + $0x2a0] sm:$0xf0] }
 0x20b   :  { %2616 = vmatpush.bf16.msrb.mxu0 %v6501_v2  ;;  %2630 = vmatpush.bf16.msrb.mxu1 %v6757_v5  ;;  %v8907_v2 = vld [vmem:[#allocation11 + $0x144] sm:$0xf] }
 0x20c   :  { %2644 = vmatpush.bf16.msrb.mxu2 %v7013_v8  ;;  %2658 = vmatpush.bf16.msrb.mxu3 %v7269_v10  ;;  %v6505_v4 = vor.u32 %v8907_v2, %v6502_v3  ;;  %v8899_v5 = vld [vmem:[#allocation11 + $0x104] sm:$0xf]  ;;  %v7172_v8 = vld [vmem:[#allocation11 + $0x680] sm:$0xf] }
 0x20d   :  { %v6473_v7 = vor.u32 %v8899_v5, %v6470_v6  ;;  %v7173_v10 = vor.u32 %v9079_v9, %v7172_v8  ;;  %v7302_v54 = vld [vmem:[#allocation11 + $0x7a0] sm:$0xf0] }
 0x20e   :  { %v8939_v62 = vld [vmem:[#allocation11 + $0x244] sm:$0xf] }
 0x20f   :  { %2617 = vmatpush.bf16.msrb.mxu0 %v6469_v14  ;;  %2631 = vmatpush.bf16.msrb.mxu1 %v6725_v17  ;;  %v6852_v14 = vld [vmem:[#allocation11 + $0x400] sm:$0xf]  ;;  %v8891_v17 = vld [vmem:[#allocation11 + $0xc4] sm:$0xf] }
 0x210   :  { %2645 = vmatpush.bf16.msrb.mxu2 %v6981_v20  ;;  %2659 = vmatpush.bf16.msrb.mxu3 %v7237_v22  ;;  %v6853_v16 = vor.u32 %v8999_v15, %v6852_v14  ;;  %v6441_v20 = vor.u32 %v8891_v17, %v6438_v18  ;;  %v7140_v22 = vld [vmem:[#allocation11 + $0x640] sm:$0xf]  ;;  %v6630_v63 = vld [vmem:[#allocation11 + $0x260] sm:$0xf0] }
 0x211   :  { %997 = vmatmul.bf16.vlgmr.msra.gmra.mxu0 %v9973_v40  ;;  %1011 = vmatmul.bf16.vlgmr.msra.gmra.mxu1 %v9975_v41  ;;  %v7141_v25 = vor.u32 %v9071_v23, %v7140_v22  ;;  %v7270_v2 = vld [vmem:[#allocation11 + $0x760] sm:$0xf0] }
 0x212   :  { %1025 = vmatmul.bf16.vlgmr.msra.gmra.mxu2 %v9973_v40  ;;  %1039 = vmatmul.bf16.vlgmr.msra.gmra.mxu3 %v9975_v41  ;;  %v8871_v40 = vld [vmem:[#allocation11 + $0x1c] sm:$0xf0]  ;;  %v8923_v41 = vld [vmem:[#allocation11 + $0x1c4] sm:$0xf] }
 0x213   :  { %2618 = vmatpush.bf16.msrb.mxu0 %v6437_v26  ;;  %2632 = vmatpush.bf16.msrb.mxu1 %v6693_v28  ;;  %v6341_v56 = vor.u32 %v8871_v40, %v6340_v48  ;;  %v6569_v58 = vor.u32 %v8923_v41, %v6566_v53  ;;  %v8963_v26 = vld [vmem:[#allocation11 + $0x304] sm:$0xf]  ;;  %v6665_v53 = vor.u32 %v8947_v50, %v6662_v51 }
 0x214   :  { %2646 = vmatpush.bf16.msrb.mxu2 %v6949_v32  ;;  %2660 = vmatpush.bf16.msrb.mxu3 %v7205_v33  ;;  %v6729_v28 = vor.u32 %v8963_v26, %v6726_v27  ;;  %v6409_v32 = vor.u32 %v8883_v29, %v6406_v30  ;;  %v7046_v33 = vld [vmem:[#allocation11 + $0x5a0] sm:$0xf0] }
 0x215   :  { %v9035_v48 = vld [vmem:[#allocation11 + $0x544] sm:$0xf] }
 0x216   :  { %v6950_v5 = vld [vmem:[#allocation11 + $0x4e0] sm:$0xf0] }
 0x217   :  { %2619 = vmatpush.bf16.msrb.mxu0 %v6405_v36  ;;  %2633 = vmatpush.bf16.msrb.mxu1 %v6661_v38  ;;  %v7049_v36 = vor.u32 %v9043_v31, %v7046_v33  ;;  %v8955_v38 = vld [vmem:[#allocation11 + $0x2c4] sm:$0xf] }
 0x218   :  { %2647 = vmatpush.bf16.msrb.mxu2 %v6917_v44  ;;  %2661 = vmatpush.bf16.msrb.mxu3 %v7173_v10  ;;  %v6697_v43 = vor.u32 %v8955_v38, %v6694_v39  ;;  %v7334_v44 = vld [vmem:[#allocation11 + $0x7e0] sm:$0xf0] }
 0x219   :  { %v7337_v45 = vor.u32 %v9115_v42, %v7334_v44  ;;  %v6598_v8 = vld [vmem:[#allocation11 + $0x220] sm:$0xf0] }
 0x21a   :  { %v9091_v9 = vld [vmem:[#allocation11 + $0x704] sm:$0xf] }
 0x21b   :  { %2620 = vmatpush.bf16.msrb.mxu0 %v6373_v47  ;;  %2634 = vmatpush.bf16.msrb.mxu1 %v6629_v49  ;;  %v6374_v47 = vld [vmem:[#allocation11 + $0x60] sm:$0xf0]  ;;  %v7241_v12 = vor.u32 %v9091_v9, %v7238_v11  ;;  %v6796_v11 = vld [vmem:[#allocation11 + $0x388] sm:$0xf] }
 0x21c   :  { %2648 = vmatpush.bf16.msrb.mxu2 %v6885_v52  ;;  %2662 = vmatpush.bf16.msrb.mxu3 %v7141_v25  ;;  %v6377_v40 = vor.u32 %v8875_v46, %v6374_v47  ;;  %v7014_v49 = vld [vmem:[#allocation11 + $0x560] sm:$0xf0] }
 0x21d   :  { %v7017_v41 = vor.u32 %v9035_v48, %v7014_v49  ;;  %v9107_v52 = vld [vmem:[#allocation11 + $0x784] sm:$0xf]  ;;  %v8928_v49 = vld [vmem:[#allocation11 + $0x1e4] sm:$0xf0] }
 0x21e   :  { %v7305_v55 = vor.u32 %v9107_v52, %v7302_v54  ;;  %v6918_v14 = vld [vmem:[#allocation11 + $0x4a0] sm:$0xf0] }
 0x21f   :  { %2621 = vmatpush.bf16.msrb.mxu0 %v6341_v56  ;;  %2635 = vmatpush.bf16.msrb.mxu1 %v6597_v57  ;;  %v8867_v56 = vld [vmem:[#allocation11 + $0x4] sm:$0xf] }
 0x220   :  { %2649 = vmatpush.bf16.msrb.mxu2 %v6853_v16  ;;  %2663 = vmatpush.bf16.msrb.mxu3 %v7109_v37  ;;  %v6342_v57 = vld [vmem:[#allocation11 + $0x20] sm:$0xf0] }
 0x221   :  { %v6345_v59 = vor.u32 %v8867_v56, %v6342_v57  ;;  %v9083_v16 = vld [vmem:[#allocation11 + $0x6c4] sm:$0xf]  ;;  %v6540_v56 = vld [vmem:[#allocation11 + $0x188] sm:$0xf] }
 0x222   :  { %v7206_v17 = vld [vmem:[#allocation11 + $0x6e0] sm:$0xf0]  ;;  %v8920_v57 = vld [vmem:[#allocation11 + $0x1a4] sm:$0xf0] }
 0x223   :  { %2670 = vmatpush.bf16.msra.mxu0 %v6569_v58  ;;  %2684 = vmatpush.bf16.msra.mxu1 %v6825_v60  ;;  %v9027_v58 = vld [vmem:[#allocation11 + $0x504] sm:$0xf]  ;;  %v7209_v18 = vor.u32 %v9083_v16, %v7206_v17  ;;  %v8904_v16 = vld [vmem:[#allocation11 + $0x124] sm:$0xf0] }
 0x224   :  { %2698 = vmatpush.bf16.msra.mxu2 %v7081_v24  ;;  %2712 = vmatpush.bf16.msra.mxu3 %v7337_v45  ;;  %v6982_v60 = vld [vmem:[#allocation11 + $0x520] sm:$0xf0]  ;;  %v9985_v24 = vld [vmem:[#allocation20 + $0x3] ss:$8 sm:$0xf] }
 0x225   :  { %v6985_v61 = vor.u32 %v9027_v58, %v6982_v60  ;;  %v9075_v22 = vld [vmem:[#allocation11 + $0x684] sm:$0xf]  ;;  %v605_v31 = vperm.slane %v9985_v24, 0  ;;  %v608_v17 = vperm.slane %v9985_v24, 3 }
 0x226   :  { %v7174_v23 = vld [vmem:[#allocation11 + $0x6a0] sm:$0xf0] }
 0x227   :  { %2671 = vmatpush.bf16.msra.mxu0 %v6537_v0  ;;  %2685 = vmatpush.bf16.msra.mxu1 %v6793_v1  ;;  %v6633_v0 = vor.u32 %v8939_v62, %v6630_v63  ;;  %v9099_v1 = vld [vmem:[#allocation11 + $0x744] sm:$0xf]  ;;  %v7177_v25 = vor.u32 %v9075_v22, %v7174_v23  ;;  %v607_v62 = vperm.slane %v9985_v24, 2 }
 0x228   :  { %2699 = vmatpush.bf16.msra.mxu2 %v7049_v36  ;;  %2713 = vmatpush.bf16.msra.mxu3 %v7305_v55  ;;  %v7273_v3 = vor.u32 %v9099_v1, %v7270_v2  ;;  %v8995_v26 = vld [vmem:[#allocation11 + $0x404] sm:$0xf]  ;;  %v6828_v1 = vld [vmem:[#allocation11 + $0x3c8] sm:$0xf] }
 0x229   :  { %v6854_v27 = vld [vmem:[#allocation11 + $0x420] sm:$0xf0]  ;;  %v8992_v2 = vld [vmem:[#allocation11 + $0x3e4] sm:$0xf0] }
 0x22a   :  { %v6857_v30 = vor.u32 %v8995_v26, %v6854_v27  ;;  %v7142_v33 = vld [vmem:[#allocation11 + $0x660] sm:$0xf0]  ;;  %v8976_v26 = vld [vmem:[#allocation11 + $0x364] sm:$0xf0] }
 0x22b   :  { %2672 = vmatpush.bf16.msra.mxu0 %v6505_v4  ;;  %2686 = vmatpush.bf16.msra.mxu1 %v6761_v13  ;;  %v9019_v4 = vld [vmem:[#allocation11 + $0x4c4] sm:$0xf] }
 0x22c   :  { %2700 = vmatpush.bf16.msra.mxu2 %v7017_v41  ;;  %v6953_v6 = vor.u32 %v9019_v4, %v6950_v5  ;;  %2714 = vmatpush.bf16.msra.mxu3 %v7273_v3  ;;  %v9011_v13 = vld [vmem:[#allocation11 + $0x484] sm:$0xf]  ;;  %v6508_v3 = vld [vmem:[#allocation11 + $0x148] sm:$0xf] }
 0x22d   :  { %v6921_v15 = vor.u32 %v9011_v13, %v6918_v14  ;;  %v9059_v36 = vld [vmem:[#allocation11 + $0x604] sm:$0xf]  ;;  %v8912_v4 = vld [vmem:[#allocation11 + $0x164] sm:$0xf0] }
 0x22e   :  { %v7110_v37 = vld [vmem:[#allocation11 + $0x620] sm:$0xf0] }
 0x22f   :  { %2673 = vmatpush.bf16.msra.mxu0 %v6473_v7  ;;  %2687 = vmatpush.bf16.msra.mxu1 %v6729_v28  ;;  %v8931_v7 = vld [vmem:[#allocation11 + $0x204] sm:$0xf]  ;;  %v7113_v42 = vor.u32 %v9059_v36, %v7110_v37  ;;  %v6732_v36 = vld [vmem:[#allocation11 + $0x308] sm:$0xf] }
 0x230   :  { %2701 = vmatpush.bf16.msra.mxu2 %v6985_v61  ;;  %v6601_v10 = vor.u32 %v8931_v7, %v6598_v8  ;;  %2715 = vmatpush.bf16.msra.mxu3 %v7241_v12  ;;  %v6829_v8 = vor.u32 %v8992_v2, %v6828_v1  ;;  %v8984_v12 = vld [vmem:[#allocation11 + $0x3a4] sm:$0xf0] }
 0x231   :  { %v8968_v37 = vld [vmem:[#allocation11 + $0x324] sm:$0xf0] }
 0x232   :  { %v6668_v1 = vld [vmem:[#allocation11 + $0x288] sm:$0xf] }
 0x233   :  { %2674 = vmatpush.bf16.msra.mxu0 %v6441_v20  ;;  %2688 = vmatpush.bf16.msra.mxu1 %v6697_v43  ;;  %v6886_v20 = vld [vmem:[#allocation11 + $0x460] sm:$0xf0]  ;;  %v606_v43 = vperm.slane %v9985_v24, 1 }
 0x234   :  { %2702 = vmatpush.bf16.msra.mxu2 %v6953_v6  ;;  %2716 = vmatpush.bf16.msra.mxu3 %v7209_v18  ;;  %v6889_v21 = vor.u32 %v9003_v19, %v6886_v20 }
 0x237   :  { %2675 = vmatpush.bf16.msra.mxu0 %v6409_v32  ;;  %2689 = vmatpush.bf16.msra.mxu1 %v6665_v53  ;;  %v9067_v32 = vld [vmem:[#allocation11 + $0x644] sm:$0xf] }
 0x238   :  { %2703 = vmatpush.bf16.msra.mxu2 %v6921_v15  ;;  %2717 = vmatpush.bf16.msra.mxu3 %v7177_v25  ;;  %v7145_v34 = vor.u32 %v9067_v32, %v7142_v33  ;;  %v6476_v15 = vld [vmem:[#allocation11 + $0x108] sm:$0xf] }
 0x239   :  { %v6477_v23 = vor.u32 %v8904_v16, %v6476_v15  ;;  %v6764_v25 = vld [vmem:[#allocation11 + $0x348] sm:$0xf]  ;;  %v8924_v15 = vld [vmem:[#allocation11 + $0x1cc] sm:$0xf] }
 0x23a   :  { %v8896_v32 = vld [vmem:[#allocation11 + $0xe4] sm:$0xf0]  ;;  %v6574_v16 = vld [vmem:[#allocation11 + $0x1e8] sm:$0xf0] }
 0x23b   :  { %2676 = vmatpush.bf16.msra.mxu0 %v6377_v40  ;;  %2690 = vmatpush.bf16.msra.mxu1 %v6633_v0  ;;  %v6572_v40 = vld [vmem:[#allocation11 + $0x1c8] sm:$0xf]  ;;  %v6541_v0 = vor.u32 %v8920_v57, %v6540_v56 }
 0x23c   :  { %2704 = vmatpush.bf16.msra.mxu2 %v6889_v21  ;;  %2718 = vmatpush.bf16.msra.mxu3 %v7145_v34  ;;  %v6573_v52 = vor.u32 %v8928_v49, %v6572_v40  ;;  %v6797_v21 = vor.u32 %v8984_v12, %v6796_v11  ;;  %v6765_v34 = vor.u32 %v8976_v26, %v6764_v25  ;;  %v7020_v57 = vld [vmem:[#allocation11 + $0x548] sm:$0xf] }
 0x23d   :  { %v6733_v49 = vor.u32 %v8968_v37, %v6732_v36  ;;  %v6348_v11 = vld [vmem:[#allocation11 + $0x8] sm:$0xf]  ;;  %v6830_v36 = vld [vmem:[#allocation11 + $0x3e8] sm:$0xf0] }
 0x23e   :  { %v8872_v12 = vld [vmem:[#allocation11 + $0x24] sm:$0xf0] }
 0x23f   :  { %2677 = vmatpush.bf16.msra.mxu0 %v6345_v59  ;;  %2691 = vmatpush.bf16.msra.mxu1 %v6601_v10  ;;  %v6509_v10 = vor.u32 %v8912_v4, %v6508_v3  ;;  %v8952_v4 = vld [vmem:[#allocation11 + $0x2a4] sm:$0xf0] }
 0x240   :  { %2705 = vmatpush.bf16.msra.mxu2 %v6857_v30  ;;  %2719 = vmatpush.bf16.msra.mxu3 %v7113_v42  ;;  %v6956_v25 = vld [vmem:[#allocation11 + $0x4c8] sm:$0xf] }
 0x241   :  { %v9024_v26 = vld [vmem:[#allocation11 + $0x4e4] sm:$0xf0] }
 0x27e   :  { %v942_v28 = vpop.f32.mrf.mxu0  ;;  %v956_v29 = vpop.f32.mrf.mxu1 }
 0x27f   :  { %v943_v35 = vadd.f32 %v942_v28, %v605_v31  ;;  %v7084_v28 = vld [vmem:[#allocation11 + $0x5c8] sm:$0xf] }
 0x281   :  { %v957_v46 = vadd.f32 %v956_v29, %v943_v35  ;;  %v9056_v29 = vld [vmem:[#allocation11 + $0x5e4] sm:$0xf0] }
 0x282   :  { %v7085_v35 = vor.u32 %v9056_v29, %v7084_v28  ;;  %v8916_v29 = vld [vmem:[#allocation11 + $0x18c] sm:$0xf] }
 0x283   :  { %v1045_v50 = vmax.f32 %v957_v46, 0.0 }
 0x285   :  { %v970_v38 = vpop.f32.mrf.mxu2  ;;  %v984_v39 = vpop.f32.mrf.mxu3 }
 0x286   :  { %v944_v44 = vpop.f32.mrf.mxu0  ;;  %v958_v45 = vpop.f32.mrf.mxu1  ;;  %v971_v41 = vadd.f32 %v970_v38, %v606_v43 }
 0x287   :  { %v945_v47 = vadd.f32 %v944_v44, %v605_v31  ;;  %v6444_v31 = vld [vmem:[#allocation11 + $0xc8] sm:$0xf] }
 0x288   :  { %v985_v58 = vadd.f32 %v984_v39, %v971_v41  ;;  %v6445_v42 = vor.u32 %v8896_v32, %v6444_v31  ;;  %v9048_v44 = vld [vmem:[#allocation11 + $0x5a4] sm:$0xf0] }
 0x289   :  { %v959_v48 = vadd.f32 %v958_v45, %v945_v47  ;;  %v6412_v47 = vld [vmem:[#allocation11 + $0x88] sm:$0xf] }
 0x28a   :  { %v1046_v5 = vmax.f32 %v985_v58, 0.0  ;;  %v6700_v41 = vld [vmem:[#allocation11 + $0x2c8] sm:$0xf] }
 0x28b   :  { %v1049_v51 = vmax.f32 %v959_v48, 0.0  ;;  %v8888_v48 = vld [vmem:[#allocation11 + $0xa4] sm:$0xf0] }
 0x28c   :  { %v6413_v56 = vor.u32 %v8888_v48, %v6412_v47  ;;  %v9040_v58 = vld [vmem:[#allocation11 + $0x564] sm:$0xf0] }
 0x28d   :  { %v9989_v53 = vpack.c.bf16 %v1049_v51, %v1045_v50  ;;  %v972_v54 = vpop.f32.mrf.mxu2  ;;  %v986_v55 = vpop.f32.mrf.mxu3  ;;  %v7021_v3 = vor.u32 %v9040_v58, %v7020_v57  ;;  %v6604_v31 = vld [vmem:[#allocation11 + $0x208] sm:$0xf]  ;;  %v6478_v57 = vld [vmem:[#allocation11 + $0x128] sm:$0xf0] }
 0x28e   :  { %v973_v59 = vadd.f32 %v972_v54, %v606_v43  ;;  %v998_v60 = vpop.f32.mrf.mxu0  ;;  %v1012_v61 = vpop.f32.mrf.mxu1  ;;  %v7052_v43 = vld [vmem:[#allocation11 + $0x588] sm:$0xf] }
 0x28f   :  { %2622 = vmatmul.bf16.vlgmr.msrb.gmra.mxu0 %v9989_v53  ;;  %v999_v7 = vadd.f32 %v998_v60, %v607_v62  ;;  %v7053_v51 = vor.u32 %v9048_v44, %v7052_v43  ;;  %v7340_v54 = vld [vmem:[#allocation11 + $0x7c8] sm:$0xf] }
 0x290   :  { %v987_v63 = vadd.f32 %v986_v55, %v973_v59  ;;  %2726 = vmatpush.bf16.msrb.mxu0 %v6573_v52  ;;  %v8960_v52 = vld [vmem:[#allocation11 + $0x2e4] sm:$0xf0] }
 0x291   :  { %v1013_v19 = vadd.f32 %v1012_v61, %v999_v7  ;;  %v9120_v55 = vld [vmem:[#allocation11 + $0x7e4] sm:$0xf0] }
 0x292   :  { %v1050_v6 = vmax.f32 %v987_v63, 0.0  ;;  %v6380_v61 = vld [vmem:[#allocation11 + $0x48] sm:$0xf]  ;;  %v6701_v63 = vor.u32 %v8960_v52, %v6700_v41  ;;  %v8980_v41 = vld [vmem:[#allocation11 + $0x38c] sm:$0xf] }
 0x293   :  { %v1047_v33 = vmax.f32 %v1013_v19, 0.0  ;;  %v8944_v19 = vld [vmem:[#allocation11 + $0x264] sm:$0xf0] }
 0x294   :  { %v9993_v9 = vpack.c.bf16 %v1050_v6, %v1046_v5  ;;  %2727 = vmatpush.bf16.msrb.mxu0 %v6541_v0  ;;  %v7341_v0 = vor.u32 %v9120_v55, %v7340_v54  ;;  %v7308_v5 = vld [vmem:[#allocation11 + $0x788] sm:$0xf] }
 0x295   :  { %v1026_v13 = vpop.f32.mrf.mxu2  ;;  %v1040_v14 = vpop.f32.mrf.mxu3  ;;  %v9112_v6 = vld [vmem:[#allocation11 + $0x7a4] sm:$0xf0] }
 0x296   :  { %2636 = vmatmul.bf16.vlgmr.msrb.gmra.mxu1 %v9993_v9  ;;  %v1000_v18 = vpop.f32.mrf.mxu0  ;;  %v1014_v22 = vpop.f32.mrf.mxu1  ;;  %v1027_v30 = vadd.f32 %v1026_v13, %v608_v17  ;;  %v6669_v13 = vor.u32 %v8952_v4, %v6668_v1  ;;  %v8936_v32 = vld [vmem:[#allocation11 + $0x224] sm:$0xf0]  ;;  %v8892_v4 = vld [vmem:[#allocation11 + $0xcc] sm:$0xf] }
 0x297   :  { %2740 = vmatpush.bf16.msrb.mxu1 %v6829_v8  ;;  %v1001_v20 = vadd.f32 %v1000_v18, %v607_v62  ;;  %v8880_v62 = vld [vmem:[#allocation11 + $0x64] sm:$0xf0]  ;;  %v6605_v43 = vor.u32 %v8936_v32, %v6604_v31 }
 0x298   :  { %2728 = vmatpush.bf16.msrb.mxu0 %v6509_v10  ;;  %v1041_v45 = vadd.f32 %v1040_v14, %v1027_v30  ;;  %v6381_v7 = vor.u32 %v8880_v62, %v6380_v61  ;;  %v6988_v8 = vld [vmem:[#allocation11 + $0x508] sm:$0xf]  ;;  %v7309_v14 = vor.u32 %v9112_v6, %v7308_v5  ;;  %v6542_v30 = vld [vmem:[#allocation11 + $0x1a8] sm:$0xf0] }
 0x299   :  { %v1015_v27 = vadd.f32 %v1014_v22, %v1001_v20  ;;  %v9032_v10 = vld [vmem:[#allocation11 + $0x524] sm:$0xf0]  ;;  %v6349_v22 = vor.u32 %v8872_v12, %v6348_v11  ;;  %v6545_v37 = vor.u32 %v8916_v29, %v6542_v30  ;;  %v8972_v62 = vld [vmem:[#allocation11 + $0x34c] sm:$0xf] }
 0x29a   :  { %v1048_v59 = vmax.f32 %v1041_v45, 0.0  ;;  %v6989_v18 = vor.u32 %v9032_v10, %v6988_v8  ;;  %v7276_v20 = vld [vmem:[#allocation11 + $0x748] sm:$0xf]  ;;  %v8908_v45 = vld [vmem:[#allocation11 + $0x14c] sm:$0xf] }
 0x29b   :  { %v1051_v24 = vmax.f32 %v1015_v27, 0.0  ;;  %2741 = vmatpush.bf16.msrb.mxu1 %v6797_v21  ;;  %v9104_v21 = vld [vmem:[#allocation11 + $0x764] sm:$0xf0]  ;;  %v6446_v6 = vld [vmem:[#allocation11 + $0xe8] sm:$0xf0] }
 0x29c   :  { %2729 = vmatpush.bf16.msrb.mxu0 %v6477_v23  ;;  %v6577_v23 = vor.u32 %v8924_v15, %v6574_v16  ;;  %v7277_v28 = vor.u32 %v9104_v21, %v7276_v20  ;;  %v7212_v48 = vld [vmem:[#allocation11 + $0x6c8] sm:$0xf]  ;;  %v7086_v8 = vld [vmem:[#allocation11 + $0x5e8] sm:$0xf0]  ;;  %v6449_v16 = vor.u32 %v8892_v4, %v6446_v6  ;;  %v8921_v4 = vld [vmem:[#allocation11 + $0x1ac] sm:$0xf0] }
 0x29d   :  { %v9997_v38 = vpack.c.bf16 %v1051_v24, %v1047_v33  ;;  %v1028_v39 = vpop.f32.mrf.mxu2  ;;  %v1042_v40 = vpop.f32.mrf.mxu3  ;;  %v7244_v33 = vld [vmem:[#allocation11 + $0x708] sm:$0xf]  ;;  %v6734_v15 = vld [vmem:[#allocation11 + $0x328] sm:$0xf0] }
 0x29e   :  { %v1029_v46 = vadd.f32 %v1028_v39, %v608_v17  ;;  %v6636_v17 = vld [vmem:[#allocation11 + $0x248] sm:$0xf]  ;;  %v6414_v20 = vld [vmem:[#allocation11 + $0xa8] sm:$0xf0] }
 0x29f   :  { %2742 = vmatpush.bf16.msrb.mxu1 %v6765_v34  ;;  %2650 = vmatmul.bf16.vlgmr.msrb.gmra.mxu2 %v9997_v38  ;;  %v6637_v27 = vor.u32 %v8944_v19, %v6636_v17  ;;  %v9096_v24 = vld [vmem:[#allocation11 + $0x724] sm:$0xf0]  ;;  %v6957_v34 = vor.u32 %v9024_v26, %v6956_v25  ;;  %v9044_v21 = vld [vmem:[#allocation11 + $0x58c] sm:$0xf] }
 0x2a0   :  { %v1043_v50 = vadd.f32 %v1042_v40, %v1029_v46  ;;  %2678 = vmatmul.bf16.vlgmr.msra.gmra.mxu0 %v9989_v53  ;;  %2754 = vmatpush.bf16.msrb.mxu2 %v7085_v35  ;;  %v8988_v35 = vld [vmem:[#allocation11 + $0x3cc] sm:$0xf]  ;;  %v6924_v39 = vld [vmem:[#allocation11 + $0x488] sm:$0xf]  ;;  %v7245_v44 = vor.u32 %v9096_v24, %v7244_v33 }
 0x2a1   :  { %2730 = vmatpush.bf16.msrb.mxu0 %v6445_v42  ;;  %v9016_v42 = vld [vmem:[#allocation11 + $0x4a4] sm:$0xf0]  ;;  %v6510_v46 = vld [vmem:[#allocation11 + $0x168] sm:$0xf0]  ;;  %v6833_v47 = vor.u32 %v8988_v35, %v6830_v36 }
 0x2a2   :  { %v1052_v60 = vmax.f32 %v1043_v50, 0.0  ;;  %v9088_v40 = vld [vmem:[#allocation11 + $0x6e4] sm:$0xf0]  ;;  %v6798_v50 = vld [vmem:[#allocation11 + $0x3a8] sm:$0xf0] }
 0x2a3   :  { %2743 = vmatpush.bf16.msrb.mxu1 %v6733_v49  ;;  %v6925_v49 = vor.u32 %v9016_v42, %v6924_v39  ;;  %v6892_v52 = vld [vmem:[#allocation11 + $0x448] sm:$0xf]  ;;  %v7213_v55 = vor.u32 %v9088_v40, %v7212_v48  ;;  %v6801_v58 = vor.u32 %v8980_v41, %v6798_v50  ;;  %v9116_v29 = vld [vmem:[#allocation11 + $0x7cc] sm:$0xf] }
 0x2a4   :  { %v10001_v2 = vpack.c.bf16 %v1052_v60, %v1048_v59  ;;  %2755 = vmatpush.bf16.msrb.mxu2 %v7053_v51  ;;  %v6513_v51 = vor.u32 %v8908_v45, %v6510_v46  ;;  %v9008_v54 = vld [vmem:[#allocation11 + $0x464] sm:$0xf0]  ;;  %v7342_v30 = vld [vmem:[#allocation11 + $0x7e8] sm:$0xf0] }
 0x2a5   :  { %2731 = vmatpush.bf16.msrb.mxu0 %v6413_v56  ;;  %v8900_v56 = vld [vmem:[#allocation11 + $0x10c] sm:$0xf]  ;;  %v7180_v59 = vld [vmem:[#allocation11 + $0x688] sm:$0xf]  ;;  %v6893_v61 = vor.u32 %v9008_v54, %v6892_v52  ;;  %v7345_v39 = vor.u32 %v9116_v29, %v7342_v30  ;;  %v6580_v52 = vld [vmem:[#allocation11 + $0x1d0] sm:$0xf] }
 0x2a6   :  { %2664 = vmatmul.bf16.vlgmr.msrb.gmra.mxu3 %v10001_v2  ;;  %2692 = vmatmul.bf16.vlgmr.msra.gmra.mxu1 %v9993_v9  ;;  %v9080_v60 = vld [vmem:[#allocation11 + $0x6a4] sm:$0xf0]  ;;  %v8876_v33 = vld [vmem:[#allocation11 + $0x4c] sm:$0xf]  ;;  %v8929_v54 = vld [vmem:[#allocation11 + $0x1ec] sm:$0xf0] }
 0x2a7   :  { %2744 = vmatpush.bf16.msrb.mxu1 %v6701_v63  ;;  %2768 = vmatpush.bf16.msrb.mxu3 %v7341_v0  ;;  %v6766_v63 = vld [vmem:[#allocation11 + $0x368] sm:$0xf0]  ;;  %v6481_v0 = vor.u32 %v8900_v56, %v6478_v57  ;;  %v6860_v1 = vld [vmem:[#allocation11 + $0x408] sm:$0xf]  ;;  %v7181_v5 = vor.u32 %v9080_v60, %v7180_v59 }
 0x2a8   :  { %2756 = vmatpush.bf16.msrb.mxu2 %v7021_v3  ;;  %v9000_v3 = vld [vmem:[#allocation11 + $0x424] sm:$0xf0]  ;;  %v6769_v10 = vor.u32 %v8972_v62, %v6766_v63  ;;  %v9036_v35 = vld [vmem:[#allocation11 + $0x54c] sm:$0xf] }
 0x2a9   :  { %2732 = vmatpush.bf16.msrb.mxu0 %v6381_v7  ;;  %v9052_v7 = vld [vmem:[#allocation11 + $0x5cc] sm:$0xf]  ;;  %v7148_v11 = vld [vmem:[#allocation11 + $0x648] sm:$0xf] }
 0x2aa   :  { %v9072_v12 = vld [vmem:[#allocation11 + $0x664] sm:$0xf0]  ;;  %v7089_v17 = vor.u32 %v9052_v7, %v7086_v8  ;;  %v7022_v36 = vld [vmem:[#allocation11 + $0x568] sm:$0xf0] }
 0x2ab   :  { %2745 = vmatpush.bf16.msrb.mxu1 %v6669_v13  ;;  %2769 = vmatpush.bf16.msrb.mxu3 %v7309_v14  ;;  %v6861_v13 = vor.u32 %v9000_v3, %v6860_v1  ;;  %v8964_v14 = vld [vmem:[#allocation11 + $0x30c] sm:$0xf]  ;;  %v7149_v19 = vor.u32 %v9072_v12, %v7148_v11  ;;  %v7116_v25 = vld [vmem:[#allocation11 + $0x608] sm:$0xf]  ;;  %v6548_v3 = vld [vmem:[#allocation11 + $0x190] sm:$0xf] }
 0x2ac   :  { %2757 = vmatpush.bf16.msrb.mxu2 %v6989_v18  ;;  %v8884_v18 = vld [vmem:[#allocation11 + $0x8c] sm:$0xf]  ;;  %v9064_v26 = vld [vmem:[#allocation11 + $0x624] sm:$0xf0]  ;;  %v6836_v11 = vld [vmem:[#allocation11 + $0x3d0] sm:$0xf] }
 0x2ad   :  { %2733 = vmatpush.bf16.msrb.mxu0 %v6349_v22  ;;  %v7054_v22 = vld [vmem:[#allocation11 + $0x5a8] sm:$0xf0]  ;;  %v6417_v31 = vor.u32 %v8884_v18, %v6414_v20  ;;  %v7117_v24 = vor.u32 %v9064_v26, %v7116_v25  ;;  %v8993_v12 = vld [vmem:[#allocation11 + $0x3ec] sm:$0xf0] }
 0x2ae   :  { %v7057_v32 = vor.u32 %v9044_v21, %v7054_v22  ;;  %v8948_v42 = vld [vmem:[#allocation11 + $0x28c] sm:$0xf]  ;;  %v6516_v18 = vld [vmem:[#allocation11 + $0x150] sm:$0xf]  ;;  %v6837_v20 = vor.u32 %v8993_v12, %v6836_v11 }
 0x2af   :  { %2746 = vmatpush.bf16.msrb.mxu1 %v6637_v27  ;;  %2770 = vmatpush.bf16.msrb.mxu3 %v7277_v28  ;;  %v8956_v27 = vld [vmem:[#allocation11 + $0x2cc] sm:$0xf]  ;;  %v6804_v25 = vld [vmem:[#allocation11 + $0x390] sm:$0xf] }
 0x2b0   :  { %2706 = vmatmul.bf16.vlgmr.msra.gmra.mxu2 %v9997_v38  ;;  %2734 = vmatmul.bf16.vlgmr.msrb.gmra.mxu0 %v9989_v53  ;;  %v6702_v28 = vld [vmem:[#allocation11 + $0x2e8] sm:$0xf0]  ;;  %v8985_v26 = vld [vmem:[#allocation11 + $0x3ac] sm:$0xf0] }
 0x2b1   :  { %2782 = vmatpush.bf16.msra.mxu0 %v6577_v23  ;;  %2758 = vmatpush.bf16.msrb.mxu2 %v6957_v34  ;;  %v6737_v23 = vor.u32 %v8964_v14, %v6734_v15  ;;  %v6382_v34 = vld [vmem:[#allocation11 + $0x68] sm:$0xf0] }
 0x2b2   :  { %v7310_v45 = vld [vmem:[#allocation11 + $0x7a8] sm:$0xf0]  ;;  %v6385_v46 = vor.u32 %v8876_v33, %v6382_v34  ;;  %v6805_v33 = vor.u32 %v8985_v26, %v6804_v25  ;;  %v9033_v25 = vld [vmem:[#allocation11 + $0x52c] sm:$0xf0] }
 0x2b3   :  { %2747 = vmatpush.bf16.msrb.mxu1 %v6605_v43  ;;  %2771 = vmatpush.bf16.msrb.mxu3 %v7245_v44  ;;  %v6670_v43 = vld [vmem:[#allocation11 + $0x2a8] sm:$0xf0] }
 0x2b4   :  { %v9108_v44 = vld [vmem:[#allocation11 + $0x78c] sm:$0xf]  ;;  %v6673_v50 = vor.u32 %v8948_v42, %v6670_v43 }
 0x2b5   :  { %2783 = vmatpush.bf16.msra.mxu0 %v6545_v37  ;;  %2759 = vmatpush.bf16.msrb.mxu2 %v6925_v49  ;;  %v6705_v37 = vor.u32 %v8956_v27, %v6702_v28  ;;  %v8868_v48 = vld [vmem:[#allocation11 + $0xc] sm:$0xf] }
 0x2b6   :  { %2720 = vmatmul.bf16.vlgmr.msra.gmra.mxu3 %v10001_v2  ;;  %2748 = vmatmul.bf16.vlgmr.msrb.gmra.mxu1 %v9993_v9  ;;  %v6350_v40 = vld [vmem:[#allocation11 + $0x28] sm:$0xf0] }
 0x2b7   :  { %2796 = vmatpush.bf16.msra.mxu1 %v6833_v47  ;;  %2772 = vmatpush.bf16.msrb.mxu3 %v7213_v55  ;;  %v7025_v47 = vor.u32 %v9036_v35, %v7022_v36  ;;  %v9028_v49 = vld [vmem:[#allocation11 + $0x50c] sm:$0xf]  ;;  %v6353_v59 = vor.u32 %v8868_v48, %v6350_v40  ;;  %v6772_v36 = vld [vmem:[#allocation11 + $0x350] sm:$0xf] }
 0x2b8   :  { %v6990_v41 = vld [vmem:[#allocation11 + $0x528] sm:$0xf0]  ;;  %v9057_v48 = vld [vmem:[#allocation11 + $0x5ec] sm:$0xf0] }
 0x2b9   :  { %2784 = vmatpush.bf16.msra.mxu0 %v6513_v51  ;;  %2760 = vmatpush.bf16.msrb.mxu2 %v6893_v61  ;;  %v7313_v51 = vor.u32 %v9108_v44, %v7310_v45  ;;  %v8940_v55 = vld [vmem:[#allocation11 + $0x24c] sm:$0xf]  ;;  %v6993_v60 = vor.u32 %v9028_v49, %v6990_v41  ;;  %v6581_v61 = vor.u32 %v8929_v54, %v6580_v52  ;;  %v6452_v44 = vld [vmem:[#allocation11 + $0xd0] sm:$0xf] }
 0x2ba   :  { %v6638_v56 = vld [vmem:[#allocation11 + $0x268] sm:$0xf0]  ;;  %v8969_v52 = vld [vmem:[#allocation11 + $0x32c] sm:$0xf0] }
 0x2bb   :  { %2797 = vmatpush.bf16.msra.mxu1 %v6801_v58  ;;  %2773 = vmatpush.bf16.msrb.mxu3 %v7181_v5  ;;  %v9100_v57 = vld [vmem:[#allocation11 + $0x74c] sm:$0xf] }
 0x2bc   :  { %v7278_v58 = vld [vmem:[#allocation11 + $0x768] sm:$0xf0] }
 0x2bd   :  { %2785 = vmatpush.bf16.msra.mxu0 %v6481_v0  ;;  %2761 = vmatpush.bf16.msrb.mxu2 %v6861_v13  ;;  %v9020_v62 = vld [vmem:[#allocation11 + $0x4cc] sm:$0xf]  ;;  %v6641_v0 = vor.u32 %v8940_v55, %v6638_v56  ;;  %v7281_v1 = vor.u32 %v9100_v57, %v7278_v58  ;;  %v6549_v13 = vor.u32 %v8921_v4, %v6548_v3  ;;  %v6420_v56 = vld [vmem:[#allocation11 + $0x90] sm:$0xf] }
 0x2be   :  { %v6958_v63 = vld [vmem:[#allocation11 + $0x4e8] sm:$0xf0]  ;;  %v8889_v58 = vld [vmem:[#allocation11 + $0xac] sm:$0xf0] }
 0x2bf   :  { %2798 = vmatpush.bf16.msra.mxu1 %v6769_v10  ;;  %2774 = vmatpush.bf16.msrb.mxu3 %v7149_v19  ;;  %v8932_v5 = vld [vmem:[#allocation11 + $0x20c] sm:$0xf]  ;;  %v6961_v10 = vor.u32 %v9020_v62, %v6958_v63  ;;  %v8913_v19 = vld [vmem:[#allocation11 + $0x16c] sm:$0xf0] }
 0x2c0   :  { %2762 = vmatmul.bf16.vlgmr.msrb.gmra.mxu2 %v9997_v38  ;;  %v6606_v6 = vld [vmem:[#allocation11 + $0x228] sm:$0xf0]  ;;  %v6517_v27 = vor.u32 %v8913_v19, %v6516_v18  ;;  %v7348_v3 = vld [vmem:[#allocation11 + $0x7d0] sm:$0xf] }
 0x2c1   :  { %2786 = vmatpush.bf16.msra.mxu0 %v6449_v16  ;;  %2810 = vmatpush.bf16.msra.mxu2 %v7089_v17  ;;  %v9092_v7 = vld [vmem:[#allocation11 + $0x70c] sm:$0xf]  ;;  %v6609_v16 = vor.u32 %v8932_v5, %v6606_v6  ;;  %v9121_v4 = vld [vmem:[#allocation11 + $0x7ec] sm:$0xf0]  ;;  %v6421_v5 = vor.u32 %v8889_v58, %v6420_v56  ;;  %v8909_v56 = vld [vmem:[#allocation11 + $0x154] sm:$0xf] }
 0x2c2   :  { %v7246_v8 = vld [vmem:[#allocation11 + $0x728] sm:$0xf0]  ;;  %v7349_v12 = vor.u32 %v9121_v4, %v7348_v3  ;;  %v9113_v18 = vld [vmem:[#allocation11 + $0x7ac] sm:$0xf0]  ;;  %v6518_v58 = vld [vmem:[#allocation11 + $0x170] sm:$0xf0] }
 0x2c3   :  { %2799 = vmatpush.bf16.msra.mxu1 %v6737_v23  ;;  %2775 = vmatpush.bf16.msrb.mxu3 %v7117_v24  ;;  %v9012_v14 = vld [vmem:[#allocation11 + $0x48c] sm:$0xf]  ;;  %v7249_v17 = vor.u32 %v9092_v7, %v7246_v8  ;;  %v6388_v8 = vld [vmem:[#allocation11 + $0x50] sm:$0xf] }
 0x2c4   :  { %v6926_v15 = vld [vmem:[#allocation11 + $0x4a8] sm:$0xf0]  ;;  %v6900_v3 = vld [vmem:[#allocation11 + $0x450] sm:$0xf] }
 0x2c5   :  { %2787 = vmatpush.bf16.msra.mxu0 %v6417_v31  ;;  %2811 = vmatpush.bf16.msra.mxu2 %v7057_v32  ;;  %v9084_v21 = vld [vmem:[#allocation11 + $0x6cc] sm:$0xf]  ;;  %v6929_v23 = vor.u32 %v9012_v14, %v6926_v15  ;;  %v6484_v31 = vld [vmem:[#allocation11 + $0x110] sm:$0xf] }
 0x2c6   :  { %2776 = vmatmul.bf16.vlgmr.msrb.gmra.mxu3 %v10001_v2  ;;  %v7214_v22 = vld [vmem:[#allocation11 + $0x6e8] sm:$0xf0]  ;;  %v8905_v32 = vld [vmem:[#allocation11 + $0x12c] sm:$0xf0] }
 0x2c7   :  { %2800 = vmatpush.bf16.msra.mxu1 %v6705_v37  ;;  %2824 = vmatpush.bf16.msra.mxu3 %v7345_v39  ;;  %v9004_v28 = vld [vmem:[#allocation11 + $0x44c] sm:$0xf]  ;;  %v7217_v30 = vor.u32 %v9084_v21, %v7214_v22  ;;  %v8977_v37 = vld [vmem:[#allocation11 + $0x36c] sm:$0xf0]  ;;  %v6485_v39 = vor.u32 %v8905_v32, %v6484_v31 }
 0x2c8   :  { %v6894_v29 = vld [vmem:[#allocation11 + $0x468] sm:$0xf0]  ;;  %v6773_v40 = vor.u32 %v8977_v37, %v6772_v36  ;;  %v9041_v14 = vld [vmem:[#allocation11 + $0x56c] sm:$0xf0] }
 0x2c9   :  { %2788 = vmatpush.bf16.msra.mxu0 %v6385_v46  ;;  %2812 = vmatpush.bf16.msra.mxu2 %v7025_v47  ;;  %v9076_v24 = vld [vmem:[#allocation11 + $0x68c] sm:$0xf]  ;;  %v6897_v35 = vor.u32 %v9004_v28, %v6894_v29  ;;  %v8897_v46 = vld [vmem:[#allocation11 + $0xec] sm:$0xf0]  ;;  %v8925_v28 = vld [vmem:[#allocation11 + $0x1d4] sm:$0xf] }
 0x2ca   :  { %v7182_v34 = vld [vmem:[#allocation11 + $0x6a8] sm:$0xf0]  ;;  %v7092_v47 = vld [vmem:[#allocation11 + $0x5d0] sm:$0xf]  ;;  %v6453_v54 = vor.u32 %v8897_v46, %v6452_v44  ;;  %v6582_v29 = vld [vmem:[#allocation11 + $0x1f0] sm:$0xf0] }
 0x2cb   :  { %2801 = vmatpush.bf16.msra.mxu1 %v6673_v50  ;;  %2825 = vmatpush.bf16.msra.mxu3 %v7313_v51  ;;  %v8996_v42 = vld [vmem:[#allocation11 + $0x40c] sm:$0xf]  ;;  %v7185_v45 = vor.u32 %v9076_v24, %v7182_v34  ;;  %v6740_v51 = vld [vmem:[#allocation11 + $0x310] sm:$0xf]  ;;  %v7093_v55 = vor.u32 %v9057_v48, %v7092_v47  ;;  %v6550_v44 = vld [vmem:[#allocation11 + $0x1b0] sm:$0xf0] }
 0x2cc   :  { %v6862_v43 = vld [vmem:[#allocation11 + $0x428] sm:$0xf0]  ;;  %v6676_v15 = vld [vmem:[#allocation11 + $0x290] sm:$0xf] }
 0x2cd   :  { %2789 = vmatpush.bf16.msra.mxu0 %v6353_v59  ;;  %2813 = vmatpush.bf16.msra.mxu2 %v6993_v60  ;;  %v9068_v49 = vld [vmem:[#allocation11 + $0x64c] sm:$0xf]  ;;  %v6865_v50 = vor.u32 %v8996_v42, %v6862_v43  ;;  %v7060_v59 = vld [vmem:[#allocation11 + $0x590] sm:$0xf]  ;;  %v8917_v43 = vld [vmem:[#allocation11 + $0x194] sm:$0xf] }
 0x2ce   :  { %v7150_v41 = vld [vmem:[#allocation11 + $0x668] sm:$0xf0]  ;;  %v9049_v60 = vld [vmem:[#allocation11 + $0x5ac] sm:$0xf0] }
 0x2cf   :  { %2802 = vmatpush.bf16.msra.mxu1 %v6641_v0  ;;  %2826 = vmatpush.bf16.msra.mxu3 %v7281_v1  ;;  %v7153_v57 = vor.u32 %v9068_v49, %v7150_v41  ;;  %v9060_v62 = vld [vmem:[#allocation11 + $0x60c] sm:$0xf]  ;;  %v6708_v0 = vld [vmem:[#allocation11 + $0x2d0] sm:$0xf]  ;;  %v7061_v6 = vor.u32 %v9049_v60, %v7060_v59  ;;  %v6838_v49 = vld [vmem:[#allocation11 + $0x3f0] sm:$0xf0] }
 0x2d0   :  { %2790 = vmatmul.bf16.vlgmr.msra.gmra.mxu0 %v9989_v53  ;;  %v7118_v63 = vld [vmem:[#allocation11 + $0x628] sm:$0xf0]  ;;  %v8961_v1 = vld [vmem:[#allocation11 + $0x2ec] sm:$0xf0] }
 0x2d1   :  { %2838 = vmatpush.bf16.msrb.mxu0 %v6581_v61  ;;  %2814 = vmatpush.bf16.msra.mxu2 %v6961_v10  ;;  %v6741_v61 = vor.u32 %v8969_v52, %v6740_v51  ;;  %v7121_v7 = vor.u32 %v9060_v62, %v7118_v63  ;;  %v8881_v10 = vld [vmem:[#allocation11 + $0x6c] sm:$0xf0]  ;;  %v6709_v11 = vor.u32 %v8961_v1, %v6708_v0  ;;  %v6806_v62 = vld [vmem:[#allocation11 + $0x3b0] sm:$0xf0] }
 0x2d2   :  { %v6389_v19 = vor.u32 %v8881_v10, %v6388_v8  ;;  %v8873_v22 = vld [vmem:[#allocation11 + $0x2c] sm:$0xf0]  ;;  %v6521_v0 = vor.u32 %v8909_v56, %v6518_v58  ;;  %v7318_v56 = vld [vmem:[#allocation11 + $0x7b0] sm:$0xf0] }
 0x2d3   :  { %2803 = vmatpush.bf16.msra.mxu1 %v6609_v16  ;;  %2827 = vmatpush.bf16.msra.mxu3 %v7249_v17  ;;  %v8953_v16 = vld [vmem:[#allocation11 + $0x2ac] sm:$0xf0]  ;;  %v8869_v58 = vld [vmem:[#allocation11 + $0x14] sm:$0xf] }
 0x2d4   :  { %v7316_v17 = vld [vmem:[#allocation11 + $0x790] sm:$0xf]  ;;  %v6677_v26 = vor.u32 %v8953_v16, %v6676_v15 }
 0x2d5   :  { %2839 = vmatpush.bf16.msrb.mxu0 %v6549_v13  ;;  %2815 = vmatpush.bf16.msra.mxu2 %v6929_v23  ;;  %v7028_v13 = vld [vmem:[#allocation11 + $0x550] sm:$0xf] }
 0x2d6   :  { %2804 = vmatmul.bf16.vlgmr.msra.gmra.mxu1 %v9993_v9  ;;  %v7029_v21 = vor.u32 %v9041_v14, %v7028_v13  ;;  %v6996_v23 = vld [vmem:[#allocation11 + $0x510] sm:$0xf] }
 0x2d7   :  { %2852 = vmatpush.bf16.msrb.mxu1 %v6837_v20  ;;  %2828 = vmatpush.bf16.msra.mxu3 %v7217_v30  ;;  %v6356_v20 = vld [vmem:[#allocation11 + $0x10] sm:$0xf]  ;;  %v6997_v34 = vor.u32 %v9033_v25, %v6996_v23 }
 0x2d8   :  { %v6644_v30 = vld [vmem:[#allocation11 + $0x250] sm:$0xf]  ;;  %v6357_v24 = vor.u32 %v8873_v22, %v6356_v20  ;;  %v7094_v22 = vld [vmem:[#allocation11 + $0x5f0] sm:$0xf0] }
 0x2d9   :  { %2840 = vmatpush.bf16.msrb.mxu0 %v6517_v27  ;;  %2816 = vmatpush.bf16.msra.mxu2 %v6897_v35  ;;  %v7317_v27 = vor.u32 %v9113_v18, %v7316_v17  ;;  %v8945_v31 = vld [vmem:[#allocation11 + $0x26c] sm:$0xf0]  ;;  %v6585_v35 = vor.u32 %v8925_v28, %v6582_v29  ;;  %v8893_v18 = vld [vmem:[#allocation11 + $0xd4] sm:$0xf] }
 0x2da   :  { %v7284_v32 = vld [vmem:[#allocation11 + $0x750] sm:$0xf] }
 0x2db   :  { %2853 = vmatpush.bf16.msrb.mxu1 %v6805_v33  ;;  %2829 = vmatpush.bf16.msra.mxu3 %v7185_v45  ;;  %v9105_v33 = vld [vmem:[#allocation11 + $0x76c] sm:$0xf0] }
 0x2dc   :  { %v6964_v36 = vld [vmem:[#allocation11 + $0x4d0] sm:$0xf]  ;;  %v7285_v42 = vor.u32 %v9105_v33, %v7284_v32  ;;  %v6422_v32 = vld [vmem:[#allocation11 + $0xb0] sm:$0xf0] }
 0x2dd   :  { %2841 = vmatpush.bf16.msrb.mxu0 %v6485_v39  ;;  %2817 = vmatpush.bf16.msra.mxu2 %v6865_v50  ;;  %v9025_v37 = vld [vmem:[#allocation11 + $0x4ec] sm:$0xf0]  ;;  %v6645_v39 = vor.u32 %v8945_v31, %v6644_v30  ;;  %v6553_v50 = vor.u32 %v8917_v43, %v6550_v44  ;;  %v8885_v31 = vld [vmem:[#allocation11 + $0x94] sm:$0xf] }
 0x2de   :  { %v6612_v45 = vld [vmem:[#allocation11 + $0x210] sm:$0xf]  ;;  %v6965_v41 = vor.u32 %v9025_v37, %v6964_v36  ;;  %v9117_v43 = vld [vmem:[#allocation11 + $0x7d4] sm:$0xf] }
 0x2df   :  { %2854 = vmatpush.bf16.msrb.mxu1 %v6773_v40  ;;  %2830 = vmatpush.bf16.msra.mxu3 %v7153_v57  ;;  %v8937_v46 = vld [vmem:[#allocation11 + $0x22c] sm:$0xf0]  ;;  %v8989_v40 = vld [vmem:[#allocation11 + $0x3d4] sm:$0xf] }
 0x2e0   :  { %2818 = vmatmul.bf16.vlgmr.msra.gmra.mxu2 %v9997_v38  ;;  %v7252_v47 = vld [vmem:[#allocation11 + $0x710] sm:$0xf]  ;;  %v6613_v51 = vor.u32 %v8937_v46, %v6612_v45  ;;  %v6841_v57 = vor.u32 %v8989_v40, %v6838_v49  ;;  %v7350_v44 = vld [vmem:[#allocation11 + $0x7f0] sm:$0xf0]  ;;  %v6425_v45 = vor.u32 %v8885_v31, %v6422_v32  ;;  %v6524_v31 = vld [vmem:[#allocation11 + $0x158] sm:$0xf] }
 0x2e1   :  { %2842 = vmatpush.bf16.msrb.mxu0 %v6453_v54  ;;  %2866 = vmatpush.bf16.msrb.mxu2 %v7093_v55  ;;  %v9097_v48 = vld [vmem:[#allocation11 + $0x72c] sm:$0xf0]  ;;  %v8877_v40 = vld [vmem:[#allocation11 + $0x54] sm:$0xf] }
 0x2e2   :  { %v7253_v52 = vor.u32 %v9097_v48, %v7252_v47  ;;  %v6932_v54 = vld [vmem:[#allocation11 + $0x490] sm:$0xf]  ;;  %v6390_v49 = vld [vmem:[#allocation11 + $0x70] sm:$0xf0] }
 0x2e3   :  { %2855 = vmatpush.bf16.msrb.mxu1 %v6741_v61  ;;  %2831 = vmatpush.bf16.msra.mxu3 %v7121_v7  ;;  %v9017_v55 = vld [vmem:[#allocation11 + $0x4ac] sm:$0xf0]  ;;  %v8981_v61 = vld [vmem:[#allocation11 + $0x394] sm:$0xf] }
 0x2e4   :  { %v7220_v59 = vld [vmem:[#allocation11 + $0x6d0] sm:$0xf]  ;;  %v6933_v63 = vor.u32 %v9017_v55, %v6932_v54  ;;  %v6486_v7 = vld [vmem:[#allocation11 + $0x130] sm:$0xf0] }
 0x2e5   :  { %2843 = vmatpush.bf16.msrb.mxu0 %v6421_v5  ;;  %2867 = vmatpush.bf16.msrb.mxu2 %v7061_v6  ;;  %v9089_v60 = vld [vmem:[#allocation11 + $0x6ec] sm:$0xf0]  ;;  %v8901_v5 = vld [vmem:[#allocation11 + $0x114] sm:$0xf]  ;;  %v6809_v6 = vor.u32 %v8981_v61, %v6806_v62 }
 0x2e6   :  { %2832 = vmatmul.bf16.vlgmr.msra.gmra.mxu3 %v10001_v2  ;;  %v7221_v1 = vor.u32 %v9089_v60, %v7220_v59  ;;  %v9009_v4 = vld [vmem:[#allocation11 + $0x46c] sm:$0xf0]  ;;  %v6489_v15 = vor.u32 %v8901_v5, %v6486_v7  ;;  %v6678_v54 = vld [vmem:[#allocation11 + $0x2b0] sm:$0xf0] }
 0x2e7   :  { %2856 = vmatpush.bf16.msrb.mxu1 %v6709_v11  ;;  %2880 = vmatpush.bf16.msrb.mxu3 %v7349_v12  ;;  %v7188_v8 = vld [vmem:[#allocation11 + $0x690] sm:$0xf]  ;;  %v8973_v11 = vld [vmem:[#allocation11 + $0x354] sm:$0xf]  ;;  %v6901_v13 = vor.u32 %v9009_v4, %v6900_v3  ;;  %v8930_v3 = vld [vmem:[#allocation11 + $0x1f4] sm:$0xf0] }
 0x2e8   :  { %v9081_v10 = vld [vmem:[#allocation11 + $0x6ac] sm:$0xf0]  ;;  %v6774_v12 = vld [vmem:[#allocation11 + $0x370] sm:$0xf0] }
 0x2e9   :  { %2844 = vmatpush.bf16.msrb.mxu0 %v6389_v19  ;;  %2868 = vmatpush.bf16.msrb.mxu2 %v7029_v21  ;;  %v6868_v14 = vld [vmem:[#allocation11 + $0x410] sm:$0xf]  ;;  %v7189_v16 = vor.u32 %v9081_v10, %v7188_v8  ;;  %v6454_v19 = vld [vmem:[#allocation11 + $0xf0] sm:$0xf0]  ;;  %v6777_v20 = vor.u32 %v8973_v11, %v6774_v12 }
 0x2ea   :  { %v9001_v17 = vld [vmem:[#allocation11 + $0x42c] sm:$0xf0]  ;;  %v9053_v21 = vld [vmem:[#allocation11 + $0x5d4] sm:$0xf]  ;;  %v6457_v29 = vor.u32 %v8893_v18, %v6454_v19 }
 0x2eb   :  { %2857 = vmatpush.bf16.msrb.mxu1 %v6677_v26  ;;  %2881 = vmatpush.bf16.msrb.mxu3 %v7317_v27  ;;  %v7156_v23 = vld [vmem:[#allocation11 + $0x650] sm:$0xf]  ;;  %v8965_v26 = vld [vmem:[#allocation11 + $0x314] sm:$0xf]  ;;  %v6869_v28 = vor.u32 %v9001_v17, %v6868_v14  ;;  %v7097_v30 = vor.u32 %v9053_v21, %v7094_v22  ;;  %v8922_v17 = vld [vmem:[#allocation11 + $0x1b4] sm:$0xf0] }
 0x2ec   :  { %v9073_v25 = vld [vmem:[#allocation11 + $0x66c] sm:$0xf0]  ;;  %v6742_v27 = vld [vmem:[#allocation11 + $0x330] sm:$0xf0]  ;;  %v6844_v22 = vld [vmem:[#allocation11 + $0x3d8] sm:$0xf] }
 0x2ed   :  { %2845 = vmatpush.bf16.msrb.mxu0 %v6357_v24  ;;  %2869 = vmatpush.bf16.msrb.mxu2 %v6997_v34  ;;  %v7157_v33 = vor.u32 %v9073_v25, %v7156_v23  ;;  %v6745_v24 = vor.u32 %v8965_v26, %v6742_v27  ;;  %v9045_v34 = vld [vmem:[#allocation11 + $0x594] sm:$0xf]  ;;  %v7124_v36 = vld [vmem:[#allocation11 + $0x610] sm:$0xf]  ;;  %v8994_v23 = vld [vmem:[#allocation11 + $0x3f4] sm:$0xf0] }
 0x2ee   :  { %v9065_v37 = vld [vmem:[#allocation11 + $0x62c] sm:$0xf0]  ;;  %v9109_v55 = vld [vmem:[#allocation11 + $0x794] sm:$0xf]  ;;  %v6845_v32 = vor.u32 %v8994_v23, %v6844_v22  ;;  %v6396_v22 = vld [vmem:[#allocation11 + $0x58] sm:$0xf] }
 0x2ef   :  { %2858 = vmatpush.bf16.msrb.mxu1 %v6645_v39  ;;  %2882 = vmatpush.bf16.msrb.mxu3 %v7285_v42  ;;  %v8957_v39 = vld [vmem:[#allocation11 + $0x2d4] sm:$0xf]  ;;  %v7125_v47 = vor.u32 %v9065_v37, %v7124_v36  ;;  %v8986_v36 = vld [vmem:[#allocation11 + $0x3b4] sm:$0xf0] }
 0x2f0   :  { %2846 = vmatmul.bf16.vlgmr.msrb.gmra.mxu0 %v9989_v53  ;;  %v6710_v42 = vld [vmem:[#allocation11 + $0x2f0] sm:$0xf0]  ;;  %v8882_v23 = vld [vmem:[#allocation11 + $0x74] sm:$0xf0] }
 0x2f1   :  { %2894 = vmatpush.bf16.msra.mxu0 %v6585_v35  ;;  %2870 = vmatpush.bf16.msrb.mxu2 %v6965_v41  ;;  %v7062_v35 = vld [vmem:[#allocation11 + $0x5b0] sm:$0xf0]  ;;  %v6713_v48 = vor.u32 %v8957_v39, %v6710_v42 }
 0x2f2   :  { %v7065_v46 = vor.u32 %v9045_v34, %v7062_v35  ;;  %v9037_v41 = vld [vmem:[#allocation11 + $0x554] sm:$0xf]  ;;  %v6812_v35 = vld [vmem:[#allocation11 + $0x398] sm:$0xf] }
 0x2f3   :  { %2859 = vmatpush.bf16.msrb.mxu1 %v6613_v51  ;;  %2883 = vmatpush.bf16.msrb.mxu3 %v7253_v52  ;;  %v7030_v51 = vld [vmem:[#allocation11 + $0x570] sm:$0xf0] }
 0x2f4   :  { %v8949_v52 = vld [vmem:[#allocation11 + $0x294] sm:$0xf]  ;;  %v7033_v59 = vor.u32 %v9037_v41, %v7030_v51  ;;  %v8978_v41 = vld [vmem:[#allocation11 + $0x374] sm:$0xf0] }
 0x2f5   :  { %2895 = vmatpush.bf16.msra.mxu0 %v6553_v50  ;;  %2871 = vmatpush.bf16.msrb.mxu2 %v6933_v63  ;;  %v7353_v50 = vor.u32 %v9117_v43, %v7350_v44  ;;  %v6681_v60 = vor.u32 %v8949_v52, %v6678_v54  ;;  %v6358_v61 = vld [vmem:[#allocation11 + $0x30] sm:$0xf0] }
 0x2f6   :  { %2860 = vmatmul.bf16.vlgmr.msrb.gmra.mxu1 %v9993_v9  ;;  %v9029_v62 = vld [vmem:[#allocation11 + $0x514] sm:$0xf]  ;;  %v6361_v8 = vor.u32 %v8869_v58, %v6358_v61 }
 0x2f7   :  { %2908 = vmatpush.bf16.msra.mxu1 %v6841_v57  ;;  %2884 = vmatpush.bf16.msrb.mxu3 %v7221_v1  ;;  %v6393_v57 = vor.u32 %v8877_v40, %v6390_v49  ;;  %v6998_v63 = vld [vmem:[#allocation11 + $0x530] sm:$0xf0]  ;;  %v6588_v1 = vld [vmem:[#allocation11 + $0x1d8] sm:$0xf] }
 0x2f8   :  { %v8941_v4 = vld [vmem:[#allocation11 + $0x254] sm:$0xf]  ;;  %v7001_v10 = vor.u32 %v9029_v62, %v6998_v63  ;;  %v6589_v11 = vor.u32 %v8930_v3, %v6588_v1  ;;  %v6780_v49 = vld [vmem:[#allocation11 + $0x358] sm:$0xf] }
 0x2f9   :  { %2896 = vmatpush.bf16.msra.mxu0 %v6521_v0  ;;  %2872 = vmatpush.bf16.msrb.mxu2 %v6901_v13  ;;  %v7321_v0 = vor.u32 %v9109_v55, %v7318_v56  ;;  %v6646_v5 = vld [vmem:[#allocation11 + $0x270] sm:$0xf0]  ;;  %v6460_v56 = vld [vmem:[#allocation11 + $0xd8] sm:$0xf]  ;;  %v6781_v58 = vor.u32 %v8978_v41, %v6780_v49 }
 0x2fa   :  { %v7286_v7 = vld [vmem:[#allocation11 + $0x770] sm:$0xf0]  ;;  %v6649_v14 = vor.u32 %v8941_v4, %v6646_v5  ;;  %v6748_v63 = vld [vmem:[#allocation11 + $0x318] sm:$0xf] }
 0x2fb   :  { %2909 = vmatpush.bf16.msra.mxu1 %v6809_v6  ;;  %2885 = vmatpush.bf16.msrb.mxu3 %v7189_v16  ;;  %v9101_v6 = vld [vmem:[#allocation11 + $0x754] sm:$0xf]  ;;  %v6556_v16 = vld [vmem:[#allocation11 + $0x198] sm:$0xf] }
 0x2fc   :  { %v9021_v12 = vld [vmem:[#allocation11 + $0x4d4] sm:$0xf]  ;;  %v6557_v26 = vor.u32 %v8922_v17, %v6556_v16  ;;  %v6428_v5 = vld [vmem:[#allocation11 + $0x98] sm:$0xf] }
 0x2fd   :  { %2897 = vmatpush.bf16.msra.mxu0 %v6489_v15  ;;  %2873 = vmatpush.bf16.msrb.mxu2 %v6869_v28  ;;  %v6966_v13 = vld [vmem:[#allocation11 + $0x4f0] sm:$0xf0]  ;;  %v7289_v15 = vor.u32 %v9101_v6, %v7286_v7  ;;  %v8890_v6 = vld [vmem:[#allocation11 + $0xb4] sm:$0xf0] }
 0x2fe   :  { %v8933_v18 = vld [vmem:[#allocation11 + $0x214] sm:$0xf]  ;;  %v6969_v25 = vor.u32 %v9021_v12, %v6966_v13  ;;  %v7356_v16 = vld [vmem:[#allocation11 + $0x7d8] sm:$0xf] }
 0x2ff   :  { %2910 = vmatpush.bf16.msra.mxu1 %v6777_v20  ;;  %2886 = vmatpush.bf16.msrb.mxu3 %v7157_v33  ;;  %v6614_v19 = vld [vmem:[#allocation11 + $0x230] sm:$0xf0]  ;;  %v8914_v33 = vld [vmem:[#allocation11 + $0x174] sm:$0xf0] }
 0x300   :  { %2874 = vmatmul.bf16.vlgmr.msrb.gmra.mxu2 %v9997_v38  ;;  %v9093_v20 = vld [vmem:[#allocation11 + $0x714] sm:$0xf]  ;;  %v6617_v27 = vor.u32 %v8933_v18, %v6614_v19  ;;  %v6525_v39 = vor.u32 %v8914_v33, %v6524_v31  ;;  %v9122_v17 = vld [vmem:[#allocation11 + $0x7f4] sm:$0xf0]  ;;  %v6429_v18 = vor.u32 %v8890_v6, %v6428_v5 }
 0x301   :  { %2898 = vmatpush.bf16.msra.mxu0 %v6457_v29  ;;  %2922 = vmatpush.bf16.msra.mxu2 %v7097_v30  ;;  %v7254_v21 = vld [vmem:[#allocation11 + $0x730] sm:$0xf0]  ;;  %v9114_v31 = vld [vmem:[#allocation11 + $0x7b4] sm:$0xf0] }
 0x302   :  { %v7257_v28 = vor.u32 %v9093_v20, %v7254_v21  ;;  %v9013_v29 = vld [vmem:[#allocation11 + $0x494] sm:$0xf]  ;;  %v6364_v33 = vld [vmem:[#allocation11 + $0x18] sm:$0xf] }
 0x303   :  { %2911 = vmatpush.bf16.msra.mxu1 %v6745_v24  ;;  %2887 = vmatpush.bf16.msrb.mxu3 %v7125_v47  ;;  %v6934_v30 = vld [vmem:[#allocation11 + $0x4b0] sm:$0xf0]  ;;  %v8906_v47 = vld [vmem:[#allocation11 + $0x134] sm:$0xf0] }
 0x304   :  { %v9085_v24 = vld [vmem:[#allocation11 + $0x6d4] sm:$0xf]  ;;  %v6937_v37 = vor.u32 %v9013_v29, %v6934_v30  ;;  %v8954_v29 = vld [vmem:[#allocation11 + $0x2b4] sm:$0xf0] }
 0x305   :  { %2899 = vmatpush.bf16.msra.mxu0 %v6425_v45  ;;  %2923 = vmatpush.bf16.msra.mxu2 %v7065_v46  ;;  %v7222_v34 = vld [vmem:[#allocation11 + $0x6f0] sm:$0xf0]  ;;  %v6492_v45 = vld [vmem:[#allocation11 + $0x118] sm:$0xf]  ;;  %v6813_v46 = vor.u32 %v8986_v36, %v6812_v35 }
 0x306   :  { %2888 = vmatmul.bf16.vlgmr.msrb.gmra.mxu3 %v10001_v2  ;;  %v7225_v42 = vor.u32 %v9085_v24, %v7222_v34  ;;  %v9005_v43 = vld [vmem:[#allocation11 + $0x454] sm:$0xf]  ;;  %v6493_v52 = vor.u32 %v8906_v47, %v6492_v45  ;;  %v7324_v30 = vld [vmem:[#allocation11 + $0x798] sm:$0xf] }
 0x307   :  { %2912 = vmatpush.bf16.msra.mxu1 %v6713_v48  ;;  %2936 = vmatpush.bf16.msra.mxu3 %v7353_v50  ;;  %v6902_v44 = vld [vmem:[#allocation11 + $0x470] sm:$0xf0]  ;;  %v8874_v35 = vld [vmem:[#allocation11 + $0x34] sm:$0xf0] }
 0x308   :  { %v9077_v48 = vld [vmem:[#allocation11 + $0x694] sm:$0xf]  ;;  %v6905_v50 = vor.u32 %v9005_v43, %v6902_v44  ;;  %v7004_v36 = vld [vmem:[#allocation11 + $0x518] sm:$0xf]  ;;  %v6590_v43 = vld [vmem:[#allocation11 + $0x1f8] sm:$0xf0] }
 0x309   :  { %2900 = vmatpush.bf16.msra.mxu0 %v6393_v57  ;;  %2924 = vmatpush.bf16.msra.mxu2 %v7033_v59  ;;  %v7190_v40 = vld [vmem:[#allocation11 + $0x6b0] sm:$0xf0]  ;;  %v8898_v57 = vld [vmem:[#allocation11 + $0xf4] sm:$0xf0] }
 0x30a   :  { %v8997_v51 = vld [vmem:[#allocation11 + $0x414] sm:$0xf]  ;;  %v7193_v54 = vor.u32 %v9077_v48, %v7190_v40  ;;  %v7100_v59 = vld [vmem:[#allocation11 + $0x5d8] sm:$0xf]  ;;  %v6461_v3 = vor.u32 %v8898_v57, %v6460_v56  ;;  %v6365_v48 = vor.u32 %v8874_v35, %v6364_v33  ;;  %v8894_v35 = vld [vmem:[#allocation11 + $0xdc] sm:$0xf] }
 0x30b   :  { %2913 = vmatpush.bf16.msra.mxu1 %v6681_v60  ;;  %2937 = vmatpush.bf16.msra.mxu3 %v7321_v0  ;;  %v6870_v55 = vld [vmem:[#allocation11 + $0x430] sm:$0xf0]  ;;  %v9058_v60 = vld [vmem:[#allocation11 + $0x5f4] sm:$0xf0] }
 0x30c   :  { %v9069_v61 = vld [vmem:[#allocation11 + $0x654] sm:$0xf]  ;;  %v8970_v0 = vld [vmem:[#allocation11 + $0x334] sm:$0xf0]  ;;  %v6873_v1 = vor.u32 %v8997_v51, %v6870_v55  ;;  %v7101_v4 = vor.u32 %v9058_v60, %v7100_v59  ;;  %v6558_v55 = vld [vmem:[#allocation11 + $0x1b8] sm:$0xf0]  ;;  %v10023_v57 = vpop.f32.mrf.mxu0 }
 0x30d   :  { %2901 = vmatpush.bf16.msra.mxu0 %v6361_v8  ;;  %2925 = vmatpush.bf16.msra.mxu2 %v7001_v10  ;;  %v7158_v62 = vld [vmem:[#allocation11 + $0x670] sm:$0xf0]  ;;  %v6749_v8 = vor.u32 %v8970_v0, %v6748_v63  ;;  %v7068_v10 = vld [vmem:[#allocation11 + $0x598] sm:$0xf] }
 0x30e   :  { %v7161_v7 = vor.u32 %v9069_v61, %v7158_v62  ;;  %v9061_v12 = vld [vmem:[#allocation11 + $0x614] sm:$0xf]  ;;  %v6652_v44 = vld [vmem:[#allocation11 + $0x258] sm:$0xf]  ;;  %v8990_v61 = vld [vmem:[#allocation11 + $0x3dc] sm:$0xf] }
 0x30f   :  { %2914 = vmatpush.bf16.msra.mxu1 %v6649_v14  ;;  %2938 = vmatpush.bf16.msra.mxu3 %v7289_v15  ;;  %v7126_v13 = vld [vmem:[#allocation11 + $0x630] sm:$0xf0]  ;;  %v6716_v14 = vld [vmem:[#allocation11 + $0x2d8] sm:$0xf]  ;;  %v6846_v62 = vld [vmem:[#allocation11 + $0x3f8] sm:$0xf0] }
 0x310   :  { %2902 = vmatmul.bf16.vlgmr.msra.gmra.mxu0 %v9989_v53  ;;  %v8962_v15 = vld [vmem:[#allocation11 + $0x2f4] sm:$0xf0]  ;;  %v7129_v20 = vor.u32 %v9061_v12, %v7126_v13 }
 0x311   :  { %2950 = vmatpush.bf16.msrb.mxu0 %v6589_v11  ;;  %2926 = vmatpush.bf16.msra.mxu2 %v6969_v25  ;;  %v9050_v11 = vld [vmem:[#allocation11 + $0x5b4] sm:$0xf0]  ;;  %v6717_v21 = vor.u32 %v8962_v15, %v6716_v14  ;;  %v8982_v14 = vld [vmem:[#allocation11 + $0x39c] sm:$0xf] }
 0x312   :  { %v7069_v19 = vor.u32 %v9050_v11, %v7068_v10  ;;  %v7036_v25 = vld [vmem:[#allocation11 + $0x558] sm:$0xf]  ;;  %v6849_v10 = vor.u32 %v8990_v61, %v6846_v62  ;;  %v6526_v11 = vld [vmem:[#allocation11 + $0x178] sm:$0xf0] }
 0x313   :  { %2915 = vmatpush.bf16.msra.mxu1 %v6617_v27  ;;  %2939 = vmatpush.bf16.msra.mxu3 %v7257_v28  ;;  %v9042_v27 = vld [vmem:[#allocation11 + $0x574] sm:$0xf0]  ;;  %v10025_v63 = vpop.f32.mrf.mxu1  ;;  %v6814_v15 = vld [vmem:[#allocation11 + $0x3b8] sm:$0xf0] }
 0x314   :  { %v6684_v28 = vld [vmem:[#allocation11 + $0x298] sm:$0xf]  ;;  %v7037_v24 = vor.u32 %v9042_v27, %v7036_v25  ;;  %v8974_v27 = vld [vmem:[#allocation11 + $0x35c] sm:$0xf] }
 0x315   :  { %2951 = vmatpush.bf16.msrb.mxu0 %v6557_v26  ;;  %2927 = vmatpush.bf16.msra.mxu2 %v6937_v37  ;;  %v7357_v26 = vor.u32 %v9122_v17, %v7356_v16  ;;  %v6685_v34 = vor.u32 %v8954_v29, %v6684_v28  ;;  %v9034_v37 = vld [vmem:[#allocation11 + $0x534] sm:$0xf0]  ;;  %v6782_v28 = vld [vmem:[#allocation11 + $0x378] sm:$0xf0]  ;;  %v10030_v29 = vpop.f32.mrf.mxu0 }
 0x316   :  { %2916 = vmatmul.bf16.vlgmr.msra.gmra.mxu1 %v9993_v9  ;;  %v8946_v45 = vld [vmem:[#allocation11 + $0x274] sm:$0xf0]  ;;  %v7005_v40 = vor.u32 %v9034_v37, %v7004_v36  ;;  %v6462_v36 = vld [vmem:[#allocation11 + $0xf8] sm:$0xf0] }
 0x317   :  { %2964 = vmatpush.bf16.msrb.mxu1 %v6845_v32  ;;  %2940 = vmatpush.bf16.msra.mxu3 %v7225_v42  ;;  %v6397_v32 = vor.u32 %v8882_v23, %v6396_v22  ;;  %v8926_v42 = vld [vmem:[#allocation11 + $0x1dc] sm:$0xf]  ;;  %v9106_v47 = vld [vmem:[#allocation11 + $0x774] sm:$0xf0]  ;;  %v6653_v51 = vor.u32 %v8946_v45, %v6652_v44  ;;  %v6817_v22 = vor.u32 %v8982_v14, %v6814_v15 }
 0x318   :  { %v6593_v49 = vor.u32 %v8926_v42, %v6590_v43  ;;  %v6972_v41 = vld [vmem:[#allocation11 + $0x4d8] sm:$0xf]  ;;  %v6494_v23 = vld [vmem:[#allocation11 + $0x138] sm:$0xf0] }
 0x319   :  { %2952 = vmatpush.bf16.msrb.mxu0 %v6525_v39  ;;  %2928 = vmatpush.bf16.msra.mxu2 %v6905_v50  ;;  %v7325_v39 = vor.u32 %v9114_v31, %v7324_v30  ;;  %v9026_v50 = vld [vmem:[#allocation11 + $0x4f4] sm:$0xf0]  ;;  %v9054_v42 = vld [vmem:[#allocation11 + $0x5dc] sm:$0xf] }
 0x31a   :  { %v6620_v56 = vld [vmem:[#allocation11 + $0x218] sm:$0xf]  ;;  %v6973_v0 = vor.u32 %v9026_v50, %v6972_v41  ;;  %v7102_v43 = vld [vmem:[#allocation11 + $0x5f8] sm:$0xf0] }
 0x31b   :  { %2965 = vmatpush.bf16.msrb.mxu1 %v6813_v46  ;;  %2941 = vmatpush.bf16.msra.mxu3 %v7193_v54  ;;  %v7292_v46 = vld [vmem:[#allocation11 + $0x758] sm:$0xf]  ;;  %v8918_v54 = vld [vmem:[#allocation11 + $0x19c] sm:$0xf]  ;;  %v10035_v37 = vpop.f32.mrf.mxu1  ;;  %v7105_v41 = vor.u32 %v9054_v42, %v7102_v43 }
 0x31c   :  { %v7260_v59 = vld [vmem:[#allocation11 + $0x718] sm:$0xf]  ;;  %v8886_v50 = vld [vmem:[#allocation11 + $0x9c] sm:$0xf] }
 0x31d   :  { %2953 = vmatpush.bf16.msrb.mxu0 %v6493_v52  ;;  %2929 = vmatpush.bf16.msra.mxu2 %v6873_v1  ;;  %v7293_v52 = vor.u32 %v9106_v47, %v7292_v46  ;;  %v9098_v60 = vld [vmem:[#allocation11 + $0x734] sm:$0xf0]  ;;  %v6561_v1 = vor.u32 %v8918_v54, %v6558_v55  ;;  %v8966_v46 = vld [vmem:[#allocation11 + $0x31c] sm:$0xf] }
 0x31e   :  { %v6940_v5 = vld [vmem:[#allocation11 + $0x498] sm:$0xf]  ;;  %v6750_v47 = vld [vmem:[#allocation11 + $0x338] sm:$0xf0] }
 0x31f   :  { %2966 = vmatpush.bf16.msrb.mxu1 %v6781_v58  ;;  %2942 = vmatpush.bf16.msra.mxu3 %v7161_v7  ;;  %v8938_v58 = vld [vmem:[#allocation11 + $0x234] sm:$0xf0]  ;;  %v8910_v7 = vld [vmem:[#allocation11 + $0x15c] sm:$0xf]  ;;  %v6753_v54 = vor.u32 %v8966_v46, %v6750_v47 }
 0x320   :  { %2930 = vmatmul.bf16.vlgmr.msra.gmra.mxu2 %v9997_v38  ;;  %v9018_v6 = vld [vmem:[#allocation11 + $0x4b4] sm:$0xf0]  ;;  %v6529_v17 = vor.u32 %v8910_v7, %v6526_v11  ;;  %v9046_v55 = vld [vmem:[#allocation11 + $0x59c] sm:$0xf] }
 0x321   :  { %2954 = vmatpush.bf16.msrb.mxu0 %v6461_v3  ;;  %2978 = vmatpush.bf16.msrb.mxu2 %v7101_v4  ;;  %v6621_v3 = vor.u32 %v8938_v58, %v6620_v56  ;;  %v7261_v4 = vor.u32 %v9098_v60, %v7260_v59  ;;  %v7228_v12 = vld [vmem:[#allocation11 + $0x6d8] sm:$0xf]  ;;  %v6941_v16 = vor.u32 %v9018_v6, %v6940_v5  ;;  %v7070_v56 = vld [vmem:[#allocation11 + $0x5b8] sm:$0xf0] }
 0x322   :  { %v9090_v13 = vld [vmem:[#allocation11 + $0x6f4] sm:$0xf0]  ;;  %v8958_v60 = vld [vmem:[#allocation11 + $0x2dc] sm:$0xf] }
 0x323   :  { %2967 = vmatpush.bf16.msrb.mxu1 %v6749_v8  ;;  %2943 = vmatpush.bf16.msra.mxu3 %v7129_v20  ;;  %v10027_v8 = vpop.f32.mrf.mxu2  ;;  %v9010_v20 = vld [vmem:[#allocation11 + $0x474] sm:$0xf0]  ;;  %v6718_v61 = vld [vmem:[#allocation11 + $0x2f8] sm:$0xf0] }
 0x324   :  { %v7196_v25 = vld [vmem:[#allocation11 + $0x698] sm:$0xf]  ;;  %v9118_v62 = vld [vmem:[#allocation11 + $0x7dc] sm:$0xf]  ;;  %v6721_v7 = vor.u32 %v8958_v60, %v6718_v61 }
 0x325   :  { %2955 = vmatpush.bf16.msrb.mxu0 %v6429_v18  ;;  %2979 = vmatpush.bf16.msrb.mxu2 %v7069_v19  ;;  %v7229_v18 = vor.u32 %v9090_v13, %v7228_v12  ;;  %v6908_v19 = vld [vmem:[#allocation11 + $0x458] sm:$0xf]  ;;  %v6398_v11 = vld [vmem:[#allocation11 + $0x78] sm:$0xf0] }
 0x326   :  { %2944 = vmatmul.bf16.vlgmr.msra.gmra.mxu3 %v10001_v2  ;;  %v6909_v31 = vor.u32 %v9010_v20, %v6908_v19  ;;  %v7164_v44 = vld [vmem:[#allocation11 + $0x658] sm:$0xf]  ;;  %v9038_v12 = vld [vmem:[#allocation11 + $0x55c] sm:$0xf] }
 0x327   :  { %2968 = vmatpush.bf16.msrb.mxu1 %v6717_v21  ;;  %2992 = vmatpush.bf16.msrb.mxu3 %v7357_v26  ;;  %v8902_v21 = vld [vmem:[#allocation11 + $0x11c] sm:$0xf]  ;;  %v9082_v26 = vld [vmem:[#allocation11 + $0x6b4] sm:$0xf0] }
 0x328   :  { %v6497_v33 = vor.u32 %v8902_v21, %v6494_v23  ;;  %v9074_v45 = vld [vmem:[#allocation11 + $0x674] sm:$0xf0]  ;;  %v7038_v14 = vld [vmem:[#allocation11 + $0x578] sm:$0xf0] }
 0x329   :  { %2956 = vmatpush.bf16.msrb.mxu0 %v6397_v32  ;;  %2980 = vmatpush.bf16.msrb.mxu2 %v7037_v24  ;;  %v10032_v30 = vpop.f32.mrf.mxu3  ;;  %v6876_v32 = vld [vmem:[#allocation11 + $0x418] sm:$0xf]  ;;  %v7197_v24 = vor.u32 %v9082_v26, %v7196_v25  ;;  %v8950_v15 = vld [vmem:[#allocation11 + $0x29c] sm:$0xf]  ;;  %v7041_v23 = vor.u32 %v9038_v12, %v7038_v14 }
 0x32a   :  { %v7132_v58 = vld [vmem:[#allocation11 + $0x618] sm:$0xf]  ;;  %v7326_v19 = vld [vmem:[#allocation11 + $0x7b8] sm:$0xf0] }
 0x32b   :  { %2969 = vmatpush.bf16.msrb.mxu1 %v6685_v34  ;;  %2993 = vmatpush.bf16.msrb.mxu3 %v7325_v39  ;;  %v9002_v34 = vld [vmem:[#allocation11 + $0x434] sm:$0xf0]  ;;  %v6785_v39 = vor.u32 %v8974_v27, %v6782_v28  ;;  %v8870_v21 = vld [vmem:[#allocation11 + $0x1c] sm:$0xf] }
 0x32c   :  { %v9066_v59 = vld [vmem:[#allocation11 + $0x634] sm:$0xf0]  ;;  %v6366_v26 = vld [vmem:[#allocation11 + $0x38] sm:$0xf0] }
 0x32d   :  { %2957 = vmatpush.bf16.msrb.mxu0 %v6365_v48  ;;  %2981 = vmatpush.bf16.msrb.mxu2 %v7005_v40  ;;  %v10037_v48 = vpop.f32.mrf.mxu2  ;;  %v6877_v40 = vor.u32 %v9002_v34, %v6876_v32  ;;  %v7133_v6 = vor.u32 %v9066_v59, %v7132_v58  ;;  %v9030_v27 = vld [vmem:[#allocation11 + $0x51c] sm:$0xf]  ;;  %v7476_v32 = vld [vmem:[#allocation13 + $0xe0] sm:$0xf]  ;;  %v9185_v58 = vld [vmem:[#allocation13 + $0x1ec] sm:$0xf0] }
 0x32e   :  { %v7006_v28 = vld [vmem:[#allocation11 + $0x538] sm:$0xf0] }
 0x32f   :  { %2970 = vmatpush.bf16.msrb.mxu1 %v6653_v51  ;;  %2994 = vmatpush.bf16.msrb.mxu3 %v7293_v52  ;;  %v6430_v51 = vld [vmem:[#allocation11 + $0xb8] sm:$0xf0]  ;;  %v7165_v52 = vor.u32 %v9074_v45, %v7164_v44  ;;  %v7009_v42 = vor.u32 %v9030_v27, %v7006_v28  ;;  %v7428_v27 = vld [vmem:[#allocation13 + $0x80] sm:$0xf]  ;;  %v9141_v28 = vld [vmem:[#allocation13 + $0x8c] sm:$0xf0] }
 0x330   :  { %2958 = vmatmul.bf16.vlgmr.msrb.gmra.mxu0 %v9989_v53  ;;  %v6654_v34 = vld [vmem:[#allocation11 + $0x278] sm:$0xf0] }
 0x331   :  { %3006 = vmatpush.bf16.msra.mxu0 %v6593_v49  ;;  %2982 = vmatpush.bf16.msrb.mxu2 %v6973_v0  ;;  %v6465_v49 = vor.u32 %v8894_v35, %v6462_v36  ;;  %v7358_v0 = vld [vmem:[#allocation11 + $0x7f8] sm:$0xf0]  ;;  %v10041_v5 = vpop.f32.mrf.mxu3 }
 0x332   :  { %v7361_v13 = vor.u32 %v9118_v62, %v7358_v0  ;;  %v9102_v35 = vld [vmem:[#allocation11 + $0x75c] sm:$0xf] }
 0x333   :  { %2971 = vmatpush.bf16.msrb.mxu1 %v6621_v3  ;;  %2995 = vmatpush.bf16.msrb.mxu3 %v7261_v4  ;;  %v7073_v3 = vor.u32 %v9046_v55, %v7070_v56  ;;  %v10039_v4 = vpop.f32.mrf.mxu0  ;;  %v7294_v36 = vld [vmem:[#allocation11 + $0x778] sm:$0xf0]  ;;  %v7604_v56 = vld [vmem:[#allocation13 + $0x1e0] sm:$0xf] }
 0x334   :  { %v9022_v44 = vld [vmem:[#allocation11 + $0x4dc] sm:$0xf]  ;;  %v7297_v47 = vor.u32 %v9102_v35, %v7294_v36  ;;  %v7605_v12 = vor.u32 %v9185_v58, %v7604_v56  ;;  %v7556_v56 = vld [vmem:[#allocation13 + $0x180] sm:$0xf]  ;;  %v9173_v58 = vld [vmem:[#allocation13 + $0x18c] sm:$0xf0] }
 0x335   :  { %3007 = vmatpush.bf16.msra.mxu0 %v6561_v1  ;;  %2983 = vmatpush.bf16.msrb.mxu2 %v6941_v16  ;;  %v6433_v1 = vor.u32 %v8886_v50, %v6430_v51  ;;  %v6686_v16 = vld [vmem:[#allocation11 + $0x2b8] sm:$0xf0] }
 0x336   :  { %2972 = vmatmul.bf16.vlgmr.msrb.gmra.mxu1 %v9993_v9  ;;  %v6689_v25 = vor.u32 %v8950_v15, %v6686_v16  ;;  %v6974_v45 = vld [vmem:[#allocation11 + $0x4f8] sm:$0xf0]  ;;  %v7588_v16 = vld [vmem:[#allocation13 + $0x1c0] sm:$0xf] }
 0x337   :  { %3020 = vmatpush.bf16.msra.mxu1 %v6849_v10  ;;  %2996 = vmatpush.bf16.msrb.mxu3 %v7229_v18  ;;  %v8878_v10 = vld [vmem:[#allocation11 + $0x5c] sm:$0xf]  ;;  %v6977_v62 = vor.u32 %v9022_v44, %v6974_v45 }
 0x338   :  { %v9110_v18 = vld [vmem:[#allocation11 + $0x79c] sm:$0xf]  ;;  %v6401_v20 = vor.u32 %v8878_v10, %v6398_v11  ;;  %v7444_v10 = vld [vmem:[#allocation13 + $0xa0] sm:$0xf] }
 0x339   :  { %3008 = vmatpush.bf16.msra.mxu0 %v6529_v17  ;;  %2984 = vmatpush.bf16.msrb.mxu2 %v6909_v31  ;;  %v10044_v17 = vpop.f32.mrf.mxu1  ;;  %v7329_v31 = vor.u32 %v9110_v18, %v7326_v19  ;;  %v10051_v51 = vpop.f32.mrf.mxu3  ;;  %v7262_v55 = vld [vmem:[#allocation11 + $0x738] sm:$0xf0]  ;;  %v9181_v18 = vld [vmem:[#allocation13 + $0x1cc] sm:$0xf0] }
 0x33a   :  { %v1314_v59 = vld [vmem:[#allocation20 + $0x4] ss:$8 sm:$0xf] }
 0x33b   :  { %3021 = vmatpush.bf16.msra.mxu1 %v6817_v22  ;;  %2997 = vmatpush.bf16.msrb.mxu3 %v7197_v24  ;;  %v10046_v22 = vpop.f32.mrf.mxu2  ;;  %v8942_v24 = vld [vmem:[#allocation11 + $0x25c] sm:$0xf]  ;;  %v10049_v50 = vpop.f32.mrf.mxu0 }
 0x33c   :  { %v6657_v46 = vor.u32 %v8942_v24, %v6654_v34  ;;  %v1315_v60 = vld [vmem:[#allocation20 + $0x4] ss:$8 sm:$0xf0]  ;;  %v9177_v24 = vld [vmem:[#allocation13 + $0x1ac] sm:$0xf0] }
 0x33d   :  { %3009 = vmatpush.bf16.msra.mxu0 %v6497_v33  ;;  %2985 = vmatpush.bf16.msrb.mxu2 %v6877_v40  ;;  %v9153_v33 = vld [vmem:[#allocation13 + $0xec] sm:$0xf0]  ;;  %v7460_v40 = vld [vmem:[#allocation13 + $0xc0] sm:$0xf]  ;;  %v9086_v14 = vld [vmem:[#allocation11 + $0x6dc] sm:$0xf]  ;;  %v10058_v19 = vor.u32 %v1315_v60, %v1314_v59 }
 0x33e   :  { %v7477_v43 = vor.u32 %v9153_v33, %v7476_v32  ;;  %v7230_v15 = vld [vmem:[#allocation11 + $0x6f8] sm:$0xf0]  ;;  %v7572_v33 = vld [vmem:[#allocation13 + $0x1a0] sm:$0xf] }
 0x33f   :  { %3022 = vmatpush.bf16.msra.mxu1 %v6785_v39  ;;  %2998 = vmatpush.bf16.msrb.mxu3 %v7165_v52  ;;  %v6369_v39 = vor.u32 %v8870_v21, %v6366_v26  ;;  %v6622_v52 = vld [vmem:[#allocation11 + $0x238] sm:$0xf0]  ;;  %v1318_v34 = vperm.slane %v10058_v19, 0 }
 0x340   :  { %2986 = vmatmul.bf16.vlgmr.msrb.gmra.mxu2 %v9997_v38  ;;  %v6910_v26 = vld [vmem:[#allocation11 + $0x478] sm:$0xf0] }
 0x341   :  { %3010 = vmatpush.bf16.msra.mxu0 %v6465_v49  ;;  %3034 = vmatpush.bf16.msra.mxu2 %v7105_v41  ;;  %v9149_v49 = vld [vmem:[#allocation13 + $0xcc] sm:$0xf0]  ;;  %v8934_v41 = vld [vmem:[#allocation11 + $0x21c] sm:$0xf]  ;;  %v10053_v61 = vpop.f32.mrf.mxu1  ;;  %v10063_v36 = vpop.f32.mrf.mxu3 }
 0x342   :  { %v7461_v0 = vor.u32 %v9149_v49, %v7460_v40  ;;  %v7198_v32 = vld [vmem:[#allocation11 + $0x6b8] sm:$0xf0]  ;;  %v7573_v49 = vor.u32 %v9177_v24, %v7572_v33  ;;  %v7700_v33 = vld [vmem:[#allocation13 + $0x2a0] sm:$0xf] }
 0x343   :  { %3023 = vmatpush.bf16.msra.mxu1 %v6753_v54  ;;  %2999 = vmatpush.bf16.msrb.mxu3 %v7133_v6  ;;  %v9094_v54 = vld [vmem:[#allocation11 + $0x71c] sm:$0xf]  ;;  %v10055_v11 = vpop.f32.mrf.mxu2  ;;  %v10061_v35 = vpop.f32.mrf.mxu0 }
 0x344   :  { %v9014_v6 = vld [vmem:[#allocation11 + $0x49c] sm:$0xf] }
 0x345   :  { %3011 = vmatpush.bf16.msra.mxu0 %v6433_v1  ;;  %3035 = vmatpush.bf16.msra.mxu2 %v7073_v3  ;;  %v6625_v1 = vor.u32 %v8934_v41, %v6622_v52  ;;  %v7265_v3 = vor.u32 %v9094_v54, %v7262_v55  ;;  %v6878_v45 = vld [vmem:[#allocation11 + $0x438] sm:$0xf0]  ;;  %v7732_v41 = vld [vmem:[#allocation13 + $0x2e0] sm:$0xf]  ;;  %v9217_v52 = vld [vmem:[#allocation13 + $0x2ec] sm:$0xf0] }
 0x346   :  { %3000 = vmatmul.bf16.vlgmr.msrb.gmra.mxu3 %v10001_v2  ;;  %v9070_v54 = vld [vmem:[#allocation11 + $0x65c] sm:$0xf] }
 0x347   :  { %3024 = vmatpush.bf16.msra.mxu1 %v6721_v7  ;;  %3048 = vmatpush.bf16.msra.mxu3 %v7361_v13  ;;  %v6942_v7 = vld [vmem:[#allocation11 + $0x4b8] sm:$0xf0]  ;;  %v9145_v13 = vld [vmem:[#allocation13 + $0xac] sm:$0xf0] }
 0x348   :  { %v7445_v21 = vor.u32 %v9145_v13, %v7444_v10  ;;  %v7166_v55 = vld [vmem:[#allocation11 + $0x678] sm:$0xf0]  ;;  %v7716_v10 = vld [vmem:[#allocation13 + $0x2c0] sm:$0xf] }
 0x349   :  { %3012 = vmatpush.bf16.msra.mxu0 %v6401_v20  ;;  %3036 = vmatpush.bf16.msra.mxu2 %v7041_v23  ;;  %v6945_v20 = vor.u32 %v9014_v6, %v6942_v7  ;;  %v7233_v23 = vor.u32 %v9086_v14, %v7230_v15  ;;  %v10066_v40 = vpop.f32.mrf.mxu1  ;;  %v7169_v6 = vor.u32 %v9070_v54, %v7166_v55  ;;  %v9062_v13 = vld [vmem:[#allocation11 + $0x61c] sm:$0xf]  ;;  %v9125_v55 = vld [vmem:[#allocation13 + $0xc] sm:$0xf0] }
 0x34a   :  { %v7557_v7 = vor.u32 %v9173_v58, %v7556_v56  ;;  %v2626_v14 = vadd.f32 %v10030_v29, %v1318_v34  ;;  %v7134_v15 = vld [vmem:[#allocation11 + $0x638] sm:$0xf0]  ;;  %v7684_v56 = vld [vmem:[#allocation13 + $0x280] sm:$0xf]  ;;  %v9205_v58 = vld [vmem:[#allocation13 + $0x28c] sm:$0xf0] }
 0x34b   :  { %3025 = vmatpush.bf16.msra.mxu1 %v6689_v25  ;;  %3049 = vmatpush.bf16.msra.mxu3 %v7329_v31  ;;  %v9006_v25 = vld [vmem:[#allocation11 + $0x45c] sm:$0xf]  ;;  %v7137_v29 = vor.u32 %v9062_v13, %v7134_v15 }
 0x34c   :  { %v9078_v31 = vld [vmem:[#allocation11 + $0x69c] sm:$0xf] }
 0x34d   :  { %3013 = vmatpush.bf16.msra.mxu0 %v6369_v39  ;;  %3037 = vmatpush.bf16.msra.mxu2 %v7009_v42  ;;  %v6913_v39 = vor.u32 %v9006_v25, %v6910_v26  ;;  %v8998_v42 = vld [vmem:[#allocation11 + $0x41c] sm:$0xf]  ;;  %v7201_v44 = vor.u32 %v9078_v31, %v7198_v32  ;;  %v2640_v25 = vadd.f32 %v10035_v37, %v2626_v14  ;;  %v9129_v32 = vld [vmem:[#allocation13 + $0x2c] sm:$0xf0] }
 0x34e   :  { %v6881_v59 = vor.u32 %v8998_v42, %v6878_v45  ;;  %v7524_v42 = vld [vmem:[#allocation13 + $0x140] sm:$0xf] }
 0x34f   :  { %3026 = vmatpush.bf16.msra.mxu1 %v6657_v46  ;;  %3050 = vmatpush.bf16.msra.mxu3 %v7297_v47  ;;  %v7412_v46 = vld [vmem:[#allocation13 + $0x60] sm:$0xf]  ;;  %v9137_v47 = vld [vmem:[#allocation13 + $0x6c] sm:$0xf0]  ;;  %v2654_v37 = vadd.f32 %v10037_v48, %v2640_v25 }
 0x350   :  { %3014 = vmatmul.bf16.vlgmr.msra.gmra.mxu0 %v9989_v53  ;;  %v7589_v53 = vor.u32 %v9181_v18, %v7588_v16  ;;  %v7413_v60 = vor.u32 %v9137_v47, %v7412_v46  ;;  %v7540_v16 = vld [vmem:[#allocation13 + $0x160] sm:$0xf]  ;;  %v9169_v18 = vld [vmem:[#allocation13 + $0x16c] sm:$0xf0] }
 0x351   :  { %4633 = vmatpush.bf16.msrb.mxu0 %v7477_v43  ;;  %3038 = vmatpush.bf16.msra.mxu2 %v6977_v62  ;;  %v7429_v43 = vor.u32 %v9141_v28, %v7428_v27  ;;  %v7733_v62 = vor.u32 %v9217_v52, %v7732_v41  ;;  %v10077_v28 = vpop.f32.mrf.mxu3  ;;  %v7541_v31 = vor.u32 %v9169_v18, %v7540_v16  ;;  %v10083_v45 = vpop.f32.mrf.mxu1  ;;  %v7844_v46 = vld [vmem:[#allocation13 + $0x3c0] sm:$0xf]  ;;  %v9245_v47 = vld [vmem:[#allocation13 + $0x3cc] sm:$0xf0] }
 0x352   :  { %v2668_v41 = vadd.f32 %v10041_v5, %v2654_v37  ;;  %v7364_v48 = vld [vmem:[#allocation13] sm:$0xf]  ;;  %v9201_v18 = vld [vmem:[#allocation13 + $0x26c] sm:$0xf0] }
 0x353   :  { %3027 = vmatpush.bf16.msra.mxu1 %v6625_v1  ;;  %3051 = vmatpush.bf16.msra.mxu3 %v7265_v3  ;;  %v9133_v1 = vld [vmem:[#allocation13 + $0x4c] sm:$0xf0]  ;;  %v2624_v3 = vadd.f32 %v10023_v57, %v1318_v34  ;;  %v1319_v57 = vperm.slane %v10058_v19, 1  ;;  %v7988_v5 = vld [vmem:[#allocation13 + $0x4e0] sm:$0xf] }
 0x354   :  { %v7668_v16 = vld [vmem:[#allocation13 + $0x260] sm:$0xf] }
 0x355   :  { %4634 = vmatpush.bf16.msrb.mxu0 %v7461_v0  ;;  %3039 = vmatpush.bf16.msra.mxu2 %v6945_v20  ;;  %v7396_v0 = vld [vmem:[#allocation13 + $0x40] sm:$0xf]  ;;  %v2638_v20 = vadd.f32 %v10025_v63, %v2624_v3  ;;  %v9241_v3 = vld [vmem:[#allocation13 + $0x3ac] sm:$0xf0]  ;;  %v7669_v37 = vor.u32 %v9201_v18, %v7668_v16 }
 0x356   :  { %3028 = vmatmul.bf16.vlgmr.msra.gmra.mxu1 %v9993_v9  ;;  %v10068_v9 = vpop.f32.mrf.mxu2  ;;  %v7397_v26 = vor.u32 %v9133_v1, %v7396_v0  ;;  %v7380_v63 = vld [vmem:[#allocation13 + $0x20] sm:$0xf]  ;;  %v9161_v1 = vld [vmem:[#allocation13 + $0x12c] sm:$0xf0] }
 0x357   :  { %4647 = vmatpush.bf16.msrb.mxu1 %v7605_v12  ;;  %3052 = vmatpush.bf16.msra.mxu3 %v7233_v23  ;;  %v9213_v12 = vld [vmem:[#allocation13 + $0x2cc] sm:$0xf0]  ;;  %v2652_v24 = vadd.f32 %v10027_v8, %v2638_v20  ;;  %v7381_v8 = vor.u32 %v9129_v32, %v7380_v63  ;;  %v8116_v63 = vld [vmem:[#allocation13 + $0x5e0] sm:$0xf] }
 0x358   :  { %v9249_v23 = vld [vmem:[#allocation13 + $0x3ec] sm:$0xf0]  ;;  %v7717_v27 = vor.u32 %v9213_v12, %v7716_v10  ;;  %v3070_v10 = vmax.f32 %v2668_v41, 0.0  ;;  %v7365_v12 = vor.u32 %v9125_v55, %v7364_v48 }
 0x359   :  { %4635 = vmatpush.bf16.msrb.mxu0 %v7445_v21  ;;  %3040 = vmatpush.bf16.msra.mxu2 %v6913_v39  ;;  %v7860_v21 = vld [vmem:[#allocation13 + $0x3e0] sm:$0xf]  ;;  %v9209_v39 = vld [vmem:[#allocation13 + $0x2ac] sm:$0xf0] }
 0x35a   :  { %v7861_v34 = vor.u32 %v9249_v23, %v7860_v21  ;;  %v7701_v54 = vor.u32 %v9209_v39, %v7700_v33  ;;  %v7972_v21 = vld [vmem:[#allocation13 + $0x4c0] sm:$0xf]  ;;  %v9277_v23 = vld [vmem:[#allocation13 + $0x4cc] sm:$0xf0] }
 0x35b   :  { %4648 = vmatpush.bf16.msrb.mxu1 %v7589_v53  ;;  %3053 = vmatpush.bf16.msra.mxu3 %v7201_v44  ;;  %v10075_v53 = vpop.f32.mrf.mxu0  ;;  %v2682_v44 = vadd.f32 %v10049_v50, %v1319_v57  ;;  %v9313_v32 = vld [vmem:[#allocation13 + $0x5ec] sm:$0xf0] }
 0x35c   :  { %v9233_v41 = vld [vmem:[#allocation13 + $0x36c] sm:$0xf0] }
 0x35d   :  { %4636 = vmatpush.bf16.msrb.mxu0 %v7429_v43  ;;  %3041 = vmatpush.bf16.msra.mxu2 %v6881_v59  ;;  %v9165_v43 = vld [vmem:[#allocation13 + $0x14c] sm:$0xf0]  ;;  %v2680_v59 = vadd.f32 %v10039_v4, %v1319_v57  ;;  %v10101_v57 = vpop.f32.mrf.mxu1 }
 0x35e   :  { %v10088_v52 = vpop.f32.mrf.mxu2  ;;  %v7525_v50 = vor.u32 %v9165_v43, %v7524_v42  ;;  %v7652_v43 = vld [vmem:[#allocation13 + $0x240] sm:$0xf] }
 0x35f   :  { %4649 = vmatpush.bf16.msrb.mxu1 %v7573_v49  ;;  %3054 = vmatpush.bf16.msra.mxu3 %v7169_v6  ;;  %v2666_v49 = vadd.f32 %v10032_v30, %v2652_v24  ;;  %v7845_v30 = vor.u32 %v9245_v47, %v7844_v46  ;;  %v2694_v6 = vadd.f32 %v10044_v17, %v2680_v59  ;;  %v7956_v46 = vld [vmem:[#allocation13 + $0x4a0] sm:$0xf] }
 0x360   :  { %3042 = vmatmul.bf16.vlgmr.msra.gmra.mxu2 %v9997_v38  ;;  %v2696_v38 = vadd.f32 %v10053_v61, %v2682_v44  ;;  %v7828_v61 = vld [vmem:[#allocation13 + $0x3a0] sm:$0xf]  ;;  %v9197_v44 = vld [vmem:[#allocation13 + $0x24c] sm:$0xf0] }
 0x361   :  { %4637 = vmatpush.bf16.msrb.mxu0 %v7413_v60  ;;  %4661 = vmatpush.bf16.msrb.mxu2 %v7733_v62  ;;  %v9281_v60 = vld [vmem:[#allocation13 + $0x4ec] sm:$0xf0]  ;;  %v7508_v62 = vld [vmem:[#allocation13 + $0x120] sm:$0xf]  ;;  %v3062_v4 = vmax.f32 %v2666_v49, 0.0  ;;  %v7829_v20 = vor.u32 %v9241_v3, %v7828_v61  ;;  %v2708_v25 = vadd.f32 %v10046_v22, %v2694_v6 }
 0x362   :  { %v2710_v0 = vadd.f32 %v10055_v11, %v2696_v38  ;;  %v7685_v11 = vor.u32 %v9205_v58, %v7684_v56  ;;  %v7989_v15 = vor.u32 %v9281_v60, %v7988_v5  ;;  %v7509_v17 = vor.u32 %v9161_v1, %v7508_v62  ;;  %v7796_v49 = vld [vmem:[#allocation13 + $0x360] sm:$0xf]  ;;  %v9193_v60 = vld [vmem:[#allocation13 + $0x22c] sm:$0xf0] }
 0x363   :  { %4650 = vmatpush.bf16.msrb.mxu1 %v7557_v7  ;;  %3055 = vmatpush.bf16.msra.mxu3 %v7137_v29  ;;  %v1320_v7 = vperm.slane %v10058_v19, 2  ;;  %v10098_v14 = vpop.f32.mrf.mxu0  ;;  %v9237_v29 = vld [vmem:[#allocation13 + $0x38c] sm:$0xf0]  ;;  %v2722_v33 = vadd.f32 %v10051_v51, %v2708_v25  ;;  %v8100_v38 = vld [vmem:[#allocation13 + $0x5c0] sm:$0xf]  ;;  %v1321_v56 = vperm.slane %v10058_v19, 3  ;;  %v7653_v58 = vor.u32 %v9197_v44, %v7652_v43 }
 0x364   :  { %v10096_v13 = vadd.f32 %v10063_v36, %v2710_v0  ;;  %v10103_v36 = vpop.f32.mrf.mxu3  ;;  %v9273_v51 = vld [vmem:[#allocation13 + $0x4ac] sm:$0xf0]  ;;  %v7636_v59 = vld [vmem:[#allocation13 + $0x220] sm:$0xf]  ;;  %v7797_v5 = vor.u32 %v9233_v41, %v7796_v49 }
 0x365   :  { %4638 = vmatpush.bf16.msrb.mxu0 %v7397_v26  ;;  %4662 = vmatpush.bf16.msrb.mxu2 %v7717_v27  ;;  %v9157_v26 = vld [vmem:[#allocation13 + $0x10c] sm:$0xf0]  ;;  %v7812_v27 = vld [vmem:[#allocation13 + $0x380] sm:$0xf]  ;;  %v2736_v47 = vadd.f32 %v10061_v35, %v1320_v7  ;;  %v2738_v48 = vadd.f32 %v10075_v53, %v1320_v7  ;;  %v3063_v55 = vmax.f32 %v2722_v33, 0.0 }
 0x366   :  { %3056 = vmatmul.bf16.vlgmr.msra.gmra.mxu3 %v10001_v2  ;;  %v7492_v2 = vld [vmem:[#allocation13 + $0x100] sm:$0xf]  ;;  %v3071_v24 = vmax.f32 %v10096_v13, 0.0  ;;  %v10109_v22 = vpop.f32.mrf.mxu2  ;;  %v7813_v42 = vor.u32 %v9237_v29, %v7812_v27  ;;  %v9269_v53 = vld [vmem:[#allocation13 + $0x48c] sm:$0xf0]  ;;  %v2807_v13 = vpop.f32.mrf.mxu1 }
 0x367   :  { %4651 = vmatpush.bf16.msrb.mxu1 %v7541_v31  ;;  %4675 = vmatpush.bf16.msrb.mxu3 %v7861_v34  ;;  %v10105_v31 = vpack.c.bf16 %v3070_v10, %v3062_v4  ;;  %v7973_v34 = vor.u32 %v9277_v23, %v7972_v21  ;;  %v7493_v39 = vor.u32 %v9157_v26, %v7492_v2  ;;  %v7940_v62 = vld [vmem:[#allocation13 + $0x480] sm:$0xf]  ;;  %v9229_v3 = vld [vmem:[#allocation13 + $0x34c] sm:$0xf0] }
 0x368   :  { %v2752_v35 = vadd.f32 %v10083_v45, %v2738_v48  ;;  %v10117_v0 = vpack.c.bf16 %v3071_v24, %v3063_v55  ;;  %v7780_v61 = vld [vmem:[#allocation13 + $0x340] sm:$0xf]  ;;  %v2792_v4 = vadd.f32 %v10098_v14, %v1321_v56  ;;  %v9265_v2 = vld [vmem:[#allocation13 + $0x46c] sm:$0xf0] }
 0x369   :  { %4639 = vmatpush.bf16.msrb.mxu0 %v7381_v8  ;;  %4663 = vmatpush.bf16.msrb.mxu2 %v7701_v54  ;;  %v8117_v8 = vor.u32 %v9313_v32, %v8116_v63  ;;  %v9309_v54 = vld [vmem:[#allocation13 + $0x5cc] sm:$0xf0]  ;;  %v8084_v45 = vld [vmem:[#allocation13 + $0x5a0] sm:$0xf] }
 0x36a   :  { %v8101_v6 = vor.u32 %v9309_v54, %v8100_v38  ;;  %v2766_v10 = vadd.f32 %v10088_v52, %v2752_v35  ;;  %v7924_v21 = vld [vmem:[#allocation13 + $0x460] sm:$0xf]  ;;  %v2806_v52 = vadd.f32 %v10101_v57, %v2792_v4  ;;  %v9225_v25 = vld [vmem:[#allocation13 + $0x32c] sm:$0xf0] }
 0x36b   :  { %4652 = vmatpush.bf16.msrb.mxu1 %v7525_v50  ;;  %4676 = vmatpush.bf16.msrb.mxu3 %v7845_v30  ;;  %v2750_v50 = vadd.f32 %v10066_v40, %v2736_v47  ;;  %v7957_v30 = vor.u32 %v9273_v51, %v7956_v46  ;;  %v2793_v1 = vpop.f32.mrf.mxu0  ;;  %v7764_v14 = vld [vmem:[#allocation13 + $0x320] sm:$0xf]  ;;  %v7925_v57 = vor.u32 %v9265_v2, %v7924_v21  ;;  %v9261_v44 = vld [vmem:[#allocation13 + $0x44c] sm:$0xf0]  ;;  %v9183_v21 = vld [vmem:[#allocation13 + $0x1e4] sm:$0xf] }
 0x36c   :  { %v2833_v40 = vpop.f32.mrf.mxu3  ;;  %v2780_v16 = vadd.f32 %v10103_v36, %v2766_v10  ;;  %v2794_v18 = vadd.f32 %v2793_v1, %v1321_v56  ;;  %v8068_v63 = vld [vmem:[#allocation13 + $0x580] sm:$0xf]  ;;  %v9301_v36 = vld [vmem:[#allocation13 + $0x58c] sm:$0xf0]  ;;  %v2820_v32 = vadd.f32 %v10109_v22, %v2806_v52 }
 0x36d   :  { %4640 = vmatpush.bf16.msrb.mxu0 %v7365_v12  ;;  %4664 = vmatpush.bf16.msrb.mxu2 %v7685_v11  ;;  %v2764_v7 = vadd.f32 %v10068_v9, %v2750_v50  ;;  %v9305_v12 = vld [vmem:[#allocation13 + $0x5ac] sm:$0xf0]  ;;  %v7637_v11 = vor.u32 %v9193_v60, %v7636_v59  ;;  %v7748_v46 = vld [vmem:[#allocation13 + $0x300] sm:$0xf] }
 0x36e   :  { %v9189_v9 = vld [vmem:[#allocation13 + $0x20c] sm:$0xf0]  ;;  %v2821_v23 = vpop.f32.mrf.mxu2  ;;  %v8085_v26 = vor.u32 %v9305_v12, %v8084_v45  ;;  %v2808_v29 = vadd.f32 %v2807_v13, %v2794_v18  ;;  %v3072_v24 = vmax.f32 %v2780_v16, 0.0  ;;  %v8052_v41 = vld [vmem:[#allocation13 + $0x560] sm:$0xf] }
 0x36f   :  { %4653 = vmatpush.bf16.msrb.mxu1 %v7509_v17  ;;  %4677 = vmatpush.bf16.msrb.mxu3 %v7829_v20  ;;  %v7781_v17 = vor.u32 %v9229_v3, %v7780_v61  ;;  %v7620_v20 = vld [vmem:[#allocation13 + $0x200] sm:$0xf]  ;;  %v2778_v27 = vadd.f32 %v10077_v28, %v2764_v7  ;;  %v9221_v47 = vld [vmem:[#allocation13 + $0x30c] sm:$0xf0]  ;;  %v8069_v28 = vor.u32 %v9301_v36, %v8068_v63  ;;  %v9151_v61 = vld [vmem:[#allocation13 + $0xe4] sm:$0xf] }
 0x370   :  { %4641 = vmatmul.bf16.vlgmr.msrb.gmra.mxu0 %v10105_v31  ;;  %v7621_v33 = vor.u32 %v9189_v9, %v7620_v20  ;;  %v9297_v22 = vld [vmem:[#allocation13 + $0x56c] sm:$0xf0]  ;;  %v7749_v54 = vor.u32 %v9221_v47, %v7748_v46  ;;  %v7892_v55 = vld [vmem:[#allocation13 + $0x420] sm:$0xf]  ;;  %v9147_v16 = vld [vmem:[#allocation13 + $0xc4] sm:$0xf] }
 0x371   :  { %4689 = vmatpush.bf16.msra.mxu0 %v7989_v15  ;;  %4665 = vmatpush.bf16.msrb.mxu2 %v7669_v37  ;;  %v7941_v15 = vor.u32 %v9269_v53, %v7940_v62  ;;  %v2822_v37 = vadd.f32 %v2821_v23, %v2808_v29  ;;  %v3064_v51 = vmax.f32 %v2778_v27, 0.0  ;;  %v9257_v56 = vld [vmem:[#allocation13 + $0x42c] sm:$0xf0]  ;;  %v8036_v59 = vld [vmem:[#allocation13 + $0x540] sm:$0xf] }
 0x372   :  { %v9293_v35 = vld [vmem:[#allocation13 + $0x54c] sm:$0xf0]  ;;  %v7893_v62 = vor.u32 %v9257_v56, %v7892_v55  ;;  %v7876_v1 = vld [vmem:[#allocation13 + $0x400] sm:$0xf]  ;;  %v7462_v18 = vld [vmem:[#allocation13 + $0xd0] sm:$0xf0] }
 0x373   :  { %4654 = vmatpush.bf16.msrb.mxu1 %v7493_v39  ;;  %4678 = vmatpush.bf16.msrb.mxu3 %v7813_v42  ;;  %v7908_v39 = vld [vmem:[#allocation13 + $0x440] sm:$0xf]  ;;  %v2834_v42 = vadd.f32 %v2833_v40, %v2820_v32  ;;  %v9345_v60 = vld [vmem:[#allocation13 + $0x6ec] sm:$0xf0]  ;;  %v8037_v3 = vor.u32 %v9293_v35, %v8036_v59  ;;  %v2861_v52 = vpop.f32.mrf.mxu1  ;;  %v7606_v23 = vld [vmem:[#allocation13 + $0x1f0] sm:$0xf0]  ;;  %v7465_v27 = vor.u32 %v9147_v16, %v7462_v18 }
 0x374   :  { %v2835_v43 = vpop.f32.mrf.mxu3  ;;  %v7909_v38 = vor.u32 %v9261_v44, %v7908_v39  ;;  %v9253_v40 = vld [vmem:[#allocation13 + $0x40c] sm:$0xf0]  ;;  %v8020_v7 = vld [vmem:[#allocation13 + $0x520] sm:$0xf]  ;;  %v9143_v29 = vld [vmem:[#allocation13 + $0xa4] sm:$0xf]  ;;  %v7609_v32 = vor.u32 %v9183_v21, %v7606_v23 }
 0x375   :  { %4690 = vmatpush.bf16.msra.mxu0 %v7973_v34  ;;  %4666 = vmatpush.bf16.msrb.mxu2 %v7653_v58  ;;  %v7765_v34 = vor.u32 %v9225_v25, %v7764_v14  ;;  %v2836_v49 = vadd.f32 %v2835_v43, %v2822_v37  ;;  %v3065_v50 = vmax.f32 %v2834_v42, 0.0  ;;  %v8053_v58 = vor.u32 %v9297_v22, %v8052_v41  ;;  %v9289_v10 = vld [vmem:[#allocation13 + $0x52c] sm:$0xf0]  ;;  %v8228_v45 = vld [vmem:[#allocation13 + $0x6c0] sm:$0xf] }
 0x376   :  { %4655 = vmatmul.bf16.vlgmr.msrb.gmra.mxu1 %v10117_v0  ;;  %v9341_v12 = vld [vmem:[#allocation13 + $0x6cc] sm:$0xf0]  ;;  %v7877_v4 = vor.u32 %v9253_v40, %v7876_v1  ;;  %v8004_v20 = vld [vmem:[#allocation13 + $0x500] sm:$0xf]  ;;  %v7446_v36 = vld [vmem:[#allocation13 + $0xb0] sm:$0xf0] }
 0x377   :  { %4703 = vmatpush.bf16.msra.mxu1 %v8117_v8  ;;  %4679 = vmatpush.bf16.msrb.mxu3 %v7797_v5  ;;  %v10127_v8 = vpack.c.bf16 %v3072_v24, %v3064_v51  ;;  %v3073_v48 = vmax.f32 %v2836_v49, 0.0  ;;  %v8244_v5 = vld [vmem:[#allocation13 + $0x6e0] sm:$0xf]  ;;  %v8229_v13 = vor.u32 %v9341_v12, %v8228_v45  ;;  %v9285_v9 = vld [vmem:[#allocation13 + $0x50c] sm:$0xf0]  ;;  %v1322_v39 = vperm.slane %v10058_v19, 4 }
 0x378   :  { %v8245_v53 = vor.u32 %v9345_v60, %v8244_v5  ;;  %v8212_v2 = vld [vmem:[#allocation13 + $0x6a0] sm:$0xf]  ;;  %v9337_v14 = vld [vmem:[#allocation13 + $0x6ac] sm:$0xf0]  ;;  %v8005_v63 = vor.u32 %v9285_v9, %v8004_v20  ;;  %v9179_v37 = vld [vmem:[#allocation13 + $0x1c4] sm:$0xf]  ;;  %v7449_v42 = vor.u32 %v9143_v29, %v7446_v36 }
 0x379   :  { %4691 = vmatpush.bf16.msra.mxu0 %v7957_v30  ;;  %4667 = vmatpush.bf16.msrb.mxu2 %v7637_v11  ;;  %v10130_v30 = vpack.c.bf16 %v3073_v48, %v3065_v50  ;;  %v2847_v11 = vpop.f32.mrf.mxu0  ;;  %v8213_v25 = vor.u32 %v9337_v14, %v8212_v2  ;;  %v9333_v24 = vld [vmem:[#allocation13 + $0x68c] sm:$0xf0]  ;;  %v9139_v43 = vld [vmem:[#allocation13 + $0x84] sm:$0xf]  ;;  %v7430_v44 = vld [vmem:[#allocation13 + $0x90] sm:$0xf0] }
 0x37a   :  { %v9175_v47 = vld [vmem:[#allocation13 + $0x1a4] sm:$0xf]  ;;  %v7574_v49 = vld [vmem:[#allocation13 + $0x1b0] sm:$0xf0]  ;;  %v8180_v41 = vld [vmem:[#allocation13 + $0x660] sm:$0xf]  ;;  %v2848_v48 = vadd.f32 %v2847_v11, %v1322_v39  ;;  %v7433_v50 = vor.u32 %v9139_v43, %v7430_v44 }
 0x37b   :  { %4704 = vmatpush.bf16.msra.mxu1 %v8101_v6  ;;  %4680 = vmatpush.bf16.msrb.mxu3 %v7781_v17  ;;  %v7478_v6 = vld [vmem:[#allocation13 + $0xf0] sm:$0xf0]  ;;  %v8021_v17 = vor.u32 %v9289_v10, %v8020_v7  ;;  %v9329_v22 = vld [vmem:[#allocation13 + $0x66c] sm:$0xf0]  ;;  %v9135_v55 = vld [vmem:[#allocation13 + $0x64] sm:$0xf]  ;;  %v7577_v35 = vor.u32 %v9175_v47, %v7574_v49 }
 0x37c   :  { %v2862_v56 = vadd.f32 %v2861_v52, %v2848_v48  ;;  %v7414_v59 = vld [vmem:[#allocation13 + $0x70] sm:$0xf0]  ;;  %v8164_v5 = vld [vmem:[#allocation13 + $0x640] sm:$0xf]  ;;  %v9325_v60 = vld [vmem:[#allocation13 + $0x64c] sm:$0xf0] }
 0x37d   :  { %4692 = vmatpush.bf16.msra.mxu0 %v7941_v15  ;;  %4668 = vmatpush.bf16.msrb.mxu2 %v7621_v33  ;;  %v7481_v15 = vor.u32 %v9151_v61, %v7478_v6  ;;  %v8196_v33 = vld [vmem:[#allocation13 + $0x680] sm:$0xf]  ;;  %v7558_v1 = vld [vmem:[#allocation13 + $0x190] sm:$0xf0]  ;;  %v8165_v40 = vor.u32 %v9325_v60, %v8164_v5  ;;  %v7417_v6 = vor.u32 %v9135_v55, %v7414_v59  ;;  %v9131_v45 = vld [vmem:[#allocation13 + $0x44] sm:$0xf] }
 0x37e   :  { %v7398_v12 = vld [vmem:[#allocation13 + $0x50] sm:$0xf0]  ;;  %v8148_v16 = vld [vmem:[#allocation13 + $0x620] sm:$0xf]  ;;  %v9321_v18 = vld [vmem:[#allocation13 + $0x62c] sm:$0xf0] }
 0x37f   :  { %4705 = vmatpush.bf16.msra.mxu1 %v8085_v26  ;;  %4681 = vmatpush.bf16.msrb.mxu3 %v7765_v34  ;;  %v8197_v34 = vor.u32 %v9333_v24, %v8196_v33  ;;  %v8149_v20 = vor.u32 %v9321_v18, %v8148_v16  ;;  %v7401_v9 = vor.u32 %v9131_v45, %v7398_v12  ;;  %v9127_v21 = vld [vmem:[#allocation13 + $0x24] sm:$0xf]  ;;  %v7382_v52 = vld [vmem:[#allocation13 + $0x30] sm:$0xf0]  ;;  %v9377_v33 = vld [vmem:[#allocation13 + $0x7ec] sm:$0xf0] }
 0x380   :  { %4669 = vmatmul.bf16.vlgmr.msrb.gmra.mxu2 %v10127_v8  ;;  %v7526_v29 = vld [vmem:[#allocation13 + $0x150] sm:$0xf0]  ;;  %v7385_v24 = vor.u32 %v9127_v21, %v7382_v52  ;;  %v9279_v43 = vld [vmem:[#allocation13 + $0x4e4] sm:$0xf]  ;;  %v8356_v49 = vld [vmem:[#allocation13 + $0x7c0] sm:$0xf] }
 0x381   :  { %4693 = vmatpush.bf16.msra.mxu0 %v7925_v57  ;;  %4717 = vmatpush.bf16.msra.mxu2 %v8245_v53  ;;  %v7590_v57 = vld [vmem:[#allocation13 + $0x1d0] sm:$0xf0]  ;;  %v9171_v53 = vld [vmem:[#allocation13 + $0x184] sm:$0xf] }
 0x382   :  { %v7593_v46 = vor.u32 %v9179_v37, %v7590_v57  ;;  %v9215_v57 = vld [vmem:[#allocation13 + $0x2e4] sm:$0xf]  ;;  %v7990_v47 = vld [vmem:[#allocation13 + $0x4f0] sm:$0xf0] }
 0x383   :  { %4706 = vmatpush.bf16.msra.mxu1 %v8069_v28  ;;  %4682 = vmatpush.bf16.msrb.mxu3 %v7749_v54  ;;  %v2875_v26 = vpop.f32.mrf.mxu2  ;;  %v2849_v28 = vpop.f32.mrf.mxu0  ;;  %v9275_v55 = vld [vmem:[#allocation13 + $0x4c4] sm:$0xf]  ;;  %v7494_v60 = vld [vmem:[#allocation13 + $0x110] sm:$0xf0] }
 0x384   :  { %v2863_v54 = vpop.f32.mrf.mxu1  ;;  %v9155_v5 = vld [vmem:[#allocation13 + $0x104] sm:$0xf]  ;;  %v7686_v18 = vld [vmem:[#allocation13 + $0x290] sm:$0xf0] }
 0x385   :  { %4694 = vmatpush.bf16.msra.mxu0 %v7909_v38  ;;  %4718 = vmatpush.bf16.msra.mxu2 %v8229_v13  ;;  %v8181_v38 = vor.u32 %v9329_v22, %v8180_v41  ;;  %v9167_v13 = vld [vmem:[#allocation13 + $0x164] sm:$0xf]  ;;  %v9373_v41 = vld [vmem:[#allocation13 + $0x7cc] sm:$0xf0]  ;;  %v7497_v45 = vor.u32 %v9155_v5, %v7494_v60  ;;  %v7942_v52 = vld [vmem:[#allocation13 + $0x490] sm:$0xf0] }
 0x386   :  { %4683 = vmatmul.bf16.vlgmr.msrb.gmra.mxu3 %v10130_v30  ;;  %v9211_v22 = vld [vmem:[#allocation13 + $0x2c4] sm:$0xf]  ;;  %v7638_v5 = vld [vmem:[#allocation13 + $0x230] sm:$0xf0] }
 0x387   :  { %4707 = vmatpush.bf16.msra.mxu1 %v8053_v58  ;;  %v2850_v58 = vadd.f32 %v2849_v28, %v1322_v39  ;;  %v9123_v39 = vld [vmem:[#allocation13 + $0x4] sm:$0xf] }
 0x388   :  { %v9159_v28 = vld [vmem:[#allocation13 + $0x124] sm:$0xf] }
 0x389   :  { %4695 = vmatpush.bf16.msra.mxu0 %v7893_v62  ;;  %4719 = vmatpush.bf16.msra.mxu2 %v8213_v25  ;;  %v2889_v51 = vpop.f32.mrf.mxu3  ;;  %v2864_v61 = vadd.f32 %v2863_v54, %v2850_v58  ;;  %v8132_v25 = vld [vmem:[#allocation13 + $0x600] sm:$0xf]  ;;  %v7718_v54 = vld [vmem:[#allocation13 + $0x2d0] sm:$0xf0]  ;;  %v9267_v21 = vld [vmem:[#allocation13 + $0x484] sm:$0xf] }
 0x38a   :  { %v7721_v58 = vor.u32 %v9211_v22, %v7718_v54 }
 0x38b   :  { %4708 = vmatpush.bf16.msra.mxu1 %v8037_v3  ;;  %v2877_v62 = vpop.f32.mrf.mxu2  ;;  %v2876_v3 = vadd.f32 %v2875_v26, %v2862_v56  ;;  %v9317_v26 = vld [vmem:[#allocation13 + $0x60c] sm:$0xf0] }
 0x38c   :  { %v2878_v10 = vadd.f32 %v2877_v62, %v2864_v61  ;;  %v8340_v62 = vld [vmem:[#allocation13 + $0x7a0] sm:$0xf] }
 0x38d   :  { %4696 = vmatpush.bf16.msra.mxu0 %v7877_v4  ;;  %4720 = vmatpush.bf16.msra.mxu2 %v8197_v34  ;;  %v2890_v7 = vadd.f32 %v2889_v51, %v2876_v3  ;;  %v7561_v4 = vor.u32 %v9171_v53, %v7558_v1  ;;  %v7734_v34 = vld [vmem:[#allocation13 + $0x2f0] sm:$0xf0]  ;;  %v2903_v59 = vpop.f32.mrf.mxu0  ;;  %v9369_v53 = vld [vmem:[#allocation13 + $0x7ac] sm:$0xf0]  ;;  %v9207_v1 = vld [vmem:[#allocation13 + $0x2a4] sm:$0xf] }
 0x38e   :  { %v7510_v51 = vld [vmem:[#allocation13 + $0x130] sm:$0xf0]  ;;  %v8341_v61 = vor.u32 %v9369_v53, %v8340_v62  ;;  %v9311_v53 = vld [vmem:[#allocation13 + $0x5e4] sm:$0xf] }
 0x38f   :  { %4709 = vmatpush.bf16.msra.mxu1 %v8021_v17  ;;  %v3066_v23 = vmax.f32 %v2890_v7, 0.0  ;;  %v7513_v56 = vor.u32 %v9159_v28, %v7510_v51  ;;  %v7702_v3 = vld [vmem:[#allocation13 + $0x2b0] sm:$0xf0]  ;;  %v9271_v7 = vld [vmem:[#allocation13 + $0x4a4] sm:$0xf] }
 0x390   :  { %v7705_v12 = vor.u32 %v9207_v1, %v7702_v3  ;;  %v8118_v1 = vld [vmem:[#allocation13 + $0x5f0] sm:$0xf0] }
 0x391   :  { %4745 = vmatpush.bf16.msrb.mxu0 %v7481_v15  ;;  %4721 = vmatpush.bf16.msra.mxu2 %v8181_v38  ;;  %v2891_v11 = vpop.f32.mrf.mxu3  ;;  %v7542_v15 = vld [vmem:[#allocation13 + $0x170] sm:$0xf0]  ;;  %v8357_v38 = vor.u32 %v9373_v41, %v8356_v49 }
 0x392   :  { %v2892_v17 = vadd.f32 %v2891_v11, %v2878_v10  ;;  %v7545_v14 = vor.u32 %v9167_v13, %v7542_v15  ;;  %v7958_v10 = vld [vmem:[#allocation13 + $0x4b0] sm:$0xf0]  ;;  %v8324_v13 = vld [vmem:[#allocation13 + $0x780] sm:$0xf]  ;;  %v9365_v11 = vld [vmem:[#allocation13 + $0x78c] sm:$0xf0] }
 0x393   :  { %4710 = vmatpush.bf16.msra.mxu1 %v8005_v63  ;;  %v8133_v63 = vor.u32 %v9317_v26, %v8132_v25  ;;  %v9203_v15 = vld [vmem:[#allocation13 + $0x284] sm:$0xf]  ;;  %v8325_v16 = vor.u32 %v9365_v11, %v8324_v13  ;;  %v7894_v3 = vld [vmem:[#allocation13 + $0x430] sm:$0xf0] }
 0x394   :  { %v3074_v2 = vmax.f32 %v2892_v17, 0.0  ;;  %v7689_v17 = vor.u32 %v9203_v15, %v7686_v18  ;;  %v9187_v13 = vld [vmem:[#allocation13 + $0x204] sm:$0xf]  ;;  %v7622_v11 = vld [vmem:[#allocation13 + $0x210] sm:$0xf0] }
 0x395   :  { %4746 = vmatpush.bf16.msrb.mxu0 %v7465_v27  ;;  %4722 = vmatpush.bf16.msra.mxu2 %v8165_v40  ;;  %v9163_v27 = vld [vmem:[#allocation13 + $0x144] sm:$0xf]  ;;  %v2917_v40 = vpop.f32.mrf.mxu1  ;;  %v2905_v25 = vpop.f32.mrf.mxu0 }
 0x396   :  { %v10134_v36 = vpack.c.bf16 %v3074_v2, %v3066_v23  ;;  %v7529_v44 = vor.u32 %v9163_v27, %v7526_v29  ;;  %v8308_v23 = vld [vmem:[#allocation13 + $0x760] sm:$0xf]  ;;  %v9361_v2 = vld [vmem:[#allocation13 + $0x76c] sm:$0xf0]  ;;  %v7670_v29 = vld [vmem:[#allocation13 + $0x270] sm:$0xf0] }
 0x397   :  { %4759 = vmatpush.bf16.msrb.mxu1 %v7609_v32  ;;  %v8372_v32 = vld [vmem:[#allocation13 + $0x7e0] sm:$0xf]  ;;  %v8309_v27 = vor.u32 %v9361_v2, %v8308_v23  ;;  %v9251_v18 = vld [vmem:[#allocation13 + $0x404] sm:$0xf]  ;;  %v7862_v23 = vld [vmem:[#allocation13 + $0x3f0] sm:$0xf0] }
 0x398   :  { %v8373_v37 = vor.u32 %v9377_v33, %v8372_v32  ;;  %4697 = vmatmul.bf16.vlgmr.msra.gmra.mxu0 %v10134_v36  ;;  %v7945_v32 = vor.u32 %v9267_v21, %v7942_v52  ;;  %v9263_v33 = vld [vmem:[#allocation13 + $0x464] sm:$0xf]  ;;  %v7878_v21 = vld [vmem:[#allocation13 + $0x410] sm:$0xf0]  ;;  %v7484_v2 = vld [vmem:[#allocation13 + $0xe8] sm:$0xf] }
 0x399   :  { %4747 = vmatpush.bf16.msrb.mxu0 %v7449_v42  ;;  %4723 = vmatpush.bf16.msra.mxu2 %v8149_v20  ;;  %v7366_v42 = vld [vmem:[#allocation13 + $0x10] sm:$0xf0]  ;;  %v1323_v20 = vperm.slane %v10058_v19, 5  ;;  %v9247_v52 = vld [vmem:[#allocation13 + $0x3e4] sm:$0xf] }
 0x39a   :  { %4731 = vmatpush.bf16.msra.mxu3 %v8373_v37  ;;  %v7369_v48 = vor.u32 %v9123_v39, %v7366_v42  ;;  %v9357_v39 = vld [vmem:[#allocation13 + $0x74c] sm:$0xf0]  ;;  %v9195_v42 = vld [vmem:[#allocation13 + $0x244] sm:$0xf] }
 0x39b   :  { %4760 = vmatpush.bf16.msrb.mxu1 %v7593_v46  ;;  %v7737_v46 = vor.u32 %v9215_v57, %v7734_v34  ;;  %v8292_v34 = vld [vmem:[#allocation13 + $0x740] sm:$0xf] }
 0x39d   :  { %4748 = vmatpush.bf16.msrb.mxu0 %v7433_v50  ;;  %4724 = vmatpush.bf16.msra.mxu2 %v8133_v63  ;;  %v7993_v50 = vor.u32 %v9279_v43, %v7990_v47  ;;  %v2904_v63 = vadd.f32 %v2903_v59, %v1323_v20  ;;  %v2919_v57 = vpop.f32.mrf.mxu1  ;;  %v7654_v47 = vld [vmem:[#allocation13 + $0x250] sm:$0xf0] }
 0x39e   :  { %4732 = vmatpush.bf16.msra.mxu3 %v8357_v38  ;;  %v7657_v51 = vor.u32 %v9195_v42, %v7654_v47  ;;  %v7910_v38 = vld [vmem:[#allocation13 + $0x450] sm:$0xf0] }
 0x39f   :  { %4761 = vmatpush.bf16.msrb.mxu1 %v7577_v35  ;;  %v7974_v35 = vld [vmem:[#allocation13 + $0x4d0] sm:$0xf0]  ;;  %v2918_v43 = vadd.f32 %v2917_v40, %v2904_v63  ;;  %v9303_v63 = vld [vmem:[#allocation13 + $0x5a4] sm:$0xf] }
 0x3a0   :  { %v8070_v47 = vld [vmem:[#allocation13 + $0x590] sm:$0xf0] }
 0x3a1   :  { %4749 = vmatpush.bf16.msrb.mxu0 %v7417_v6  ;;  %4773 = vmatpush.bf16.msrb.mxu2 %v7737_v46  ;;  %v7977_v6 = vor.u32 %v9275_v55, %v7974_v35  ;;  %v8293_v46 = vor.u32 %v9357_v39, %v8292_v34  ;;  %v8276_v55 = vld [vmem:[#allocation13 + $0x720] sm:$0xf]  ;;  %v9150_v34 = vld [vmem:[#allocation13 + $0xd4] sm:$0xf0] }
 0x3a2   :  { %4733 = vmatpush.bf16.msra.mxu3 %v8341_v61  ;;  %v9255_v61 = vld [vmem:[#allocation13 + $0x424] sm:$0xf] }
 0x3a3   :  { %4762 = vmatpush.bf16.msrb.mxu1 %v7561_v4  ;;  %v2931_v4 = vpop.f32.mrf.mxu2 }
 0x3a4   :  { %v2932_v41 = vadd.f32 %v2931_v4, %v2918_v43  ;;  %v9239_v43 = vld [vmem:[#allocation13 + $0x3a4] sm:$0xf] }
 0x3a5   :  { %4750 = vmatpush.bf16.msrb.mxu0 %v7401_v9  ;;  %4774 = vmatpush.bf16.msrb.mxu2 %v7721_v58  ;;  %v7961_v9 = vor.u32 %v9271_v7, %v7958_v10  ;;  %v9191_v58 = vld [vmem:[#allocation13 + $0x224] sm:$0xf]  ;;  %v8260_v10 = vld [vmem:[#allocation13 + $0x700] sm:$0xf] }
 0x3a6   :  { %4734 = vmatpush.bf16.msra.mxu3 %v8325_v16  ;;  %v7641_v40 = vor.u32 %v9191_v58, %v7638_v5  ;;  %v7897_v16 = vor.u32 %v9255_v61, %v7894_v3  ;;  %v7436_v5 = vld [vmem:[#allocation13 + $0x88] sm:$0xf]  ;;  %v7798_v61 = vld [vmem:[#allocation13 + $0x370] sm:$0xf0] }
 0x3a7   :  { %4763 = vmatpush.bf16.msrb.mxu1 %v7545_v14  ;;  %v9199_v14 = vld [vmem:[#allocation13 + $0x264] sm:$0xf] }
 0x3a8   :  { %v7673_v37 = vor.u32 %v9199_v14, %v7670_v29  ;;  %v9154_v14 = vld [vmem:[#allocation13 + $0xf4] sm:$0xf0]  ;;  %v7881_v29 = vor.u32 %v9251_v18, %v7878_v21  ;;  %v7782_v18 = vld [vmem:[#allocation13 + $0x350] sm:$0xf0] }
 0x3a9   :  { %4751 = vmatpush.bf16.msrb.mxu0 %v7385_v24  ;;  %4775 = vmatpush.bf16.msrb.mxu2 %v7705_v12  ;;  %v2945_v26 = vpop.f32.mrf.mxu3  ;;  %v7926_v24 = vld [vmem:[#allocation13 + $0x470] sm:$0xf0]  ;;  %v8121_v12 = vor.u32 %v9311_v53, %v8118_v1  ;;  %v9231_v53 = vld [vmem:[#allocation13 + $0x364] sm:$0xf] }
 0x3aa   :  { %4735 = vmatpush.bf16.msra.mxu3 %v8309_v27  ;;  %v7929_v22 = vor.u32 %v9263_v33, %v7926_v24  ;;  %v2946_v54 = vadd.f32 %v2945_v26, %v2932_v41  ;;  %v9243_v27 = vld [vmem:[#allocation13 + $0x3c4] sm:$0xf]  ;;  %v7846_v33 = vld [vmem:[#allocation13 + $0x3d0] sm:$0xf0]  ;;  %v7485_v24 = vor.u32 %v9154_v14, %v7484_v2  ;;  %v7452_v41 = vld [vmem:[#allocation13 + $0xa8] sm:$0xf] }
 0x3ab   :  { %4764 = vmatpush.bf16.msrb.mxu1 %v7529_v44  ;;  %v2906_v44 = vadd.f32 %v2905_v25, %v1323_v20  ;;  %v2933_v28 = vpop.f32.mrf.mxu2  ;;  %v8102_v20 = vld [vmem:[#allocation13 + $0x5d0] sm:$0xf0]  ;;  %v7865_v25 = vor.u32 %v9247_v52, %v7862_v23  ;;  %v9291_v1 = vld [vmem:[#allocation13 + $0x544] sm:$0xf] }
 0x3ac   :  { %v8022_v21 = vld [vmem:[#allocation13 + $0x530] sm:$0xf0] }
 0x3ad   :  { %4752 = vmatpush.bf16.msrb.mxu0 %v7369_v48  ;;  %4776 = vmatpush.bf16.msrb.mxu2 %v7689_v17  ;;  %v2920_v49 = vadd.f32 %v2919_v57, %v2906_v44  ;;  %v9259_v48 = vld [vmem:[#allocation13 + $0x444] sm:$0xf]  ;;  %v7468_v57 = vld [vmem:[#allocation13 + $0xc8] sm:$0xf]  ;;  %v2959_v39 = vpop.f32.mrf.mxu0  ;;  %v7830_v44 = vld [vmem:[#allocation13 + $0x3b0] sm:$0xf0] }
 0x3ae   :  { %4736 = vmatpush.bf16.msra.mxu3 %v8293_v46  ;;  %v7913_v62 = vor.u32 %v9259_v48, %v7910_v38  ;;  %v9307_v17 = vld [vmem:[#allocation13 + $0x5c4] sm:$0xf]  ;;  %v7814_v38 = vld [vmem:[#allocation13 + $0x390] sm:$0xf0] }
 0x3af   :  { %4765 = vmatpush.bf16.msrb.mxu1 %v7513_v56  ;;  %v9353_v56 = vld [vmem:[#allocation13 + $0x72c] sm:$0xf0]  ;;  %v8105_v26 = vor.u32 %v9307_v17, %v8102_v20  ;;  %v9299_v46 = vld [vmem:[#allocation13 + $0x584] sm:$0xf] }
 0x3b0   :  { %4753 = vmatmul.bf16.vlgmr.msrb.gmra.mxu0 %v10105_v31  ;;  %v8277_v35 = vor.u32 %v9353_v56, %v8276_v55  ;;  %v9235_v48 = vld [vmem:[#allocation13 + $0x384] sm:$0xf]  ;;  %v8054_v56 = vld [vmem:[#allocation13 + $0x570] sm:$0xf0] }
 0x3b1   :  { %4801 = vmatpush.bf16.msra.mxu0 %v7993_v50  ;;  %4777 = vmatpush.bf16.msrb.mxu2 %v7673_v37  ;;  %v2934_v50 = vadd.f32 %v2933_v28, %v2920_v49  ;;  %v2947_v59 = vpop.f32.mrf.mxu3  ;;  %v7849_v37 = vor.u32 %v9243_v27, %v7846_v33  ;;  %v7833_v28 = vor.u32 %v9239_v43, %v7830_v44  ;;  %v9295_v55 = vld [vmem:[#allocation13 + $0x564] sm:$0xf]  ;;  %v9134_v27 = vld [vmem:[#allocation13 + $0x54] sm:$0xf0]  ;;  %v7388_v43 = vld [vmem:[#allocation13 + $0x28] sm:$0xf] }
 0x3b2   :  { %4737 = vmatpush.bf16.msra.mxu3 %v8277_v35  ;;  %v7469_v49 = vor.u32 %v9150_v34, %v7468_v57  ;;  %v7817_v58 = vor.u32 %v9235_v48, %v7814_v38  ;;  %v1324_v35 = vperm.slane %v10058_v19, 6  ;;  %v8006_v57 = vld [vmem:[#allocation13 + $0x510] sm:$0xf0]  ;;  %v7612_v44 = vld [vmem:[#allocation13 + $0x1e8] sm:$0xf] }
 0x3b3   :  { %4766 = vmatpush.bf16.msrb.mxu1 %v7497_v45  ;;  %v2948_v60 = vadd.f32 %v2947_v59, %v2934_v50  ;;  %v9349_v45 = vld [vmem:[#allocation13 + $0x70c] sm:$0xf0]  ;;  %v8073_v50 = vor.u32 %v9299_v46, %v8070_v47  ;;  %v9186_v46 = vld [vmem:[#allocation13 + $0x1f4] sm:$0xf0]  ;;  %v7750_v48 = vld [vmem:[#allocation13 + $0x310] sm:$0xf0] }
 0x3b4   :  { %v8261_v4 = vor.u32 %v9349_v45, %v8260_v10  ;;  %v7801_v10 = vor.u32 %v9231_v53, %v7798_v61  ;;  %v2960_v45 = vadd.f32 %v2959_v39, %v1324_v35  ;;  %v8230_v53 = vld [vmem:[#allocation13 + $0x6d0] sm:$0xf0]  ;;  %v9282_v61 = vld [vmem:[#allocation13 + $0x4f4] sm:$0xf0] }
 0x3b5   :  { %4802 = vmatpush.bf16.msra.mxu0 %v7977_v6  ;;  %4778 = vmatpush.bf16.msrb.mxu2 %v7657_v51  ;;  %v3067_v6 = vmax.f32 %v2946_v54, 0.0  ;;  %v3075_v7 = vmax.f32 %v2948_v60, 0.0  ;;  %v2973_v51 = vpop.f32.mrf.mxu1  ;;  %v9142_v60 = vld [vmem:[#allocation13 + $0x94] sm:$0xf0]  ;;  %v2961_v3 = vpop.f32.mrf.mxu0 }
 0x3b6   :  { %4738 = vmatpush.bf16.msra.mxu3 %v8261_v4  ;;  %v9138_v4 = vld [vmem:[#allocation13 + $0x74] sm:$0xf0]  ;;  %v2974_v17 = vadd.f32 %v2973_v51, %v2960_v45  ;;  %v2962_v20 = vadd.f32 %v2961_v3, %v1324_v35  ;;  %v9343_v51 = vld [vmem:[#allocation13 + $0x6e4] sm:$0xf] }
 0x3b7   :  { %v10139_v15 = vpack.c.bf16 %v3075_v7, %v3067_v6  ;;  %v7437_v7 = vor.u32 %v9142_v60, %v7436_v5  ;;  %v9182_v35 = vld [vmem:[#allocation13 + $0x1d4] sm:$0xf0] }
 0x3b8   :  { %v9126_v60 = vld [vmem:[#allocation13 + $0x14] sm:$0xf0] }
 0x3b9   :  { %4803 = vmatpush.bf16.msra.mxu0 %v7961_v9  ;;  %4779 = vmatpush.bf16.msrb.mxu2 %v7641_v40  ;;  %v7625_v9 = vor.u32 %v9187_v13, %v7622_v11  ;;  %v8038_v40 = vld [vmem:[#allocation13 + $0x550] sm:$0xf0]  ;;  %v9227_v13 = vld [vmem:[#allocation13 + $0x344] sm:$0xf]  ;;  %v9178_v45 = vld [vmem:[#allocation13 + $0x1b4] sm:$0xf0] }
 0x3ba   :  { %4711 = vmatmul.bf16.vlgmr.msra.gmra.mxu1 %v10139_v15  ;;  %4787 = vmatpush.bf16.msrb.mxu3 %v7865_v25  ;;  %v7785_v52 = vor.u32 %v9227_v13, %v7782_v18  ;;  %v8214_v13 = vld [vmem:[#allocation13 + $0x6b0] sm:$0xf0] }
 0x3bb   :  { %4815 = vmatpush.bf16.msra.mxu1 %v8121_v12  ;;  %v7420_v12 = vld [vmem:[#allocation13 + $0x68] sm:$0xf] }
 0x3bc   :  { %v7421_v2 = vor.u32 %v9138_v4, %v7420_v12  ;;  %v9335_v4 = vld [vmem:[#allocation13 + $0x6a4] sm:$0xf] }
 0x3bd   :  { %4804 = vmatpush.bf16.msra.mxu0 %v7945_v32  ;;  %4780 = vmatpush.bf16.msrb.mxu2 %v7625_v9  ;;  %v8086_v32 = vld [vmem:[#allocation13 + $0x5b0] sm:$0xf0]  ;;  %v2975_v11 = vpop.f32.mrf.mxu1  ;;  %v9287_v9 = vld [vmem:[#allocation13 + $0x524] sm:$0xf] }
 0x3be   :  { %v8089_v42 = vor.u32 %v9303_v63, %v8086_v32  ;;  %4788 = vmatpush.bf16.msrb.mxu3 %v7849_v37  ;;  %v2976_v14 = vadd.f32 %v2975_v11, %v2962_v20  ;;  %v9223_v63 = vld [vmem:[#allocation13 + $0x324] sm:$0xf]  ;;  %v7766_v32 = vld [vmem:[#allocation13 + $0x330] sm:$0xf0]  ;;  %v7980_v11 = vld [vmem:[#allocation13 + $0x4c8] sm:$0xf]  ;;  %v8217_v20 = vor.u32 %v9335_v4, %v8214_v13 }
 0x3bf   :  { %4816 = vmatpush.bf16.msra.mxu1 %v8105_v26  ;;  %v7404_v26 = vld [vmem:[#allocation13 + $0x48] sm:$0xf]  ;;  %v9283_v37 = vld [vmem:[#allocation13 + $0x504] sm:$0xf]  ;;  %v7769_v34 = vor.u32 %v9223_v63, %v7766_v32  ;;  %v9158_v4 = vld [vmem:[#allocation13 + $0x114] sm:$0xf0] }
 0x3c0   :  { %v7548_v32 = vld [vmem:[#allocation13 + $0x168] sm:$0xf] }
 0x3c1   :  { %4805 = vmatpush.bf16.msra.mxu0 %v7929_v22  ;;  %v9146_v22 = vld [vmem:[#allocation13 + $0xb4] sm:$0xf0] }
 0x3c2   :  { %4789 = vmatpush.bf16.msrb.mxu3 %v7833_v28  ;;  %v7453_v59 = vor.u32 %v9146_v22, %v7452_v41  ;;  %v9130_v28 = vld [vmem:[#allocation13 + $0x34] sm:$0xf0]  ;;  %v8009_v41 = vor.u32 %v9283_v37, %v8006_v57  ;;  %v9219_v22 = vld [vmem:[#allocation13 + $0x304] sm:$0xf]  ;;  %v8182_v57 = vld [vmem:[#allocation13 + $0x670] sm:$0xf0] }
 0x3c3   :  { %v2987_v54 = vpop.f32.mrf.mxu2  ;;  %4817 = vmatpush.bf16.msra.mxu1 %v8089_v42  ;;  %v7405_v42 = vor.u32 %v9134_v27, %v7404_v26  ;;  %v9274_v26 = vld [vmem:[#allocation13 + $0x4b4] sm:$0xf0]  ;;  %v9327_v37 = vld [vmem:[#allocation13 + $0x664] sm:$0xf] }
 0x3c4   :  { %v2988_v25 = vadd.f32 %v2987_v54, %v2974_v17 }
 0x3c5   :  { %4806 = vmatpush.bf16.msra.mxu0 %v7913_v62  ;;  %v8057_v62 = vor.u32 %v9295_v55, %v8054_v56  ;;  %v7389_v55 = vor.u32 %v9130_v28, %v7388_v43 }
 0x3c6   :  { %4790 = vmatpush.bf16.msrb.mxu3 %v7817_v58  ;;  %v7372_v58 = vld [vmem:[#allocation13 + $0x8] sm:$0xf] }
 0x3c7   :  { %4818 = vmatpush.bf16.msra.mxu1 %v8073_v50  ;;  %v7613_v50 = vor.u32 %v9186_v46, %v7612_v44  ;;  %v8185_v44 = vor.u32 %v9327_v37, %v8182_v57  ;;  %v7532_v46 = vld [vmem:[#allocation13 + $0x148] sm:$0xf]  ;;  %v9310_v57 = vld [vmem:[#allocation13 + $0x5d4] sm:$0xf0] }
 0x3c8   :  { %v8108_v37 = vld [vmem:[#allocation13 + $0x5c8] sm:$0xf] }
 0x3c9   :  { %4807 = vmatpush.bf16.msra.mxu0 %v7897_v16  ;;  %v3001_v6 = vpop.f32.mrf.mxu3  ;;  %v8041_v16 = vor.u32 %v9291_v1, %v8038_v40  ;;  %v7753_v1 = vor.u32 %v9219_v22, %v7750_v48  ;;  %v7996_v40 = vld [vmem:[#allocation13 + $0x4e8] sm:$0xf] }
 0x3ca   :  { %4767 = vmatmul.bf16.vlgmr.msrb.gmra.mxu1 %v10117_v0  ;;  %4791 = vmatpush.bf16.msrb.mxu3 %v7801_v10  ;;  %v3002_v33 = vadd.f32 %v3001_v6, %v2988_v25  ;;  %v7373_v6 = vor.u32 %v9126_v60, %v7372_v58  ;;  %v7580_v10 = vld [vmem:[#allocation13 + $0x1a8] sm:$0xf]  ;;  %v7997_v12 = vor.u32 %v9282_v61, %v7996_v40  ;;  %v9162_v58 = vld [vmem:[#allocation13 + $0x134] sm:$0xf0] }
 0x3cb   :  { %4819 = vmatpush.bf16.msra.mxu1 %v8057_v62  ;;  %v2989_v23 = vpop.f32.mrf.mxu2  ;;  %v9339_v62 = vld [vmem:[#allocation13 + $0x6c4] sm:$0xf]  ;;  %v7581_v18 = vor.u32 %v9178_v45, %v7580_v10  ;;  %v7964_v25 = vld [vmem:[#allocation13 + $0x4a8] sm:$0xf]  ;;  %v9262_v61 = vld [vmem:[#allocation13 + $0x454] sm:$0xf0] }
 0x3cc   :  { %v3068_v38 = vmax.f32 %v3002_v33, 0.0  ;;  %v9170_v33 = vld [vmem:[#allocation13 + $0x174] sm:$0xf0]  ;;  %v7932_v48 = vld [vmem:[#allocation13 + $0x468] sm:$0xf] }
 0x3cd   :  { %4808 = vmatpush.bf16.msra.mxu0 %v7881_v29  ;;  %v8025_v29 = vor.u32 %v9287_v9, %v8022_v21  ;;  %v3015_v17 = vpop.f32.mrf.mxu0  ;;  %v7564_v9 = vld [vmem:[#allocation13 + $0x188] sm:$0xf]  ;;  %v9174_v21 = vld [vmem:[#allocation13 + $0x194] sm:$0xf0]  ;;  %v7549_v43 = vor.u32 %v9170_v33, %v7548_v32  ;;  %v9315_v45 = vld [vmem:[#allocation13 + $0x604] sm:$0xf] }
 0x3ce   :  { %4792 = vmatpush.bf16.msrb.mxu3 %v7785_v52  ;;  %v7565_v27 = vor.u32 %v9174_v21, %v7564_v9  ;;  %v7916_v40 = vld [vmem:[#allocation13 + $0x448] sm:$0xf] }
 0x3cf   :  { %4820 = vmatpush.bf16.msra.mxu1 %v8041_v16  ;;  %v9278_v16 = vld [vmem:[#allocation13 + $0x4d4] sm:$0xf0]  ;;  %v7900_v21 = vld [vmem:[#allocation13 + $0x428] sm:$0xf] }
 0x3d0   :  { %4809 = vmatmul.bf16.vlgmr.msra.gmra.mxu0 %v10134_v36  ;;  %v7981_v52 = vor.u32 %v9278_v16, %v7980_v11  ;;  %v7917_v16 = vor.u32 %v9262_v61, %v7916_v40  ;;  %v9302_v40 = vld [vmem:[#allocation13 + $0x594] sm:$0xf0] }
 0x3d1   :  { %4857 = vmatpush.bf16.msrb.mxu0 %v7485_v24  ;;  %v2990_v24 = vadd.f32 %v2989_v23, %v2976_v14  ;;  %v3003_v39 = vpop.f32.mrf.mxu3  ;;  %v9331_v23 = vld [vmem:[#allocation13 + $0x684] sm:$0xf] }
 0x3d2   :  { %4793 = vmatpush.bf16.msrb.mxu3 %v7769_v34  ;;  %v7948_v34 = vld [vmem:[#allocation13 + $0x488] sm:$0xf] }
 0x3d3   :  { %v3004_v47 = vadd.f32 %v3003_v39, %v2990_v24  ;;  %4821 = vmatpush.bf16.msra.mxu1 %v8025_v29  ;;  %v3029_v14 = vpop.f32.mrf.mxu1  ;;  %v7965_v24 = vor.u32 %v9274_v26, %v7964_v25  ;;  %v9270_v39 = vld [vmem:[#allocation13 + $0x494] sm:$0xf0]  ;;  %v8374_v25 = vld [vmem:[#allocation13 + $0x7f0] sm:$0xf0]  ;;  %v7740_v26 = vld [vmem:[#allocation13 + $0x2e8] sm:$0xf] }
 0x3d4   :  { %v7949_v28 = vor.u32 %v9270_v39, %v7948_v34 }
 0x3d5   :  { %4858 = vmatpush.bf16.msrb.mxu0 %v7469_v49  ;;  %v8246_v49 = vld [vmem:[#allocation13 + $0x6f0] sm:$0xf0]  ;;  %v3076_v54 = vmax.f32 %v3004_v47, 0.0  ;;  %v9166_v47 = vld [vmem:[#allocation13 + $0x154] sm:$0xf0] }
 0x3d6   :  { %v8249_v56 = vor.u32 %v9343_v51, %v8246_v49  ;;  %4794 = vmatpush.bf16.msrb.mxu3 %v7753_v1  ;;  %v9323_v51 = vld [vmem:[#allocation13 + $0x644] sm:$0xf]  ;;  %v8166_v49 = vld [vmem:[#allocation13 + $0x650] sm:$0xf0] }
 0x3d7   :  { %v10145_v5 = vpack.c.bf16 %v3076_v54, %v3068_v38  ;;  %4822 = vmatpush.bf16.msra.mxu1 %v8009_v41  ;;  %v3017_v41 = vpop.f32.mrf.mxu0  ;;  %v9266_v38 = vld [vmem:[#allocation13 + $0x474] sm:$0xf0] }
 0x3d8   :  { %v7933_v60 = vor.u32 %v9266_v38, %v7932_v48  ;;  %v8092_v38 = vld [vmem:[#allocation13 + $0x5a8] sm:$0xf] }
 0x3d9   :  { %4859 = vmatpush.bf16.msrb.mxu0 %v7453_v59  ;;  %v7596_v59 = vld [vmem:[#allocation13 + $0x1c8] sm:$0xf]  ;;  %4725 = vmatmul.bf16.vlgmr.msra.gmra.mxu2 %v10145_v5 }
 0x3da   :  { %v7597_v3 = vor.u32 %v9182_v35, %v7596_v59  ;;  %4829 = vmatpush.bf16.msra.mxu2 %v8249_v56  ;;  %4823 = vmatmul.bf16.vlgmr.msra.gmra.mxu1 %v10139_v15  ;;  %v7516_v56 = vld [vmem:[#allocation13 + $0x128] sm:$0xf] }
 0x3db   :  { %4871 = vmatpush.bf16.msrb.mxu1 %v7613_v50  ;;  %v7533_v50 = vor.u32 %v9166_v47, %v7532_v46  ;;  %v8358_v47 = vld [vmem:[#allocation13 + $0x7d0] sm:$0xf0] }
 0x3dd   :  { %4860 = vmatpush.bf16.msrb.mxu0 %v7437_v7  ;;  %v8233_v7 = vor.u32 %v9339_v62, %v8230_v53  ;;  %v9319_v62 = vld [vmem:[#allocation13 + $0x624] sm:$0xf]  ;;  %v8150_v53 = vld [vmem:[#allocation13 + $0x630] sm:$0xf0] }
 0x3de   :  { %v8153_v10 = vor.u32 %v9319_v62, %v8150_v53  ;;  %v9148_v62 = vld [vmem:[#allocation13 + $0xcc] sm:$0xf]  ;;  %v7470_v53 = vld [vmem:[#allocation13 + $0xd8] sm:$0xf0] }
 0x3df   :  { %4872 = vmatpush.bf16.msrb.mxu1 %v7597_v3  ;;  %4830 = vmatpush.bf16.msra.mxu2 %v8233_v7  ;;  %v7517_v7 = vor.u32 %v9162_v58, %v7516_v56  ;;  %v8342_v58 = vld [vmem:[#allocation13 + $0x7b0] sm:$0xf0] }
 0x3e1   :  { %4861 = vmatpush.bf16.msrb.mxu0 %v7421_v2  ;;  %v8198_v2 = vld [vmem:[#allocation13 + $0x690] sm:$0xf0] }
 0x3e2   :  { %v8201_v63 = vor.u32 %v9331_v23, %v8198_v2  ;;  %v9375_v23 = vld [vmem:[#allocation13 + $0x7e4] sm:$0xf] }
 0x3e3   :  { %4873 = vmatpush.bf16.msrb.mxu1 %v7581_v18  ;;  %v3043_v29 = vpop.f32.mrf.mxu2  ;;  %4831 = vmatpush.bf16.msra.mxu2 %v8217_v20  ;;  %v8134_v18 = vld [vmem:[#allocation13 + $0x610] sm:$0xf0]  ;;  %v9314_v20 = vld [vmem:[#allocation13 + $0x5f4] sm:$0xf0]  ;;  %v8377_v34 = vor.u32 %v9375_v23, %v8374_v25  ;;  %v7676_v23 = vld [vmem:[#allocation13 + $0x268] sm:$0xf] }
 0x3e4   :  { %v9140_v25 = vld [vmem:[#allocation13 + $0x8c] sm:$0xf] }
 0x3e5   :  { %4862 = vmatpush.bf16.msrb.mxu0 %v7405_v42  ;;  %v1325_v42 = vperm.slane %v10058_v19, 7  ;;  %v3031_v19 = vpop.f32.mrf.mxu1 }
 0x3e7   :  { %4874 = vmatpush.bf16.msrb.mxu1 %v7565_v27  ;;  %4832 = vmatpush.bf16.msra.mxu2 %v8201_v63  ;;  %v3016_v54 = vadd.f32 %v3015_v17, %v1325_v42  ;;  %v3018_v35 = vadd.f32 %v3017_v41, %v1325_v42  ;;  %v8124_v17 = vld [vmem:[#allocation13 + $0x5e8] sm:$0xf]  ;;  %v9218_v27 = vld [vmem:[#allocation13 + $0x2f4] sm:$0xf0]  ;;  %v9152_v41 = vld [vmem:[#allocation13 + $0xec] sm:$0xf] }
 0x3e8   :  { %v8125_v63 = vor.u32 %v9314_v20, %v8124_v17  ;;  %v7741_v39 = vor.u32 %v9218_v27, %v7740_v26  ;;  %v7884_v42 = vld [vmem:[#allocation13 + $0x408] sm:$0xf]  ;;  %v7438_v26 = vld [vmem:[#allocation13 + $0x98] sm:$0xf0] }
 0x3e9   :  { %4863 = vmatpush.bf16.msrb.mxu0 %v7389_v55  ;;  %v3057_v22 = vpop.f32.mrf.mxu3  ;;  %4781 = vmatmul.bf16.vlgmr.msrb.gmra.mxu2 %v10127_v8  ;;  %v8169_v55 = vor.u32 %v9323_v51, %v8166_v49  ;;  %v3030_v59 = vadd.f32 %v3029_v14, %v3016_v54  ;;  %v3032_v3 = vadd.f32 %v3031_v19, %v3018_v35  ;;  %v9214_v51 = vld [vmem:[#allocation13 + $0x2d4] sm:$0xf0]  ;;  %v8044_v27 = vld [vmem:[#allocation13 + $0x548] sm:$0xf] }
 0x3ea   :  { %v8109_v49 = vor.u32 %v9310_v57, %v8108_v37  ;;  %v9306_v54 = vld [vmem:[#allocation13 + $0x5b4] sm:$0xf0]  ;;  %v8294_v37 = vld [vmem:[#allocation13 + $0x750] sm:$0xf0]  ;;  %v7660_v57 = vld [vmem:[#allocation13 + $0x248] sm:$0xf] }
 0x3eb   :  { %4875 = vmatpush.bf16.msrb.mxu1 %v7549_v43  ;;  %4833 = vmatpush.bf16.msra.mxu2 %v8185_v44  ;;  %v3045_v1 = vpop.f32.mrf.mxu2  ;;  %v9254_v43 = vld [vmem:[#allocation13 + $0x414] sm:$0xf0]  ;;  %v9371_v44 = vld [vmem:[#allocation13 + $0x7c4] sm:$0xf] }
 0x3ec   :  { %v3046_v11 = vadd.f32 %v3045_v1, %v3032_v3  ;;  %v7885_v48 = vor.u32 %v9254_v43, %v7884_v42  ;;  %v9210_v35 = vld [vmem:[#allocation13 + $0x2b4] sm:$0xf0]  ;;  %v8076_v1 = vld [vmem:[#allocation13 + $0x588] sm:$0xf]  ;;  %v9136_v42 = vld [vmem:[#allocation13 + $0x6c] sm:$0xf] }
 0x3ed   :  { %4864 = vmatpush.bf16.msrb.mxu0 %v7373_v6  ;;  %v3044_v6 = vadd.f32 %v3043_v29, %v3030_v59  ;;  %v8137_v29 = vor.u32 %v9315_v45, %v8134_v18  ;;  %v7708_v59 = vld [vmem:[#allocation13 + $0x2a8] sm:$0xf]  ;;  %v9298_v18 = vld [vmem:[#allocation13 + $0x574] sm:$0xf0]  ;;  %v7422_v43 = vld [vmem:[#allocation13 + $0x78] sm:$0xf0] }
 0x3ee   :  { %v7709_v3 = vor.u32 %v9210_v35, %v7708_v59  ;;  %v7692_v45 = vld [vmem:[#allocation13 + $0x288] sm:$0xf] }
 0x3ef   :  { %4876 = vmatpush.bf16.msrb.mxu1 %v7533_v50  ;;  %4834 = vmatpush.bf16.msra.mxu2 %v8169_v55  ;;  %v3058_v13 = vadd.f32 %v3057_v22, %v3044_v6  ;;  %v7486_v22 = vld [vmem:[#allocation13 + $0xf8] sm:$0xf0]  ;;  %v8361_v50 = vor.u32 %v9371_v44, %v8358_v47  ;;  %v9367_v55 = vld [vmem:[#allocation13 + $0x7a4] sm:$0xf]  ;;  %v8028_v44 = vld [vmem:[#allocation13 + $0x528] sm:$0xf] }
 0x3f0   :  { %4865 = vmatmul.bf16.vlgmr.msrb.gmra.mxu0 %v10105_v31  ;;  %v7489_v56 = vor.u32 %v9152_v41, %v7486_v22  ;;  %v8345_v61 = vor.u32 %v9367_v55, %v8342_v58  ;;  %v9363_v6 = vld [vmem:[#allocation13 + $0x784] sm:$0xf]  ;;  %v9290_v47 = vld [vmem:[#allocation13 + $0x534] sm:$0xf0]  ;;  %v7425_v41 = vor.u32 %v9136_v42, %v7422_v43  ;;  %v8278_v22 = vld [vmem:[#allocation13 + $0x730] sm:$0xf0] }
 0x3f1   :  { %4913 = vmatpush.bf16.msra.mxu0 %v7997_v12  ;;  %v7500_v12 = vld [vmem:[#allocation13 + $0x108] sm:$0xf]  ;;  %v3059_v9 = vpop.f32.mrf.mxu3  ;;  %v3069_v32 = vmax.f32 %v3058_v13, 0.0  ;;  %v9144_v13 = vld [vmem:[#allocation13 + $0xac] sm:$0xf] }
 0x3f2   :  { %v3060_v2 = vadd.f32 %v3059_v9, %v3046_v11  ;;  %v7501_v14 = vor.u32 %v9158_v4, %v7500_v12  ;;  %v9206_v12 = vld [vmem:[#allocation13 + $0x294] sm:$0xf0]  ;;  %v8077_v4 = vor.u32 %v9302_v40, %v8076_v1  ;;  %v7454_v11 = vld [vmem:[#allocation13 + $0xb8] sm:$0xf0]  ;;  %v9359_v9 = vld [vmem:[#allocation13 + $0x764] sm:$0xf] }
 0x3f3   :  { %4877 = vmatpush.bf16.msrb.mxu1 %v7517_v7  ;;  %4835 = vmatpush.bf16.msra.mxu2 %v8153_v10  ;;  %v7473_v7 = vor.u32 %v9148_v62, %v7470_v53  ;;  %v8326_v10 = vld [vmem:[#allocation13 + $0x790] sm:$0xf0]  ;;  %v7693_v20 = vor.u32 %v9206_v12, %v7692_v45  ;;  %v9347_v55 = vld [vmem:[#allocation13 + $0x704] sm:$0xf]  ;;  %v9286_v58 = vld [vmem:[#allocation13 + $0x514] sm:$0xf0] }
 0x3f4   :  { %v3077_v33 = vmax.f32 %v3060_v2, 0.0  ;;  %v8329_v17 = vor.u32 %v9363_v6, %v8326_v10  ;;  %v9202_v2 = vld [vmem:[#allocation13 + $0x274] sm:$0xf0]  ;;  %v9184_v62 = vld [vmem:[#allocation13 + $0x1ec] sm:$0xf] }
 0x3f5   :  { %4914 = vmatpush.bf16.msra.mxu0 %v7981_v52  ;;  %v9258_v52 = vld [vmem:[#allocation13 + $0x434] sm:$0xf0]  ;;  %v7614_v53 = vld [vmem:[#allocation13 + $0x1f8] sm:$0xf0]  ;;  %v7628_v40 = vld [vmem:[#allocation13 + $0x208] sm:$0xf] }
 0x3f6   :  { %v10152_v46 = vpack.c.bf16 %v3077_v33, %v3069_v32  ;;  %v7677_v32 = vor.u32 %v9202_v2, %v7676_v23  ;;  %v9355_v33 = vld [vmem:[#allocation13 + $0x744] sm:$0xf]  ;;  %v7868_v10 = vld [vmem:[#allocation13 + $0x3e8] sm:$0xf]  ;;  %v9250_v45 = vld [vmem:[#allocation13 + $0x3f4] sm:$0xf0] }
 0x3f7   :  { %4878 = vmatpush.bf16.msrb.mxu1 %v7501_v14  ;;  %4836 = vmatpush.bf16.msra.mxu2 %v8137_v29  ;;  %v9294_v29 = vld [vmem:[#allocation13 + $0x554] sm:$0xf0]  ;;  %v8252_v12 = vld [vmem:[#allocation13 + $0x6e8] sm:$0xf] }
 0x3f8   :  { %4739 = vmatmul.bf16.vlgmr.msra.gmra.mxu3 %v10152_v46  ;;  %v7852_v2 = vld [vmem:[#allocation13 + $0x3c8] sm:$0xf]  ;;  %v9242_v42 = vld [vmem:[#allocation13 + $0x3b4] sm:$0xf0] }
 0x3f9   :  { %4915 = vmatpush.bf16.msra.mxu0 %v7965_v24  ;;  %v7901_v24 = vor.u32 %v9258_v52, %v7900_v21  ;;  %4843 = vmatpush.bf16.msra.mxu3 %v8377_v34  ;;  %v7457_v21 = vor.u32 %v9144_v13, %v7454_v11  ;;  %v8310_v52 = vld [vmem:[#allocation13 + $0x770] sm:$0xf0]  ;;  %v9198_v34 = vld [vmem:[#allocation13 + $0x254] sm:$0xf0]  ;;  %v7617_v13 = vor.u32 %v9184_v62, %v7614_v53  ;;  %v8220_v43 = vld [vmem:[#allocation13 + $0x6a8] sm:$0xf] }
 0x3fa   :  { %4879 = vmatmul.bf16.vlgmr.msrb.gmra.mxu1 %v10117_v0  ;;  %4837 = vmatmul.bf16.vlgmr.msra.gmra.mxu2 %v10145_v5  ;;  %v7550_v62 = vld [vmem:[#allocation13 + $0x178] sm:$0xf0] }
 0x3fb   :  { %4927 = vmatpush.bf16.msra.mxu1 %v8125_v63  ;;  %4885 = vmatpush.bf16.msrb.mxu2 %v7741_v39  ;;  %v8313_v63 = vor.u32 %v9359_v9, %v8310_v52  ;;  %v8045_v39 = vor.u32 %v9294_v29, %v8044_v27  ;;  %v7374_v9 = vld [vmem:[#allocation13 + $0x18] sm:$0xf0]  ;;  %v9280_v27 = vld [vmem:[#allocation13 + $0x4ec] sm:$0xf] }
 0x3fc   :  { %v7598_v52 = vld [vmem:[#allocation13 + $0x1d8] sm:$0xf0] }
 0x3fd   :  { %4916 = vmatpush.bf16.msra.mxu0 %v7949_v28  ;;  %v7724_v28 = vld [vmem:[#allocation13 + $0x2c8] sm:$0xf]  ;;  %4844 = vmatpush.bf16.msra.mxu3 %v8361_v50  ;;  %v9132_v50 = vld [vmem:[#allocation13 + $0x4c] sm:$0xf]  ;;  %v7998_v29 = vld [vmem:[#allocation13 + $0x4f8] sm:$0xf0] }
 0x3fe   :  { %v7725_v19 = vor.u32 %v9214_v51, %v7724_v28  ;;  %v8297_v28 = vor.u32 %v9355_v33, %v8294_v37  ;;  %v7661_v51 = vor.u32 %v9198_v34, %v7660_v57  ;;  %v7582_v37 = vld [vmem:[#allocation13 + $0x1b8] sm:$0xf0]  ;;  %v8001_v34 = vor.u32 %v9280_v27, %v7998_v29  ;;  %v7772_v27 = vld [vmem:[#allocation13 + $0x328] sm:$0xf]  ;;  %v9226_v29 = vld [vmem:[#allocation13 + $0x334] sm:$0xf0] }
 0x3ff   :  { %4928 = vmatpush.bf16.msra.mxu1 %v8109_v49  ;;  %v9351_v49 = vld [vmem:[#allocation13 + $0x724] sm:$0xf] }
 0x400   :  { %4886 = vmatpush.bf16.msrb.mxu2 %v7725_v19  ;;  %v7406_v19 = vld [vmem:[#allocation13 + $0x58] sm:$0xf0]  ;;  %v8281_v59 = vor.u32 %v9351_v49, %v8278_v22 }
 0x401   :  { %4917 = vmatpush.bf16.msra.mxu0 %v7933_v60  ;;  %v8093_v60 = vor.u32 %v9306_v54, %v8092_v38  ;;  %4845 = vmatpush.bf16.msra.mxu3 %v8345_v61  ;;  %v9194_v38 = vld [vmem:[#allocation13 + $0x234] sm:$0xf0]  ;;  %v8029_v54 = vor.u32 %v9290_v47, %v8028_v44  ;;  %v7409_v1 = vor.u32 %v9132_v50, %v7406_v19  ;;  %v9276_v47 = vld [vmem:[#allocation13 + $0x4cc] sm:$0xf]  ;;  %v7566_v22 = vld [vmem:[#allocation13 + $0x198] sm:$0xf0] }
 0x402   :  { %v9190_v61 = vld [vmem:[#allocation13 + $0x214] sm:$0xf0]  ;;  %v8204_v19 = vld [vmem:[#allocation13 + $0x688] sm:$0xf] }
 0x403   :  { %4929 = vmatpush.bf16.msra.mxu1 %v8093_v60  ;;  %v8262_v60 = vld [vmem:[#allocation13 + $0x710] sm:$0xf0]  ;;  %v9338_v44 = vld [vmem:[#allocation13 + $0x6b4] sm:$0xf0] }
 0x404   :  { %4887 = vmatpush.bf16.msrb.mxu2 %v7709_v3  ;;  %v9128_v3 = vld [vmem:[#allocation13 + $0x2c] sm:$0xf]  ;;  %v8265_v11 = vor.u32 %v9347_v55, %v8262_v60  ;;  %v9238_v50 = vld [vmem:[#allocation13 + $0x394] sm:$0xf0] }
 0x405   :  { %4918 = vmatpush.bf16.msra.mxu0 %v7917_v16  ;;  %v8060_v16 = vld [vmem:[#allocation13 + $0x568] sm:$0xf]  ;;  %4846 = vmatpush.bf16.msra.mxu3 %v8329_v17  ;;  %v9334_v55 = vld [vmem:[#allocation13 + $0x694] sm:$0xf0]  ;;  %v9168_v60 = vld [vmem:[#allocation13 + $0x16c] sm:$0xf] }
 0x406   :  { %v8061_v14 = vor.u32 %v9298_v18, %v8060_v16  ;;  %v7629_v16 = vor.u32 %v9190_v61, %v7628_v40  ;;  %v9124_v18 = vld [vmem:[#allocation13 + $0xc] sm:$0xf]  ;;  %v8205_v53 = vor.u32 %v9334_v55, %v8204_v19  ;;  %v7804_v40 = vld [vmem:[#allocation13 + $0x368] sm:$0xf]  ;;  %v9234_v61 = vld [vmem:[#allocation13 + $0x374] sm:$0xf0] }
 0x407   :  { %4930 = vmatpush.bf16.msra.mxu1 %v8077_v4  ;;  %v9346_v4 = vld [vmem:[#allocation13 + $0x6f4] sm:$0xf0]  ;;  %v9216_v19 = vld [vmem:[#allocation13 + $0x2ec] sm:$0xf]  ;;  %v7742_v55 = vld [vmem:[#allocation13 + $0x2f8] sm:$0xf0] }
 0x408   :  { %4888 = vmatpush.bf16.msrb.mxu2 %v7693_v20  ;;  %4795 = vmatmul.bf16.vlgmr.msrb.gmra.mxu3 %v10130_v30  ;;  %v7869_v20 = vor.u32 %v9250_v45, %v7868_v10  ;;  %v8253_v23 = vor.u32 %v9346_v4, %v8252_v12  ;;  %v7950_v10 = vld [vmem:[#allocation13 + $0x498] sm:$0xf0]  ;;  %v7553_v45 = vor.u32 %v9168_v60, %v7550_v62  ;;  %v9164_v12 = vld [vmem:[#allocation13 + $0x14c] sm:$0xf] }
 0x409   :  { %4919 = vmatpush.bf16.msra.mxu0 %v7901_v24  ;;  %v7441_v24 = vor.u32 %v9140_v25, %v7438_v26  ;;  %4847 = vmatpush.bf16.msra.mxu3 %v8313_v63  ;;  %v8236_v25 = vld [vmem:[#allocation13 + $0x6c8] sm:$0xf]  ;;  %v9342_v26 = vld [vmem:[#allocation13 + $0x6d4] sm:$0xf0]  ;;  %v7534_v4 = vld [vmem:[#allocation13 + $0x158] sm:$0xf0] }
 0x40a   :  { %v8237_v57 = vor.u32 %v9342_v26, %v8236_v25  ;;  %v9308_v60 = vld [vmem:[#allocation13 + $0x5cc] sm:$0xf]  ;;  %v8110_v62 = vld [vmem:[#allocation13 + $0x5d8] sm:$0xf0] }
 0x40b   :  { %4931 = vmatpush.bf16.msra.mxu1 %v8061_v14  ;;  %v9246_v14 = vld [vmem:[#allocation13 + $0x3d4] sm:$0xf0] }
 0x40c   :  { %4889 = vmatpush.bf16.msrb.mxu2 %v7677_v32  ;;  %v7377_v32 = vor.u32 %v9124_v18, %v7374_v9  ;;  %v7853_v33 = vor.u32 %v9246_v14, %v7852_v2  ;;  %v9230_v18 = vld [vmem:[#allocation13 + $0x354] sm:$0xf0]  ;;  %v9264_v9 = vld [vmem:[#allocation13 + $0x46c] sm:$0xf]  ;;  %v7518_v14 = vld [vmem:[#allocation13 + $0x138] sm:$0xf0] }
 0x40d   :  { %4920 = vmatpush.bf16.msra.mxu0 %v7885_v48  ;;  %v7644_v48 = vld [vmem:[#allocation13 + $0x228] sm:$0xf]  ;;  %4848 = vmatpush.bf16.msra.mxu3 %v8297_v28  ;;  %v7982_v28 = vld [vmem:[#allocation13 + $0x4d8] sm:$0xf0]  ;;  %v9160_v2 = vld [vmem:[#allocation13 + $0x12c] sm:$0xf] }
 0x40e   :  { %v7645_v35 = vor.u32 %v9194_v38, %v7644_v48  ;;  %v8221_v48 = vor.u32 %v9338_v44, %v8220_v43  ;;  %v7985_v38 = vor.u32 %v9276_v47, %v7982_v28  ;;  %v9156_v43 = vld [vmem:[#allocation13 + $0x10c] sm:$0xf]  ;;  %v7502_v44 = vld [vmem:[#allocation13 + $0x118] sm:$0xf0] }
 0x40f   :  { %4932 = vmatpush.bf16.msra.mxu1 %v8045_v39  ;;  %v7836_v39 = vld [vmem:[#allocation13 + $0x3a8] sm:$0xf] }
 0x410   :  { %4921 = vmatmul.bf16.vlgmr.msra.gmra.mxu0 %v10134_v36  ;;  %4890 = vmatpush.bf16.msrb.mxu2 %v7661_v51  ;;  %v7837_v49 = vor.u32 %v9242_v42, %v7836_v39  ;;  %v7773_v39 = vor.u32 %v9226_v29, %v7772_v27  ;;  %v8140_v42 = vld [vmem:[#allocation13 + $0x608] sm:$0xf]  ;;  %v7694_v27 = vld [vmem:[#allocation13 + $0x298] sm:$0xf0]  ;;  %v9296_v29 = vld [vmem:[#allocation13 + $0x56c] sm:$0xf] }
 0x411   :  { %4969 = vmatpush.bf16.msrb.mxu0 %v7489_v56  ;;  %v8012_v56 = vld [vmem:[#allocation13 + $0x508] sm:$0xf]  ;;  %4849 = vmatpush.bf16.msra.mxu3 %v8281_v59 }
 0x412   :  { %v8013_v6 = vor.u32 %v9286_v58, %v8012_v56  ;;  %v9272_v56 = vld [vmem:[#allocation13 + $0x4ac] sm:$0xf]  ;;  %v7966_v58 = vld [vmem:[#allocation13 + $0x4b8] sm:$0xf0] }
 0x413   :  { %4933 = vmatpush.bf16.msra.mxu1 %v8029_v54  ;;  %v7820_v54 = vld [vmem:[#allocation13 + $0x388] sm:$0xf] }
 0x414   :  { %4891 = vmatpush.bf16.msrb.mxu2 %v7645_v35  ;;  %v7821_v35 = vor.u32 %v9238_v50, %v7820_v54  ;;  %v7505_v54 = vor.u32 %v9156_v43, %v7502_v44  ;;  %v9378_v50 = vld [vmem:[#allocation13 + $0x7f4] sm:$0xf0] }
 0x415   :  { %4970 = vmatpush.bf16.msrb.mxu0 %v7473_v7  ;;  %v7390_v7 = vld [vmem:[#allocation13 + $0x38] sm:$0xf0]  ;;  %4850 = vmatpush.bf16.msra.mxu3 %v8265_v11 }
 0x416   :  { %v7393_v17 = vor.u32 %v9128_v3, %v7390_v7  ;;  %v8188_v3 = vld [vmem:[#allocation13 + $0x668] sm:$0xf]  ;;  %v9268_v7 = vld [vmem:[#allocation13 + $0x48c] sm:$0xf] }
 0x417   :  { %4934 = vmatpush.bf16.msra.mxu1 %v8013_v6  ;;  %v9330_v6 = vld [vmem:[#allocation13 + $0x674] sm:$0xf0]  ;;  %v7953_v11 = vor.u32 %v9268_v7, %v7950_v10  ;;  %v9212_v7 = vld [vmem:[#allocation13 + $0x2cc] sm:$0xf]  ;;  %v7726_v10 = vld [vmem:[#allocation13 + $0x2d8] sm:$0xf0] }
 0x418   :  { %4892 = vmatpush.bf16.msrb.mxu2 %v7629_v16  ;;  %4851 = vmatmul.bf16.vlgmr.msra.gmra.mxu3 %v10152_v46  ;;  %v7788_v16 = vld [vmem:[#allocation13 + $0x348] sm:$0xf] }
 0x419   :  { %4971 = vmatpush.bf16.msrb.mxu0 %v7457_v21  ;;  %v9180_v21 = vld [vmem:[#allocation13 + $0x1cc] sm:$0xf]  ;;  %4899 = vmatpush.bf16.msrb.mxu3 %v7869_v20  ;;  %v9326_v20 = vld [vmem:[#allocation13 + $0x654] sm:$0xf0] }
 0x41a   :  { %v7601_v63 = vor.u32 %v9180_v21, %v7598_v52  ;;  %4935 = vmatmul.bf16.vlgmr.msra.gmra.mxu1 %v10139_v15  ;;  %v7934_v21 = vld [vmem:[#allocation13 + $0x478] sm:$0xf0]  ;;  %v7537_v52 = vor.u32 %v9164_v12, %v7534_v4  ;;  %v9304_v12 = vld [vmem:[#allocation13 + $0x5ac] sm:$0xf] }
 0x41b   :  { %4983 = vmatpush.bf16.msrb.mxu1 %v7617_v13  ;;  %4893 = vmatmul.bf16.vlgmr.msrb.gmra.mxu2 %v10127_v8  ;;  %v8189_v13 = vor.u32 %v9330_v6, %v8188_v3  ;;  %v7937_v26 = vor.u32 %v9264_v9, %v7934_v21  ;;  %v8364_v3 = vld [vmem:[#allocation13 + $0x7c8] sm:$0xf]  ;;  %v9374_v6 = vld [vmem:[#allocation13 + $0x7d4] sm:$0xf0]  ;;  %v8094_v4 = vld [vmem:[#allocation13 + $0x5b8] sm:$0xf0] }
 0x41c   :  { %4941 = vmatpush.bf16.msra.mxu2 %v8253_v23  ;;  %v7789_v23 = vor.u32 %v9230_v18, %v7788_v16  ;;  %v8348_v16 = vld [vmem:[#allocation13 + $0x7a8] sm:$0xf]  ;;  %v9370_v18 = vld [vmem:[#allocation13 + $0x7b4] sm:$0xf0]  ;;  %v8097_v9 = vor.u32 %v9304_v12, %v8094_v4  ;;  %v9300_v21 = vld [vmem:[#allocation13 + $0x58c] sm:$0xf] }
 0x41d   :  { %4972 = vmatpush.bf16.msrb.mxu0 %v7441_v24  ;;  %v9176_v24 = vld [vmem:[#allocation13 + $0x1ac] sm:$0xf]  ;;  %4900 = vmatpush.bf16.msrb.mxu3 %v7853_v33  ;;  %v9350_v12 = vld [vmem:[#allocation13 + $0x714] sm:$0xf0] }
 0x41e   :  { %v7585_v51 = vor.u32 %v9176_v24, %v7582_v37  ;;  %v9260_v33 = vld [vmem:[#allocation13 + $0x44c] sm:$0xf]  ;;  %v7918_v24 = vld [vmem:[#allocation13 + $0x458] sm:$0xf0]  ;;  %v7521_v37 = vor.u32 %v9160_v2, %v7518_v14  ;;  %v8332_v14 = vld [vmem:[#allocation13 + $0x788] sm:$0xf] }
 0x41f   :  { %4984 = vmatpush.bf16.msrb.mxu1 %v7601_v63  ;;  %v8156_v63 = vld [vmem:[#allocation13 + $0x628] sm:$0xf]  ;;  %v7921_v28 = vor.u32 %v9260_v33, %v7918_v24  ;;  %v9188_v4 = vld [vmem:[#allocation13 + $0x20c] sm:$0xf] }
 0x420   :  { %4942 = vmatpush.bf16.msra.mxu2 %v8237_v57  ;;  %v7756_v57 = vld [vmem:[#allocation13 + $0x308] sm:$0xf] }
 0x421   :  { %4973 = vmatpush.bf16.msrb.mxu0 %v7425_v41  ;;  %v9172_v41 = vld [vmem:[#allocation13 + $0x18c] sm:$0xf]  ;;  %4901 = vmatpush.bf16.msrb.mxu3 %v7837_v49  ;;  %v8316_v24 = vld [vmem:[#allocation13 + $0x768] sm:$0xf] }
 0x422   :  { %v7569_v59 = vor.u32 %v9172_v41, %v7566_v22  ;;  %v9312_v49 = vld [vmem:[#allocation13 + $0x5ec] sm:$0xf]  ;;  %v8126_v41 = vld [vmem:[#allocation13 + $0x5f8] sm:$0xf0] }
 0x423   :  { %4985 = vmatpush.bf16.msrb.mxu1 %v7585_v51  ;;  %v9318_v51 = vld [vmem:[#allocation13 + $0x614] sm:$0xf0]  ;;  %v9256_v22 = vld [vmem:[#allocation13 + $0x42c] sm:$0xf] }
 0x424   :  { %4943 = vmatpush.bf16.msra.mxu2 %v8221_v48  ;;  %v7902_v48 = vld [vmem:[#allocation13 + $0x438] sm:$0xf0] }
 0x425   :  { %4974 = vmatpush.bf16.msrb.mxu0 %v7409_v1  ;;  %v7969_v1 = vor.u32 %v9272_v56, %v7966_v58  ;;  %4902 = vmatpush.bf16.msrb.mxu3 %v7821_v35  ;;  %v8129_v58 = vor.u32 %v9312_v49, %v8126_v41  ;;  %v7905_v35 = vor.u32 %v9256_v22, %v7902_v48  ;;  %v8300_v49 = vld [vmem:[#allocation13 + $0x748] sm:$0xf]  ;;  %v9358_v41 = vld [vmem:[#allocation13 + $0x754] sm:$0xf0]  ;;  %v9196_v22 = vld [vmem:[#allocation13 + $0x24c] sm:$0xf] }
 0x426   :  { %v7662_v48 = vld [vmem:[#allocation13 + $0x258] sm:$0xf0] }
 0x427   :  { %4986 = vmatpush.bf16.msrb.mxu1 %v7569_v59  ;;  %v8141_v59 = vor.u32 %v9318_v51, %v8140_v42  ;;  %v9394_v42 = vld [vmem:[#allocation14 + $0x74] sm:$0xf0] }
 0x428   :  { %4944 = vmatpush.bf16.msra.mxu2 %v8205_v53 }
 0x429   :  { %4975 = vmatpush.bf16.msrb.mxu0 %v7393_v17  ;;  %v8172_v17 = vld [vmem:[#allocation13 + $0x648] sm:$0xf] }
 0x42a   :  { %v8173_v25 = vor.u32 %v9326_v20, %v8172_v17  ;;  %v9208_v17 = vld [vmem:[#allocation13 + $0x2ac] sm:$0xf]  ;;  %v7710_v20 = vld [vmem:[#allocation13 + $0x2b8] sm:$0xf0] }
 0x42b   :  { %4987 = vmatpush.bf16.msrb.mxu1 %v7553_v45  ;;  %v8113_v45 = vor.u32 %v9308_v60, %v8110_v62  ;;  %v7713_v2 = vor.u32 %v9208_v17, %v7710_v20  ;;  %v9354_v60 = vld [vmem:[#allocation13 + $0x734] sm:$0xf0]  ;;  %v9192_v62 = vld [vmem:[#allocation13 + $0x22c] sm:$0xf]  ;;  %v7870_v20 = vld [vmem:[#allocation13 + $0x3f8] sm:$0xf0] }
 0x42c   :  { %4945 = vmatpush.bf16.msra.mxu2 %v8189_v13  ;;  %v8365_v13 = vor.u32 %v9374_v6, %v8364_v3  ;;  %v8268_v6 = vld [vmem:[#allocation13 + $0x708] sm:$0xf] }
 0x42d   :  { %4976 = vmatpush.bf16.msrb.mxu0 %v7377_v32  ;;  %v9322_v32 = vld [vmem:[#allocation13 + $0x634] sm:$0xf0] }
 0x42e   :  { %v8157_v47 = vor.u32 %v9322_v32, %v8156_v63  ;;  %v8062_v63 = vld [vmem:[#allocation13 + $0x578] sm:$0xf0] }
 0x42f   :  { %4988 = vmatpush.bf16.msrb.mxu1 %v7537_v52  ;;  %v8078_v52 = vld [vmem:[#allocation13 + $0x598] sm:$0xf0]  ;;  %v8065_v43 = vor.u32 %v9296_v29, %v8062_v63  ;;  %v9340_v63 = vld [vmem:[#allocation13 + $0x6cc] sm:$0xf] }
 0x430   :  { %4977 = vmatmul.bf16.vlgmr.msrb.gmra.mxu0 %v10105_v31  ;;  %v7805_v31 = vor.u32 %v9234_v61, %v7804_v40  ;;  %4946 = vmatpush.bf16.msra.mxu2 %v8173_v25  ;;  %v9252_v40 = vld [vmem:[#allocation13 + $0x40c] sm:$0xf]  ;;  %v7886_v61 = vld [vmem:[#allocation13 + $0x418] sm:$0xf0]  ;;  %v9366_v25 = vld [vmem:[#allocation13 + $0x794] sm:$0xf0] }
 0x431   :  { %5025 = vmatpush.bf16.msra.mxu0 %v8001_v34  ;;  %v9222_v34 = vld [vmem:[#allocation13 + $0x314] sm:$0xf0]  ;;  %v8333_v32 = vor.u32 %v9366_v25, %v8332_v14  ;;  %v7854_v29 = vld [vmem:[#allocation13 + $0x3d8] sm:$0xf0] }
 0x432   :  { %4903 = vmatpush.bf16.msrb.mxu3 %v7805_v31  ;;  %v7757_v56 = vor.u32 %v9222_v34, %v7756_v57  ;;  %v7889_v31 = vor.u32 %v9252_v40, %v7886_v61  ;;  %v9200_v57 = vld [vmem:[#allocation13 + $0x26c] sm:$0xf]  ;;  %v7678_v34 = vld [vmem:[#allocation13 + $0x278] sm:$0xf0]  ;;  %v9390_v40 = vld [vmem:[#allocation14 + $0x54] sm:$0xf0] }
 0x433   :  { %4989 = vmatpush.bf16.msrb.mxu1 %v7521_v37  ;;  %v9362_v37 = vld [vmem:[#allocation13 + $0x774] sm:$0xf0]  ;;  %v7681_v51 = vor.u32 %v9200_v57, %v7678_v34  ;;  %v9240_v57 = vld [vmem:[#allocation13 + $0x3ac] sm:$0xf]  ;;  %v8404_v34 = vld [vmem:[#allocation14 + $0x20] sm:$0xf] }
 0x434   :  { %4947 = vmatpush.bf16.msra.mxu2 %v8157_v47  ;;  %v9292_v47 = vld [vmem:[#allocation13 + $0x54c] sm:$0xf] }
 0x435   :  { %5026 = vmatpush.bf16.msra.mxu0 %v7985_v38  ;;  %v8380_v38 = vld [vmem:[#allocation13 + $0x7e8] sm:$0xf] }
 0x436   :  { %4904 = vmatpush.bf16.msrb.mxu3 %v7789_v23  ;;  %v8381_v53 = vor.u32 %v9378_v50, %v8380_v38  ;;  %v8349_v23 = vor.u32 %v9370_v18, %v8348_v16  ;;  %v8436_v38 = vld [vmem:[#allocation14 + $0x60] sm:$0xf]  ;;  %v9388_v18 = vld [vmem:[#allocation14 + $0x44] sm:$0xf0] }
 0x437   :  { %4990 = vmatpush.bf16.msrb.mxu1 %v7505_v54  ;;  %v9392_v54 = vld [vmem:[#allocation14 + $0x64] sm:$0xf0]  ;;  %v8420_v16 = vld [vmem:[#allocation14 + $0x40] sm:$0xf] }
 0x438   :  { %4948 = vmatpush.bf16.msra.mxu2 %v8141_v59  ;;  %v7665_v59 = vor.u32 %v9196_v22, %v7662_v48  ;;  %v7822_v22 = vld [vmem:[#allocation13 + $0x398] sm:$0xf0]  ;;  %v9332_v48 = vld [vmem:[#allocation13 + $0x68c] sm:$0xf] }
 0x439   :  { %5027 = vmatpush.bf16.msra.mxu0 %v7969_v1  ;;  %v7745_v1 = vor.u32 %v9216_v19, %v7742_v55  ;;  %v8437_v19 = vor.u32 %v9392_v54, %v8436_v38  ;;  %v9288_v55 = vld [vmem:[#allocation13 + $0x52c] sm:$0xf]  ;;  %v8206_v38 = vld [vmem:[#allocation13 + $0x698] sm:$0xf0]  ;;  %v10170_v54 = vpop.f32.mrf.mxu0 }
 0x43a   :  { %4905 = vmatpush.bf16.msrb.mxu3 %v7773_v39  ;;  %4991 = vmatmul.bf16.vlgmr.msrb.gmra.mxu1 %v10117_v0  ;;  %v8081_v0 = vor.u32 %v9300_v21, %v8078_v52  ;;  %v8444_v39 = vld [vmem:[#allocation14 + $0x70] sm:$0xf]  ;;  %v8254_v21 = vld [vmem:[#allocation13 + $0x6f8] sm:$0xf0]  ;;  %v8421_v52 = vor.u32 %v9388_v18, %v8420_v16  ;;  %v8438_v16 = vld [vmem:[#allocation14 + $0x68] sm:$0xf0] }
 0x43b   :  { %5039 = vmatpush.bf16.msra.mxu1 %v8129_v58  ;;  %4949 = vmatmul.bf16.vlgmr.msra.gmra.mxu2 %v10145_v5  ;;  %v8445_v44 = vor.u32 %v9394_v42, %v8444_v39  ;;  %v8301_v58 = vor.u32 %v9358_v41, %v8300_v49  ;;  %v9384_v39 = vld [vmem:[#allocation14 + $0x24] sm:$0xf0]  ;;  %v7838_v42 = vld [vmem:[#allocation13 + $0x3b8] sm:$0xf0]  ;;  %v8396_v49 = vld [vmem:[#allocation14 + $0x10] sm:$0xf] }
 0x43c   :  { %4997 = vmatpush.bf16.msrb.mxu2 %v7745_v1  ;;  %v8428_v1 = vld [vmem:[#allocation14 + $0x50] sm:$0xf]  ;;  %v9382_v41 = vld [vmem:[#allocation14 + $0x14] sm:$0xf0] }
 0x43d   :  { %5028 = vmatpush.bf16.msra.mxu0 %v7953_v11  ;;  %v7729_v11 = vor.u32 %v9212_v7, %v7726_v10  ;;  %v8429_v3 = vor.u32 %v9390_v40, %v8428_v1  ;;  %v9284_v7 = vld [vmem:[#allocation13 + $0x50c] sm:$0xf]  ;;  %v8014_v10 = vld [vmem:[#allocation13 + $0x518] sm:$0xf0] }
 0x43e   :  { %4906 = vmatpush.bf16.msrb.mxu3 %v7757_v56  ;;  %v8030_v56 = vld [vmem:[#allocation13 + $0x538] sm:$0xf0]  ;;  %v8017_v17 = vor.u32 %v9284_v7, %v8014_v10 }
 0x43f   :  { %5040 = vmatpush.bf16.msra.mxu1 %v8113_v45  ;;  %v8033_v61 = vor.u32 %v9288_v55, %v8030_v56  ;;  %v10172_v55 = vpop.f32.mrf.mxu1  ;;  %v8209_v56 = vor.u32 %v9332_v48, %v8206_v38  ;;  %v8446_v1 = vld [vmem:[#allocation14 + $0x78] sm:$0xf0] }
 0x440   :  { %4998 = vmatpush.bf16.msrb.mxu2 %v7729_v11  ;;  %v9248_v11 = vld [vmem:[#allocation13 + $0x3ec] sm:$0xf] }
 0x441   :  { %5029 = vmatpush.bf16.msra.mxu0 %v7937_v26  ;;  %4907 = vmatmul.bf16.vlgmr.msrb.gmra.mxu3 %v10130_v30  ;;  %v9204_v26 = vld [vmem:[#allocation13 + $0x28c] sm:$0xf]  ;;  %v7873_v14 = vor.u32 %v9248_v11, %v7870_v20  ;;  %v9391_v11 = vld [vmem:[#allocation14 + $0x64] sm:$0xf]  ;;  %v7774_v20 = vld [vmem:[#allocation13 + $0x338] sm:$0xf0] }
 0x442   :  { %4955 = vmatpush.bf16.msra.mxu3 %v8381_v53  ;;  %v7697_v33 = vor.u32 %v9204_v26, %v7694_v27  ;;  %v7646_v53 = vld [vmem:[#allocation13 + $0x238] sm:$0xf0]  ;;  %v9244_v26 = vld [vmem:[#allocation13 + $0x3cc] sm:$0xf]  ;;  %v8412_v27 = vld [vmem:[#allocation14 + $0x30] sm:$0xf]  ;;  %v8441_v18 = vor.u32 %v9391_v11, %v8438_v16 }
 0x443   :  { %5041 = vmatpush.bf16.msra.mxu1 %v8097_v9  ;;  %v9344_v9 = vld [vmem:[#allocation13 + $0x6ec] sm:$0xf]  ;;  %v9400_v11 = vld [vmem:[#allocation14 + $0xa4] sm:$0xf0] }
 0x444   :  { %4999 = vmatpush.bf16.msrb.mxu2 %v7713_v2  ;;  %v8257_v25 = vor.u32 %v9344_v9, %v8254_v21  ;;  %v10176_v9 = vpop.f32.mrf.mxu0 }
 0x445   :  { %5030 = vmatpush.bf16.msra.mxu0 %v7921_v28  ;;  %v8046_v28 = vld [vmem:[#allocation13 + $0x558] sm:$0xf0] }
 0x446   :  { %4956 = vmatpush.bf16.msra.mxu3 %v8365_v13  ;;  %v8049_v50 = vor.u32 %v9292_v47, %v8046_v28  ;;  %v7630_v13 = vld [vmem:[#allocation13 + $0x218] sm:$0xf0]  ;;  %v8405_v47 = vor.u32 %v9384_v39, %v8404_v34  ;;  %v7841_v28 = vor.u32 %v9240_v57, %v7838_v42  ;;  %v9316_v57 = vld [vmem:[#allocation13 + $0x60c] sm:$0xf]  ;;  %v8492_v34 = vld [vmem:[#allocation14 + $0xd0] sm:$0xf] }
 0x447   :  { %5042 = vmatpush.bf16.msra.mxu1 %v8081_v0  ;;  %v7633_v2 = vor.u32 %v9188_v4, %v7630_v13  ;;  %v9386_v0 = vld [vmem:[#allocation14 + $0x34] sm:$0xf0]  ;;  %v8174_v4 = vld [vmem:[#allocation13 + $0x658] sm:$0xf0] }
 0x448   :  { %5000 = vmatpush.bf16.msrb.mxu2 %v7697_v33  ;;  %v8413_v33 = vor.u32 %v9386_v0, %v8412_v27  ;;  %v9389_v27 = vld [vmem:[#allocation14 + $0x54] sm:$0xf]  ;;  %v8430_v0 = vld [vmem:[#allocation14 + $0x58] sm:$0xf0]  ;;  %v9406_v39 = vld [vmem:[#allocation14 + $0xd4] sm:$0xf0] }
 0x449   :  { %5031 = vmatpush.bf16.msra.mxu0 %v7905_v35  ;;  %v8284_v35 = vld [vmem:[#allocation13 + $0x728] sm:$0xf]  ;;  %v8142_v42 = vld [vmem:[#allocation13 + $0x618] sm:$0xf0] }
 0x44a   :  { %4957 = vmatpush.bf16.msra.mxu3 %v8349_v23  ;;  %v8285_v45 = vor.u32 %v9354_v60, %v8284_v35  ;;  %v8269_v23 = vor.u32 %v9350_v12, %v8268_v6  ;;  %v9380_v35 = vld [vmem:[#allocation14 + $0x4] sm:$0xf0]  ;;  %v8190_v60 = vld [vmem:[#allocation13 + $0x678] sm:$0xf0]  ;;  %v10174_v6 = vpop.f32.mrf.mxu2  ;;  %v9410_v12 = vld [vmem:[#allocation14 + $0xf4] sm:$0xf0]  ;;  %v8145_v38 = vor.u32 %v9316_v57, %v8142_v42 }
 0x44b   :  { %5043 = vmatpush.bf16.msra.mxu1 %v8065_v43  ;;  %v9336_v43 = vld [vmem:[#allocation13 + $0x6ac] sm:$0xf] }
 0x44c   :  { %5001 = vmatpush.bf16.msrb.mxu2 %v7681_v51  ;;  %v9236_v51 = vld [vmem:[#allocation13 + $0x38c] sm:$0xf] }
 0x44d   :  { %5032 = vmatpush.bf16.msra.mxu0 %v7889_v31  ;;  %v7649_v31 = vor.u32 %v9192_v62, %v7646_v53  ;;  %v9393_v53 = vld [vmem:[#allocation14 + $0x74] sm:$0xf]  ;;  %v9360_v57 = vld [vmem:[#allocation13 + $0x76c] sm:$0xf] }
 0x44e   :  { %4958 = vmatpush.bf16.msra.mxu3 %v8333_v32  ;;  %v8238_v32 = vld [vmem:[#allocation13 + $0x6d8] sm:$0xf0]  ;;  %v8449_v40 = vor.u32 %v9393_v53, %v8446_v1  ;;  %v8476_v1 = vld [vmem:[#allocation14 + $0xb0] sm:$0xf] }
 0x44f   :  { %5044 = vmatpush.bf16.msra.mxu1 %v8049_v50  ;;  %v9232_v50 = vld [vmem:[#allocation13 + $0x36c] sm:$0xf] }
 0x450   :  { %5033 = vmatmul.bf16.vlgmr.msra.gmra.mxu0 %v10134_v36  ;;  %v8317_v36 = vor.u32 %v9362_v37, %v8316_v24  ;;  %5002 = vmatpush.bf16.msrb.mxu2 %v7665_v59  ;;  %v7857_v24 = vor.u32 %v9244_v26, %v7854_v29  ;;  %v8241_v37 = vor.u32 %v9340_v63, %v8238_v32  ;;  %v8388_v59 = vld [vmem:[#allocation14] sm:$0xf]  ;;  %v10178_v29 = vpop.f32.mrf.mxu1  ;;  %v9220_v32 = vld [vmem:[#allocation13 + $0x30c] sm:$0xf] }
 0x451   :  { %5484 = vmatpush.bf16.msrb.mxu0 %v8445_v44  ;;  %v8222_v44 = vld [vmem:[#allocation13 + $0x6b8] sm:$0xf0]  ;;  %v8389_v62 = vor.u32 %v9380_v35, %v8388_v59  ;;  %v8433_v63 = vor.u32 %v9389_v27, %v8430_v0  ;;  %v9372_v35 = vld [vmem:[#allocation13 + $0x7cc] sm:$0xf]  ;;  %v8460_v0 = vld [vmem:[#allocation14 + $0x90] sm:$0xf] }
 0x452   :  { %4959 = vmatpush.bf16.msra.mxu3 %v8317_v36  ;;  %v8225_v36 = vor.u32 %v9336_v43, %v8222_v44  ;;  %v8493_v43 = vor.u32 %v9406_v39, %v8492_v34  ;;  %v9387_v44 = vld [vmem:[#allocation14 + $0x44] sm:$0xf]  ;;  %v8318_v34 = vld [vmem:[#allocation13 + $0x778] sm:$0xf0] }
 0x453   :  { %5045 = vmatpush.bf16.msra.mxu1 %v8033_v61  ;;  %v9228_v61 = vld [vmem:[#allocation13 + $0x34c] sm:$0xf] }
 0x454   :  { %5003 = vmatpush.bf16.msrb.mxu2 %v7649_v31  ;;  %v8508_v31 = vld [vmem:[#allocation14 + $0xf0] sm:$0xf]  ;;  %v10188_v53 = vld [vmem:[#allocation20 + $0x5] ss:$8 sm:$0xf] }
 0x455   :  { %5485 = vmatpush.bf16.msrb.mxu0 %v8437_v19  ;;  %v7806_v19 = vld [vmem:[#allocation13 + $0x378] sm:$0xf0]  ;;  %v8509_v13 = vor.u32 %v9410_v12, %v8508_v31  ;;  %v9368_v12 = vld [vmem:[#allocation13 + $0x7ac] sm:$0xf]  ;;  %v3345_v16 = vperm.slane %v10188_v53, 0 }
 0x456   :  { %4960 = vmatpush.bf16.msra.mxu3 %v8301_v58  ;;  %v9328_v58 = vld [vmem:[#allocation13 + $0x66c] sm:$0xf]  ;;  %v7809_v7 = vor.u32 %v9232_v50, %v7806_v19  ;;  %v9404_v50 = vld [vmem:[#allocation14 + $0xc4] sm:$0xf0] }
 0x457   :  { %5046 = vmatpush.bf16.msra.mxu1 %v8017_v17  ;;  %v8193_v10 = vor.u32 %v9328_v58, %v8190_v60  ;;  %v9224_v17 = vld [vmem:[#allocation13 + $0x32c] sm:$0xf]  ;;  %v8414_v58 = vld [vmem:[#allocation14 + $0x38] sm:$0xf0] }
 0x458   :  { %5004 = vmatpush.bf16.msrb.mxu2 %v7633_v2  ;;  %v8500_v2 = vld [vmem:[#allocation14 + $0xe0] sm:$0xf]  ;;  %v10186_v59 = vpop.f32.mrf.mxu1  ;;  %v8366_v60 = vld [vmem:[#allocation13 + $0x7d8] sm:$0xf0] }
 0x459   :  { %5486 = vmatpush.bf16.msrb.mxu0 %v8429_v3  ;;  %v7790_v3 = vld [vmem:[#allocation13 + $0x358] sm:$0xf0] }
 0x45a   :  { %4961 = vmatpush.bf16.msra.mxu3 %v8285_v45  ;;  %5047 = vmatmul.bf16.vlgmr.msra.gmra.mxu1 %v10139_v15  ;;  %v8397_v15 = vor.u32 %v9382_v41, %v8396_v49  ;;  %v9324_v45 = vld [vmem:[#allocation13 + $0x64c] sm:$0xf]  ;;  %v7793_v21 = vor.u32 %v9228_v61, %v7790_v3  ;;  %v10182_v41 = vpop.f32.mrf.mxu3  ;;  %v8369_v61 = vor.u32 %v9372_v35, %v8366_v60 }
 0x45b   :  { %5005 = vmatmul.bf16.vlgmr.msrb.gmra.mxu2 %v10127_v8  ;;  %v7825_v8 = vor.u32 %v9236_v51, %v7822_v22  ;;  %5498 = vmatpush.bf16.msrb.mxu1 %v8509_v13  ;;  %v8382_v51 = vld [vmem:[#allocation13 + $0x7f8] sm:$0xf0]  ;;  %v10184_v22 = vpop.f32.mrf.mxu0  ;;  %v8502_v35 = vld [vmem:[#allocation14 + $0xe8] sm:$0xf0] }
 0x45c   :  { %5053 = vmatpush.bf16.msra.mxu2 %v8257_v25  ;;  %v8158_v25 = vld [vmem:[#allocation13 + $0x638] sm:$0xf0] }
 0x45d   :  { %5487 = vmatpush.bf16.msrb.mxu0 %v8421_v52  ;;  %v8177_v52 = vor.u32 %v9324_v45, %v8174_v4  ;;  %v8468_v45 = vld [vmem:[#allocation14 + $0xa0] sm:$0xf]  ;;  %v8350_v4 = vld [vmem:[#allocation13 + $0x7b8] sm:$0xf0] }
 0x45e   :  { %4962 = vmatpush.bf16.msra.mxu3 %v8269_v23  ;;  %v9320_v23 = vld [vmem:[#allocation13 + $0x62c] sm:$0xf] }
 0x460   :  { %5054 = vmatpush.bf16.msra.mxu2 %v8241_v37  ;;  %v8161_v37 = vor.u32 %v9320_v23, %v8158_v25  ;;  %v4714_v27 = vpop.f32.mrf.mxu1 }
 0x461   :  { %5488 = vmatpush.bf16.msrb.mxu0 %v8413_v33  ;;  %4963 = vmatmul.bf16.vlgmr.msra.gmra.mxu3 %v10152_v46  ;;  %v7758_v33 = vld [vmem:[#allocation13 + $0x318] sm:$0xf0] }
 0x462   :  { %5011 = vmatpush.bf16.msrb.mxu3 %v7873_v14  ;;  %v9408_v14 = vld [vmem:[#allocation14 + $0xe4] sm:$0xf0]  ;;  %v7761_v48 = vor.u32 %v9220_v32, %v7758_v33 }
 0x463   :  { %v8501_v26 = vor.u32 %v9408_v14, %v8500_v2  ;;  %v4700_v23 = vpop.f32.mrf.mxu0  ;;  %v9364_v2 = vld [vmem:[#allocation13 + $0x78c] sm:$0xf]  ;;  %v8334_v14 = vld [vmem:[#allocation13 + $0x798] sm:$0xf0] }
 0x464   :  { %5055 = vmatpush.bf16.msra.mxu2 %v8225_v36  ;;  %v9376_v36 = vld [vmem:[#allocation13 + $0x7ec] sm:$0xf]  ;;  %v8337_v32 = vor.u32 %v9364_v2, %v8334_v14 }
 0x465   :  { %5489 = vmatpush.bf16.msrb.mxu0 %v8405_v47  ;;  %5499 = vmatpush.bf16.msrb.mxu1 %v8501_v26  ;;  %v8422_v47 = vld [vmem:[#allocation14 + $0x48] sm:$0xf0]  ;;  %v8385_v19 = vor.u32 %v9376_v36, %v8382_v51  ;;  %v4643_v26 = vadd.f32 %v10170_v54, %v3345_v16  ;;  %v8321_v36 = vor.u32 %v9360_v57, %v8318_v34 }
 0x466   :  { %5012 = vmatpush.bf16.msrb.mxu3 %v7857_v24  ;;  %v7777_v24 = vor.u32 %v9224_v17, %v7774_v20  ;;  %v8425_v49 = vor.u32 %v9387_v44, %v8422_v47  ;;  %v8353_v17 = vor.u32 %v9368_v12, %v8350_v4  ;;  %v9381_v20 = vld [vmem:[#allocation14 + $0x14] sm:$0xf]  ;;  %v8452_v44 = vld [vmem:[#allocation14 + $0x80] sm:$0xf]  ;;  %v9396_v47 = vld [vmem:[#allocation14 + $0x84] sm:$0xf0] }
 0x467   :  { %v8453_v51 = vor.u32 %v9396_v47, %v8452_v44  ;;  %v8494_v12 = vld [vmem:[#allocation14 + $0xd8] sm:$0xf0] }
 0x468   :  { %5056 = vmatpush.bf16.msra.mxu2 %v8209_v56  ;;  %v9385_v56 = vld [vmem:[#allocation14 + $0x34] sm:$0xf]  ;;  %v4768_v60 = vpop.f32.mrf.mxu1  ;;  %v8462_v44 = vld [vmem:[#allocation14 + $0x98] sm:$0xf0] }
 0x469   :  { %5490 = vmatpush.bf16.msrb.mxu0 %v8397_v15  ;;  %5500 = vmatpush.bf16.msrb.mxu1 %v8493_v43  ;;  %v8484_v15 = vld [vmem:[#allocation14 + $0xc0] sm:$0xf] }
 0x46a   :  { %5013 = vmatpush.bf16.msrb.mxu3 %v7841_v28  ;;  %v10180_v28 = vpop.f32.mrf.mxu2 }
 0x46c   :  { %5057 = vmatpush.bf16.msra.mxu2 %v8193_v10  ;;  %v8406_v10 = vld [vmem:[#allocation14 + $0x28] sm:$0xf0] }
 0x46d   :  { %5491 = vmatpush.bf16.msrb.mxu0 %v8389_v62  ;;  %v8417_v62 = vor.u32 %v9385_v56, %v8414_v58  ;;  %v9407_v58 = vld [vmem:[#allocation14 + $0xe4] sm:$0xf] }
 0x46e   :  { %5014 = vmatpush.bf16.msrb.mxu3 %v7825_v8  ;;  %v8485_v8 = vor.u32 %v9404_v50, %v8484_v15  ;;  %v9356_v15 = vld [vmem:[#allocation13 + $0x74c] sm:$0xf]  ;;  %v8302_v50 = vld [vmem:[#allocation13 + $0x758] sm:$0xf0] }
 0x470   :  { %5058 = vmatpush.bf16.msra.mxu2 %v8177_v52  ;;  %5501 = vmatpush.bf16.msrb.mxu1 %v8485_v8  ;;  %v4686_v52 = vpop.f32.mrf.mxu3  ;;  %v4754_v8 = vpop.f32.mrf.mxu0 }
 0x471   :  { %5540 = vmatpush.bf16.msra.mxu0 %v8449_v40  ;;  %v9402_v40 = vld [vmem:[#allocation14 + $0xb4] sm:$0xf0] }
 0x472   :  { %5015 = vmatpush.bf16.msrb.mxu3 %v7809_v7  ;;  %v8477_v3 = vor.u32 %v9402_v40, %v8476_v1  ;;  %v9383_v7 = vld [vmem:[#allocation14 + $0x24] sm:$0xf]  ;;  %v10190_v31 = vpop.f32.mrf.mxu2  ;;  %v8286_v1 = vld [vmem:[#allocation13 + $0x738] sm:$0xf0]  ;;  %v8505_v40 = vor.u32 %v9407_v58, %v8502_v35 }
 0x473   :  { %v8409_v13 = vor.u32 %v9383_v7, %v8406_v10 }
 0x474   :  { %5059 = vmatpush.bf16.msra.mxu2 %v8161_v37  ;;  %5502 = vmatpush.bf16.msrb.mxu1 %v8477_v3  ;;  %v8390_v37 = vld [vmem:[#allocation14 + $0x8] sm:$0xf0] }
 0x475   :  { %5541 = vmatpush.bf16.msra.mxu0 %v8441_v18  ;;  %v8469_v18 = vor.u32 %v9400_v11, %v8468_v45  ;;  %v9405_v45 = vld [vmem:[#allocation14 + $0xd4] sm:$0xf]  ;;  %v8270_v11 = vld [vmem:[#allocation13 + $0x718] sm:$0xf0] }
 0x476   :  { %5016 = vmatpush.bf16.msrb.mxu3 %v7793_v21  ;;  %v8398_v21 = vld [vmem:[#allocation14 + $0x18] sm:$0xf0] }
 0x477   :  { %v8401_v25 = vor.u32 %v9381_v20, %v8398_v21 }
 0x478   :  { %5060 = vmatpush.bf16.msra.mxu2 %v8145_v38  ;;  %5503 = vmatpush.bf16.msrb.mxu1 %v8469_v18 }
 0x479   :  { %5542 = vmatpush.bf16.msra.mxu0 %v8433_v63  ;;  %v4645_v63 = vadd.f32 %v10176_v9, %v3345_v16  ;;  %v8497_v16 = vor.u32 %v9405_v45, %v8494_v12  ;;  %v8548_v12 = vld [vmem:[#allocation14 + $0x140] sm:$0xf] }
 0x47a   :  { %5017 = vmatpush.bf16.msrb.mxu3 %v7777_v24  ;;  %v9379_v24 = vld [vmem:[#allocation14 + $0x4] sm:$0xf]  ;;  %v4728_v43 = vpop.f32.mrf.mxu2 }
 0x47b   :  { %5061 = vmatmul.bf16.vlgmr.msra.gmra.mxu2 %v10145_v5  ;;  %v4657_v5 = vadd.f32 %v10172_v55, %v4643_v26  ;;  %v8393_v39 = vor.u32 %v9379_v24, %v8390_v37  ;;  %v4659_v42 = vadd.f32 %v10178_v29, %v4645_v63  ;;  %v4740_v38 = vpop.f32.mrf.mxu3  ;;  %v3346_v26 = vperm.slane %v10188_v53, 1  ;;  %v9399_v63 = vld [vmem:[#allocation14 + $0xa4] sm:$0xf] }
 0x47d   :  { %5543 = vmatpush.bf16.msra.mxu0 %v8425_v49  ;;  %v4671_v54 = vadd.f32 %v10174_v6, %v4657_v5  ;;  %v4673_v9 = vadd.f32 %v10180_v28, %v4659_v42  ;;  %v9409_v49 = vld [vmem:[#allocation14 + $0xf4] sm:$0xf]  ;;  %v8305_v28 = vor.u32 %v9356_v15, %v8302_v50  ;;  %v4755_v24 = vadd.f32 %v4754_v8, %v3346_v26 }
 0x47e   :  { %5018 = vmatpush.bf16.msrb.mxu3 %v7761_v48  ;;  %v8510_v48 = vld [vmem:[#allocation14 + $0xf8] sm:$0xf0] }
 0x47f   :  { %v4685_v55 = vadd.f32 %v10182_v41, %v4671_v54  ;;  %v8513_v29 = vor.u32 %v9409_v49, %v8510_v48  ;;  %v8572_v48 = vld [vmem:[#allocation14 + $0x170] sm:$0xf] }
 0x481   :  { %5544 = vmatpush.bf16.msra.mxu0 %v8417_v62  ;;  %5019 = vmatmul.bf16.vlgmr.msrb.gmra.mxu3 %v10130_v30  ;;  %v9398_v30 = vld [vmem:[#allocation14 + $0x94] sm:$0xf0]  ;;  %v4699_v6 = vadd.f32 %v10184_v22, %v4685_v55  ;;  %v9352_v62 = vld [vmem:[#allocation13 + $0x72c] sm:$0xf] }
 0x482   :  { %5067 = vmatpush.bf16.msra.mxu3 %v8385_v19  ;;  %v8461_v33 = vor.u32 %v9398_v30, %v8460_v0  ;;  %v4687_v19 = vadd.f32 %v4686_v52, %v4673_v9  ;;  %v8289_v22 = vor.u32 %v9352_v62, %v8286_v1  ;;  %v9403_v52 = vld [vmem:[#allocation14 + $0xc4] sm:$0xf]  ;;  %v8478_v0 = vld [vmem:[#allocation14 + $0xb8] sm:$0xf0] }
 0x483   :  { %v4713_v41 = vadd.f32 %v10186_v59, %v4699_v6  ;;  %v4782_v59 = vpop.f32.mrf.mxu2  ;;  %v4742_v4 = vpop.f32.mrf.mxu3 }
 0x484   :  { %5504 = vmatpush.bf16.msrb.mxu1 %v8461_v33  ;;  %v4701_v56 = vadd.f32 %v4700_v23, %v4687_v19  ;;  %v4756_v23 = vpop.f32.mrf.mxu0 }
 0x485   :  { %5545 = vmatpush.bf16.msra.mxu0 %v8409_v13  ;;  %v4727_v3 = vadd.f32 %v10190_v31, %v4713_v41  ;;  %v9348_v13 = vld [vmem:[#allocation13 + $0x70c] sm:$0xf]  ;;  %v4757_v34 = vadd.f32 %v4756_v23, %v3346_v26  ;;  %v8564_v41 = vld [vmem:[#allocation14 + $0x160] sm:$0xf] }
 0x486   :  { %5068 = vmatpush.bf16.msra.mxu3 %v8369_v61  ;;  %v4715_v61 = vadd.f32 %v4714_v27, %v4701_v56  ;;  %v8273_v21 = vor.u32 %v9348_v13, %v8270_v11  ;;  %v8486_v31 = vld [vmem:[#allocation14 + $0xc8] sm:$0xf0]  ;;  %v9401_v27 = vld [vmem:[#allocation14 + $0xb4] sm:$0xf] }
 0x487   :  { %v4741_v10 = vadd.f32 %v4740_v38, %v4727_v3  ;;  %v8489_v2 = vor.u32 %v9403_v52, %v8486_v31  ;;  %v8481_v5 = vor.u32 %v9401_v27, %v8478_v0  ;;  %v9426_v38 = vld [vmem:[#allocation14 + $0x174] sm:$0xf0]  ;;  %v8532_v52 = vld [vmem:[#allocation14 + $0x120] sm:$0xf]  ;;  %v9416_v31 = vld [vmem:[#allocation14 + $0x124] sm:$0xf0] }
 0x488   :  { %5505 = vmatpush.bf16.msrb.mxu1 %v8453_v51  ;;  %v4729_v7 = vadd.f32 %v4728_v43, %v4715_v61  ;;  %v9397_v43 = vld [vmem:[#allocation14 + $0x94] sm:$0xf]  ;;  %v8573_v50 = vor.u32 %v9426_v38, %v8572_v48  ;;  %v9422_v61 = vld [vmem:[#allocation14 + $0x154] sm:$0xf0]  ;;  %v8516_v27 = vld [vmem:[#allocation14 + $0x100] sm:$0xf] }
 0x489   :  { %5546 = vmatpush.bf16.msra.mxu0 %v8401_v25  ;;  %v4770_v25 = vpop.f32.mrf.mxu1  ;;  %v8465_v9 = vor.u32 %v9397_v43, %v8462_v44  ;;  %v9412_v0 = vld [vmem:[#allocation14 + $0x104] sm:$0xf0]  ;;  %v9419_v43 = vld [vmem:[#allocation14 + $0x144] sm:$0xf]  ;;  %v8550_v44 = vld [vmem:[#allocation14 + $0x148] sm:$0xf0] }
 0x48a   :  { %5069 = vmatpush.bf16.msra.mxu3 %v8353_v17  ;;  %v4743_v18 = vadd.f32 %v4742_v4, %v4729_v7  ;;  %v5081_v17 = vmax.f32 %v4741_v10, 0.0  ;;  %v4771_v42 = vadd.f32 %v4770_v25, %v4757_v34  ;;  %5512 = vmatpush.bf16.msrb.mxu2 %v8573_v50  ;;  %v9414_v25 = vld [vmem:[#allocation14 + $0x114] sm:$0xf0]  ;;  %v9421_v34 = vld [vmem:[#allocation14 + $0x154] sm:$0xf]  ;;  %v3347_v38 = vperm.slane %v10188_v53, 2 }
 0x48b   :  { %v4796_v30 = vpop.f32.mrf.mxu3  ;;  %v4784_v33 = vpop.f32.mrf.mxu2 }
 0x48c   :  { %5554 = vmatpush.bf16.msra.mxu1 %v8513_v29  ;;  %v5085_v20 = vmax.f32 %v4743_v18, 0.0  ;;  %v4810_v37 = vpop.f32.mrf.mxu0  ;;  %v8454_v29 = vld [vmem:[#allocation14 + $0x88] sm:$0xf0] }
 0x48d   :  { %5547 = vmatpush.bf16.msra.mxu0 %v8393_v39  ;;  %v4769_v39 = vadd.f32 %v4768_v60, %v4755_v24  ;;  %v8566_v24 = vld [vmem:[#allocation14 + $0x168] sm:$0xf0] }
 0x48e   :  { %5070 = vmatpush.bf16.msra.mxu3 %v8337_v32  ;;  %v5089_v14 = vpack.c.bf16 %v5085_v20, %v5081_v17  ;;  %v8470_v32 = vld [vmem:[#allocation14 + $0xa8] sm:$0xf0]  ;;  %v8540_v17 = vld [vmem:[#allocation14 + $0x130] sm:$0xf]  ;;  %v9418_v20 = vld [vmem:[#allocation14 + $0x134] sm:$0xf0] }
 0x48f   :  { %v8473_v57 = vor.u32 %v9399_v63, %v8470_v32  ;;  %v4783_v54 = vadd.f32 %v4782_v59, %v4769_v39  ;;  %v9420_v59 = vld [vmem:[#allocation14 + $0x144] sm:$0xf0]  ;;  %v8574_v63 = vld [vmem:[#allocation14 + $0x178] sm:$0xf0] }
 0x490   :  { %5555 = vmatpush.bf16.msra.mxu1 %v8505_v40  ;;  %5492 = vmatmul.bf16.vlgmr.msrb.gmra.mxu0 %v5089_v14  ;;  %v8556_v40 = vld [vmem:[#allocation14 + $0x150] sm:$0xf]  ;;  %v8549_v13 = vor.u32 %v9420_v59, %v8548_v12  ;;  %v8558_v39 = vld [vmem:[#allocation14 + $0x158] sm:$0xf0]  ;;  %v9442_v12 = vld [vmem:[#allocation14 + $0x1f4] sm:$0xf0] }
 0x491   :  { %v4824_v47 = vpop.f32.mrf.mxu1  ;;  %v4797_v51 = vadd.f32 %v4796_v30, %v4783_v54  ;;  %v8557_v3 = vor.u32 %v9422_v61, %v8556_v40  ;;  %v8517_v30 = vor.u32 %v9412_v0, %v8516_v27  ;;  %v8561_v54 = vor.u32 %v9421_v34, %v8558_v39  ;;  %v9434_v34 = vld [vmem:[#allocation14 + $0x1b4] sm:$0xf0] }
 0x492   :  { %5071 = vmatpush.bf16.msra.mxu3 %v8321_v36  ;;  %v4785_v36 = vadd.f32 %v4784_v33, %v4771_v42  ;;  %v9423_v33 = vld [vmem:[#allocation14 + $0x164] sm:$0xf] }
 0x493   :  { %v4798_v55 = vpop.f32.mrf.mxu3  ;;  %v4838_v15 = vpop.f32.mrf.mxu2  ;;  %v4811_v19 = vadd.f32 %v4810_v37, %v4797_v51  ;;  %v8542_v51 = vld [vmem:[#allocation14 + $0x138] sm:$0xf0] }
 0x494   :  { %5556 = vmatpush.bf16.msra.mxu1 %v8497_v16  ;;  %v4799_v49 = vadd.f32 %v4798_v55, %v4785_v36  ;;  %v4812_v8 = vpop.f32.mrf.mxu0  ;;  %v8553_v55 = vor.u32 %v9419_v43, %v8550_v44  ;;  %v9417_v36 = vld [vmem:[#allocation14 + $0x134] sm:$0xf]  ;;  %v8596_v43 = vld [vmem:[#allocation14 + $0x1a0] sm:$0xf]  ;;  %v9432_v44 = vld [vmem:[#allocation14 + $0x1a4] sm:$0xf0] }
 0x495   :  { %v4825_v60 = vadd.f32 %v4824_v47, %v4811_v19  ;;  %v8545_v48 = vor.u32 %v9417_v36, %v8542_v51  ;;  %v9413_v19 = vld [vmem:[#allocation14 + $0x114] sm:$0xf]  ;;  %v9430_v36 = vld [vmem:[#allocation14 + $0x194] sm:$0xf0]  ;;  %v8580_v51 = vld [vmem:[#allocation14 + $0x180] sm:$0xf] }
 0x496   :  { %5072 = vmatpush.bf16.msra.mxu3 %v8305_v28  ;;  %v4813_v56 = vadd.f32 %v4812_v8, %v4799_v49  ;;  %v9424_v28 = vld [vmem:[#allocation14 + $0x164] sm:$0xf0] }
 0x497   :  { %v8565_v35 = vor.u32 %v9424_v28, %v8564_v41  ;;  %v4839_v7 = vadd.f32 %v4838_v15, %v4825_v60  ;;  %v8534_v15 = vld [vmem:[#allocation14 + $0x128] sm:$0xf0]  ;;  %v9411_v60 = vld [vmem:[#allocation14 + $0x104] sm:$0xf] }
 0x498   :  { %5557 = vmatpush.bf16.msra.mxu1 %v8489_v2  ;;  %v8533_v2 = vor.u32 %v9416_v31, %v8532_v52 }
 0x499   :  { %v4826_v62 = vpop.f32.mrf.mxu1  ;;  %5513 = vmatpush.bf16.msrb.mxu2 %v8565_v35 }
 0x49a   :  { %5073 = vmatpush.bf16.msra.mxu3 %v8289_v22  ;;  %v4827_v1 = vadd.f32 %v4826_v62, %v4813_v56  ;;  %v8518_v62 = vld [vmem:[#allocation14 + $0x108] sm:$0xf0] }
 0x49b   :  { %v4852_v58 = vpop.f32.mrf.mxu3  ;;  %v4840_v10 = vpop.f32.mrf.mxu2 }
 0x49c   :  { %5558 = vmatpush.bf16.msra.mxu1 %v8481_v5  ;;  %v4853_v22 = vadd.f32 %v4852_v58, %v4839_v7  ;;  %v4841_v45 = vadd.f32 %v4840_v10, %v4827_v1  ;;  %v9425_v5 = vld [vmem:[#allocation14 + $0x174] sm:$0xf]  ;;  %v4866_v37 = vpop.f32.mrf.mxu0  ;;  %v8521_v7 = vor.u32 %v9411_v60, %v8518_v62  ;;  %v8614_v60 = vld [vmem:[#allocation14 + $0x1c8] sm:$0xf0] }
 0x49d   :  { %5514 = vmatpush.bf16.msrb.mxu2 %v8557_v3  ;;  %v8577_v32 = vor.u32 %v9425_v5, %v8574_v63  ;;  %v4867_v8 = vadd.f32 %v4866_v37, %v3347_v38  ;;  %v9436_v5 = vld [vmem:[#allocation14 + $0x1c4] sm:$0xf0] }
 0x49e   :  { %5074 = vmatpush.bf16.msra.mxu3 %v8273_v21  ;;  %v5082_v16 = vmax.f32 %v4853_v22, 0.0  ;;  %v8541_v21 = vor.u32 %v9418_v20, %v8540_v17  ;;  %v9440_v17 = vld [vmem:[#allocation14 + $0x1e4] sm:$0xf0] }
 0x4a0   :  { %5559 = vmatpush.bf16.msra.mxu1 %v8473_v57  ;;  %5548 = vmatmul.bf16.vlgmr.msra.gmra.mxu0 %v5089_v14  ;;  %v8524_v14 = vld [vmem:[#allocation14 + $0x110] sm:$0xf]  ;;  %v8569_v57 = vor.u32 %v9423_v33, %v8566_v24 }
 0x4a1   :  { %5075 = vmatmul.bf16.vlgmr.msra.gmra.mxu3 %v10152_v46  ;;  %v9395_v46 = vld [vmem:[#allocation14 + $0x84] sm:$0xf]  ;;  %5515 = vmatpush.bf16.msrb.mxu2 %v8549_v13  ;;  %v8525_v26 = vor.u32 %v9414_v25, %v8524_v14  ;;  %v4880_v42 = vpop.f32.mrf.mxu1  ;;  %v9438_v14 = vld [vmem:[#allocation14 + $0x1d4] sm:$0xf0] }
 0x4a2   :  { %v8457_v6 = vor.u32 %v9395_v46, %v8454_v29  ;;  %v9415_v46 = vld [vmem:[#allocation14 + $0x124] sm:$0xf]  ;;  %v4881_v35 = vadd.f32 %v4880_v42, %v4867_v8 }
 0x4a3   :  { %v4854_v4 = vpop.f32.mrf.mxu3  ;;  %v4894_v47 = vpop.f32.mrf.mxu2  ;;  %v8537_v29 = vor.u32 %v9415_v46, %v8534_v15  ;;  %v9441_v46 = vld [vmem:[#allocation14 + $0x1f4] sm:$0xf]  ;;  %v8638_v15 = vld [vmem:[#allocation14 + $0x1f8] sm:$0xf0] }
 0x4a4   :  { %5560 = vmatpush.bf16.msra.mxu1 %v8465_v9  ;;  %v4855_v11 = vadd.f32 %v4854_v4, %v4841_v45  ;;  %v4868_v9 = vpop.f32.mrf.mxu0  ;;  %v4895_v40 = vadd.f32 %v4894_v47, %v4881_v35  ;;  %v8636_v45 = vld [vmem:[#allocation14 + $0x1f0] sm:$0xf]  ;;  %v9435_v35 = vld [vmem:[#allocation14 + $0x1c4] sm:$0xf] }
 0x4a5   :  { %5516 = vmatpush.bf16.msrb.mxu2 %v8541_v21  ;;  %v4869_v58 = vadd.f32 %v4868_v9, %v3347_v38  ;;  %v8637_v4 = vor.u32 %v9442_v12, %v8636_v45  ;;  %v8588_v9 = vld [vmem:[#allocation14 + $0x190] sm:$0xf]  ;;  %v9431_v12 = vld [vmem:[#allocation14 + $0x1a4] sm:$0xf] }
 0x4a6   :  { %v5086_v18 = vmax.f32 %v4855_v11, 0.0 }
 0x4a7   :  { %5526 = vmatpush.bf16.msrb.mxu3 %v8637_v4 }
 0x4a8   :  { %5561 = vmatpush.bf16.msra.mxu1 %v8457_v6  ;;  %v5090_v23 = vpack.c.bf16 %v5086_v18, %v5082_v16  ;;  %v8526_v6 = vld [vmem:[#allocation14 + $0x118] sm:$0xf0]  ;;  %v8628_v18 = vld [vmem:[#allocation14 + $0x1e0] sm:$0xf] }
 0x4a9   :  { %5517 = vmatpush.bf16.msrb.mxu2 %v8533_v2  ;;  %v4882_v50 = vpop.f32.mrf.mxu1  ;;  %v8529_v28 = vor.u32 %v9413_v19, %v8526_v6  ;;  %v8629_v21 = vor.u32 %v9440_v17, %v8628_v18  ;;  %v8620_v2 = vld [vmem:[#allocation14 + $0x1d0] sm:$0xf]  ;;  %v8630_v19 = vld [vmem:[#allocation14 + $0x1e8] sm:$0xf0] }
 0x4aa   :  { %5506 = vmatmul.bf16.vlgmr.msrb.gmra.mxu1 %v5090_v23  ;;  %v4883_v1 = vadd.f32 %v4882_v50, %v4869_v58  ;;  %v8641_v50 = vor.u32 %v9441_v46, %v8638_v15  ;;  %v9446_v46 = vld [vmem:[#allocation16 + $0x18] sm:$0xff] }
 0x4ab   :  { %v4896_v41 = vpop.f32.mrf.mxu2  ;;  %5527 = vmatpush.bf16.msrb.mxu3 %v8629_v21  ;;  %v9458_v15 = vld [vmem:[#allocation16 + $0x78] sm:$0xff] }
 0x4ac   :  { %v4922_v56 = vpop.f32.mrf.mxu0  ;;  %v4897_v10 = vadd.f32 %v4896_v41, %v4883_v1  ;;  %v8622_v41 = vld [vmem:[#allocation14 + $0x1d8] sm:$0xf0]  ;;  %v8617_v1 = vor.u32 %v9435_v35, %v8614_v60  ;;  %5745 = vmatpush.bf16.msrb.mxu1 %v9458_v15 }
 0x4ad   :  { %5518 = vmatpush.bf16.msrb.mxu2 %v8525_v26  ;;  %v8621_v26 = vor.u32 %v9438_v14, %v8620_v2 }
 0x4af   :  { %5528 = vmatpush.bf16.msrb.mxu3 %v8621_v26 }
 0x4b1   :  { %5519 = vmatpush.bf16.msrb.mxu2 %v8517_v30  ;;  %v4936_v61 = vpop.f32.mrf.mxu1  ;;  %v8612_v30 = vld [vmem:[#allocation14 + $0x1c0] sm:$0xf] }
 0x4b2   :  { %v8613_v33 = vor.u32 %v9436_v5, %v8612_v30 }
 0x4b4   :  { %v4924_v16 = vpop.f32.mrf.mxu0  ;;  %5529 = vmatpush.bf16.msrb.mxu3 %v8613_v33 }
 0x4b5   :  { %5568 = vmatpush.bf16.msra.mxu2 %v8577_v32 }
 0x4b9   :  { %5569 = vmatpush.bf16.msra.mxu2 %v8569_v57  ;;  %v8604_v57 = vld [vmem:[#allocation14 + $0x1b0] sm:$0xf] }
 0x4ba   :  { %5562 = vmatmul.bf16.vlgmr.msra.gmra.mxu1 %v5090_v23  ;;  %v4938_v23 = vpop.f32.mrf.mxu1 }
 0x4bc   :  { %v4978_v6 = vpop.f32.mrf.mxu0 }
 0x4bd   :  { %5570 = vmatpush.bf16.msra.mxu2 %v8561_v54  ;;  %v8605_v54 = vor.u32 %v9434_v34, %v8604_v57 }
 0x4be   :  { %v4950_v13 = vpop.f32.mrf.mxu2 }
 0x4bf   :  { %5530 = vmatpush.bf16.msrb.mxu3 %v8605_v54 }
 0x4c1   :  { %5571 = vmatpush.bf16.msra.mxu2 %v8553_v55  ;;  %v8597_v55 = vor.u32 %v9432_v44, %v8596_v43 }
 0x4c3   :  { %5531 = vmatpush.bf16.msrb.mxu3 %v8597_v55 }
 0x4c4   :  { %v4908_v49 = vpop.f32.mrf.mxu3 }
 0x4c5   :  { %5572 = vmatpush.bf16.msra.mxu2 %v8545_v48  ;;  %v4909_v22 = vadd.f32 %v4908_v49, %v4895_v40  ;;  %v8589_v49 = vor.u32 %v9430_v36, %v8588_v9  ;;  %v9428_v48 = vld [vmem:[#allocation14 + $0x184] sm:$0xf0]  ;;  %v4980_v40 = vpop.f32.mrf.mxu0 }
 0x4c6   :  { %v4952_v0 = vpop.f32.mrf.mxu2  ;;  %v8581_v38 = vor.u32 %v9428_v48, %v8580_v51  ;;  %v9450_v51 = vld [vmem:[#allocation16 + $0x38] sm:$0xff]  ;;  %v9448_v48 = vld [vmem:[#allocation16 + $0x28] sm:$0xff] }
 0x4c7   :  { %v4923_v11 = vadd.f32 %v4922_v56, %v4909_v22  ;;  %5532 = vmatpush.bf16.msrb.mxu3 %v8589_v49  ;;  %v9437_v56 = vld [vmem:[#allocation14 + $0x1d4] sm:$0xf]  ;;  %v3348_v22 = vperm.slane %v10188_v53, 3  ;;  %v9427_v53 = vld [vmem:[#allocation14 + $0x184] sm:$0xf]  ;;  %5731 = vmatpush.bf16.msrb.mxu0 %v9450_v51 }
 0x4c8   :  { %v8625_v58 = vor.u32 %v9437_v56, %v8622_v41  ;;  %v9449_v49 = vld [vmem:[#allocation16 + $0x30] sm:$0xff]  ;;  %v9455_v56 = vld [vmem:[#allocation16 + $0x60] sm:$0xff]  ;;  %v9454_v41 = vld [vmem:[#allocation16 + $0x58] sm:$0xff] }
 0x4c9   :  { %5573 = vmatpush.bf16.msra.mxu2 %v8537_v29  ;;  %v4937_v31 = vadd.f32 %v4936_v61, %v4923_v11  ;;  %v9439_v29 = vld [vmem:[#allocation14 + $0x1e4] sm:$0xf]  ;;  %v9433_v61 = vld [vmem:[#allocation14 + $0x1b4] sm:$0xf]  ;;  %v8590_v11 = vld [vmem:[#allocation14 + $0x198] sm:$0xf0]  ;;  %v4981_v21 = vadd.f32 %v4980_v40, %v3348_v22 }
 0x4ca   :  { %v8633_v8 = vor.u32 %v9439_v29, %v8630_v19  ;;  %v9457_v29 = vld [vmem:[#allocation16 + $0x70] sm:$0xff]  ;;  %v9444_v19 = vld [vmem:[#allocation16 + $0x8] sm:$0xff]  ;;  %v9451_v40 = vld [vmem:[#allocation16 + $0x40] sm:$0xff] }
 0x4cb   :  { %v4951_v27 = vadd.f32 %v4950_v13, %v4937_v31  ;;  %5533 = vmatpush.bf16.msrb.mxu3 %v8581_v38  ;;  %v9429_v13 = vld [vmem:[#allocation14 + $0x194] sm:$0xf]  ;;  %5732 = vmatpush.bf16.msrb.mxu0 %v9449_v49  ;;  %v9447_v38 = vld [vmem:[#allocation16 + $0x20] sm:$0xff]  ;;  %v9474_v49 = vld [vmem:[#allocation19 + $0x38] sm:$0xff] }
 0x4cc   :  { %v4910_v3 = vpop.f32.mrf.mxu3  ;;  %5746 = vmatpush.bf16.msrb.mxu1 %v9457_v29  ;;  %v9459_v51 = vld [vmem:[#allocation17] sm:$0xff] }
 0x4cd   :  { %5574 = vmatpush.bf16.msra.mxu2 %v8529_v28  ;;  %v4911_v59 = vadd.f32 %v4910_v3, %v4897_v10  ;;  %v4992_v28 = vpop.f32.mrf.mxu1  ;;  %v8606_v3 = vld [vmem:[#allocation14 + $0x1b8] sm:$0xf0]  ;;  %v5034_v18 = vpop.f32.mrf.mxu0  ;;  %v5634_v29 = vld [vmem:[#allocation20 + $0x7] ss:$0 sm:$0xff] }
 0x4ce   :  { %v8609_v10 = vor.u32 %v9433_v61, %v8606_v3 }
 0x4cf   :  { %v4925_v20 = vadd.f32 %v4924_v16, %v4911_v59  ;;  %5582 = vmatpush.bf16.msra.mxu3 %v8641_v50  ;;  %v8598_v59 = vld [vmem:[#allocation14 + $0x1a8] sm:$0xf0]  ;;  %v4979_v16 = vadd.f32 %v4978_v6, %v3348_v22  ;;  %5733 = vmatpush.bf16.msrb.mxu0 %v9448_v48  ;;  %v9445_v50 = vld [vmem:[#allocation16 + $0x10] sm:$0xff] }
 0x4d0   :  { %v8601_v4 = vor.u32 %v9431_v12, %v8598_v59  ;;  %v9456_v6 = vld [vmem:[#allocation16 + $0x68] sm:$0xff]  ;;  %v9473_v48 = vld [vmem:[#allocation19 + $0x30] sm:$0xff] }
 0x4d1   :  { %5575 = vmatpush.bf16.msra.mxu2 %v8521_v7  ;;  %v4939_v25 = vadd.f32 %v4938_v23, %v4925_v20  ;;  %v8593_v20 = vor.u32 %v9429_v13, %v8590_v11  ;;  %5747 = vmatpush.bf16.msrb.mxu1 %v9456_v6 }
 0x4d3   :  { %v4953_v63 = vadd.f32 %v4952_v0, %v4939_v25  ;;  %5583 = vmatpush.bf16.msra.mxu3 %v8633_v8  ;;  %v8582_v25 = vld [vmem:[#allocation14 + $0x188] sm:$0xf0]  ;;  %5734 = vmatpush.bf16.msrb.mxu0 %v9447_v38  ;;  %v9443_v8 = vld [vmem:[#allocation16] sm:$0xff] }
 0x4d4   :  { %v8585_v0 = vor.u32 %v9427_v53, %v8582_v25  ;;  %v9472_v38 = vld [vmem:[#allocation19 + $0x28] sm:$0xff] }
 0x4d5   :  { %v4994_v45 = vpop.f32.mrf.mxu1  ;;  %5748 = vmatpush.bf16.msrb.mxu1 %v9455_v56 }
 0x4d6   :  { %v4995_v31 = vadd.f32 %v4994_v45, %v4981_v21 }
 0x4d7   :  { %5584 = vmatpush.bf16.msra.mxu3 %v8625_v58  ;;  %5735 = vmatpush.bf16.msrb.mxu0 %v9446_v46  ;;  %v9453_v58 = vld [vmem:[#allocation16 + $0x50] sm:$0xff]  ;;  %v9471_v46 = vld [vmem:[#allocation19 + $0x20] sm:$0xff] }
 0x4d9   :  { %5749 = vmatpush.bf16.msrb.mxu1 %v9454_v41 }
 0x4db   :  { %5585 = vmatpush.bf16.msra.mxu3 %v8617_v1  ;;  %5736 = vmatpush.bf16.msrb.mxu0 %v9445_v50  ;;  %v5158_v1 = vld [vmem:[#allocation20 + $0x6] ss:$8 sm:$0x3] }
 0x4dc   :  { %v5160_v3 = vperm.slane %v5158_v1, 0 }
 0x4dd   :  { %v5048_v2 = vpop.f32.mrf.mxu1  ;;  %5750 = vmatpush.bf16.msrb.mxu1 %v9453_v58 }
 0x4de   :  { %v5006_v62 = vpop.f32.mrf.mxu2 }
 0x4df   :  { %5586 = vmatpush.bf16.msra.mxu3 %v8609_v10  ;;  %5737 = vmatpush.bf16.msrb.mxu0 %v9444_v19 }
 0x4e3   :  { %5587 = vmatpush.bf16.msra.mxu3 %v8601_v4  ;;  %5738 = vmatpush.bf16.msrb.mxu0 %v9443_v8 }
 0x4e4   :  { %v4964_v52 = vpop.f32.mrf.mxu3 }
 0x4e5   :  { %v4965_v32 = vadd.f32 %v4964_v52, %v4951_v27  ;;  %v4993_v52 = vadd.f32 %v4992_v28, %v4979_v16  ;;  %v5050_v57 = vpop.f32.mrf.mxu1 }
 0x4e6   :  { %v5008_v17 = vpop.f32.mrf.mxu2 }
 0x4e7   :  { %v5083_v39 = vmax.f32 %v4965_v32, 0.0  ;;  %v5007_v23 = vadd.f32 %v5006_v62, %v4993_v52  ;;  %5588 = vmatpush.bf16.msra.mxu3 %v8593_v20  ;;  %v5009_v26 = vadd.f32 %v5008_v17, %v4995_v31  ;;  %v5036_v32 = vpop.f32.mrf.mxu0  ;;  %v9452_v62 = vld [vmem:[#allocation16 + $0x48] sm:$0xff] }
 0x4e8   :  { %5751 = vmatpush.bf16.msrb.mxu1 %v9452_v62  ;;  %v9470_v62 = vld [vmem:[#allocation19 + $0x18] sm:$0xff] }
 0x4eb   :  { %5589 = vmatpush.bf16.msra.mxu3 %v8585_v0 }
 0x4ec   :  { %v4966_v24 = vpop.f32.mrf.mxu3  ;;  %5752 = vmatpush.bf16.msrb.mxu1 %v9451_v40  ;;  %v9468_v40 = vld [vmem:[#allocation19 + $0x8] sm:$0xff] }
 0x4ed   :  { %v4967_v37 = vadd.f32 %v4966_v24, %v4953_v63 }
 0x4ef   :  { %v5087_v42 = vmax.f32 %v4967_v37, 0.0 }
 0x4f1   :  { %v5091_v47 = vpack.c.bf16 %v5087_v42, %v5083_v39 }
 0x4f3   :  { %5520 = vmatmul.bf16.vlgmr.msrb.gmra.mxu2 %v5091_v47 }
 0x4fe   :  { %v5062_v5 = vpop.f32.mrf.mxu2 }
 0x503   :  { %5576 = vmatmul.bf16.vlgmr.msra.gmra.mxu2 %v5091_v47 }
 0x504   :  { %v5020_v7 = vpop.f32.mrf.mxu3 }
 0x505   :  { %v5021_v27 = vadd.f32 %v5020_v7, %v5007_v23 }
 0x506   :  { %v5064_v42 = vpop.f32.mrf.mxu2 }
 0x507   :  { %v5035_v63 = vadd.f32 %v5034_v18, %v5021_v27 }
 0x509   :  { %v5049_v37 = vadd.f32 %v5048_v2, %v5035_v63  ;;  %v5161_v2 = vperm.slane %v5158_v1, 1  ;;  %v9469_v1 = vld [vmem:[#allocation19 + $0x10] sm:$0xff] }
 0x50b   :  { %v5063_v39 = vadd.f32 %v5062_v5, %v5049_v37 }
 0x50c   :  { %v5022_v14 = vpop.f32.mrf.mxu3 }
 0x50d   :  { %v5023_v30 = vadd.f32 %v5022_v14, %v5009_v26  ;;  %v5493_v28 = vpop.f32.mrf.mxu0 }
 0x50e   :  { %v5494_v45 = vadd.f32 %v5493_v28, %v5160_v3 }
 0x50f   :  { %v5037_v33 = vadd.f32 %v5036_v32, %v5023_v30 }
 0x511   :  { %v5051_v34 = vadd.f32 %v5050_v57, %v5037_v33 }
 0x513   :  { %v5065_v54 = vadd.f32 %v5064_v42, %v5051_v34 }
 0x515   :  { %v5495_v61 = vpop.f32.mrf.mxu0 }
 0x516   :  { %v5496_v12 = vadd.f32 %v5495_v61, %v5160_v3  ;;  %v9467_v61 = vld [vmem:[#allocation19] sm:$0xff] }
 0x51d   :  { %v5549_v11 = vpop.f32.mrf.mxu0 }
 0x51e   :  { %v5550_v26 = vadd.f32 %v5549_v11, %v5161_v2 }
 0x524   :  { %v5076_v24 = vpop.f32.mrf.mxu3 }
 0x525   :  { %v5077_v43 = vadd.f32 %v5076_v24, %v5063_v39  ;;  %v5551_v53 = vpop.f32.mrf.mxu0 }
 0x526   :  { %v5552_v0 = vadd.f32 %v5551_v53, %v5161_v2 }
 0x527   :  { %v5084_v55 = vmax.f32 %v5077_v43, 0.0  ;;  %v5507_v35 = vpop.f32.mrf.mxu1  ;;  %v9465_v43 = vld [vmem:[#allocation17 + $0x30] sm:$0xff] }
 0x528   :  { %v5508_v59 = vadd.f32 %v5507_v35, %v5494_v45 }
 0x52c   :  { %v5078_v44 = vpop.f32.mrf.mxu3 }
 0x52d   :  { %v5079_v47 = vadd.f32 %v5078_v44, %v5065_v54  ;;  %v9466_v54 = vld [vmem:[#allocation17 + $0x38] sm:$0xff]  ;;  %v9464_v44 = vld [vmem:[#allocation17 + $0x28] sm:$0xff] }
 0x52e   :  { %5827 = vmatpush.bf16.msrb.mxu2 %v9466_v54 }
 0x52f   :  { %v5088_v9 = vmax.f32 %v5079_v47, 0.0  ;;  %v5509_v7 = vpop.f32.mrf.mxu1  ;;  %v9463_v47 = vld [vmem:[#allocation17 + $0x20] sm:$0xff] }
 0x530   :  { %v5510_v4 = vadd.f32 %v5509_v7, %v5496_v12  ;;  %v5778_v7 = vld [vmem:[#allocation20 + $0x40] ss:$0 sm:$0xff] }
 0x531   :  { %v5092_v36 = vpack.c.bf16 %v5088_v9, %v5084_v55  ;;  %v9462_v55 = vld [vmem:[#allocation17 + $0x18] sm:$0xff]  ;;  %v9461_v9 = vld [vmem:[#allocation17 + $0x10] sm:$0xff] }
 0x532   :  { %5828 = vmatpush.bf16.msrb.mxu2 %v9465_v43 }
 0x533   :  { %5534 = vmatmul.bf16.vlgmr.msrb.gmra.mxu3 %v5092_v36 }
 0x534   :  { %5909 = vmatpush.bf16.msrb.mxu3 %v9474_v49 }
 0x536   :  { %5829 = vmatpush.bf16.msrb.mxu2 %v9464_v44 }
 0x537   :  { %v5563_v17 = vpop.f32.mrf.mxu1 }
 0x538   :  { %v5564_v30 = vadd.f32 %v5563_v17, %v5550_v26  ;;  %5910 = vmatpush.bf16.msrb.mxu3 %v9473_v48 }
 0x53a   :  { %5830 = vmatpush.bf16.msrb.mxu2 %v9463_v47 }
 0x53c   :  { %5911 = vmatpush.bf16.msrb.mxu3 %v9472_v38 }
 0x53e   :  { %5831 = vmatpush.bf16.msrb.mxu2 %v9462_v55 }
 0x53f   :  { %v5565_v27 = vpop.f32.mrf.mxu1 }
 0x540   :  { %v5566_v63 = vadd.f32 %v5565_v27, %v5552_v0  ;;  %5912 = vmatpush.bf16.msrb.mxu3 %v9471_v46 }
 0x542   :  { %5832 = vmatpush.bf16.msrb.mxu2 %v9461_v9 }
 0x543   :  { %5590 = vmatmul.bf16.vlgmr.msra.gmra.mxu3 %v5092_v36  ;;  %v9460_v36 = vld [vmem:[#allocation17 + $0x8] sm:$0xff] }
 0x544   :  { %5913 = vmatpush.bf16.msrb.mxu3 %v9470_v62 }
 0x546   :  { %5833 = vmatpush.bf16.msrb.mxu2 %v9460_v36 }
 0x548   :  { %5914 = vmatpush.bf16.msrb.mxu3 %v9469_v1 }
 0x54a   :  { %5834 = vmatpush.bf16.msrb.mxu2 %v9459_v51 }
 0x54c   :  { %5915 = vmatpush.bf16.msrb.mxu3 %v9468_v40 }
 0x550   :  { %5916 = vmatpush.bf16.msrb.mxu3 %v9467_v61 }
 0x576   :  { %v5521_v60 = vpop.f32.mrf.mxu2 }
 0x577   :  { %v5522_v13 = vadd.f32 %v5521_v60, %v5508_v59 }
 0x57e   :  { %v5523_v10 = vpop.f32.mrf.mxu2 }
 0x57f   :  { %v5524_v16 = vadd.f32 %v5523_v10, %v5510_v4 }
 0x586   :  { %v5577_v52 = vpop.f32.mrf.mxu2 }
 0x587   :  { %v5578_v32 = vadd.f32 %v5577_v52, %v5564_v30 }
 0x58e   :  { %v5579_v5 = vpop.f32.mrf.mxu2 }
 0x58f   :  { %v5580_v33 = vadd.f32 %v5579_v5, %v5566_v63 }
 0x5b6   :  { %v5535_v22 = vpop.f32.mrf.mxu3 }
 0x5b7   :  { %v5536_v18 = vadd.f32 %v5535_v22, %v5522_v13  ;;  %v5860_v13 = vld [vmem:[#allocation20 + $0x41] ss:$0 sm:$0xff] }
 0x5b9   :  { %v5596_v31 = vmax.f32 %v5536_v18, 0.0 }
 0x5be   :  { %v5537_v20 = vpop.f32.mrf.mxu3 }
 0x5bf   :  { %v5538_v21 = vadd.f32 %v5537_v20, %v5524_v16 }
 0x5c1   :  { %v5598_v23 = vmax.f32 %v5538_v21, 0.0 }
 0x5c3   :  { %v5600_v14 = vpack.c.bf16 %v5598_v23, %v5596_v31 }
 0x5c5   :  { %5739 = vmatmul.bf16.vlgmr.msrb.gmra.mxu0 %v5600_v14 }
 0x5c6   :  { %v5591_v25 = vpop.f32.mrf.mxu3 }
 0x5c7   :  { %v5592_v24 = vadd.f32 %v5591_v25, %v5578_v32 }
 0x5c9   :  { %v5597_v34 = vmax.f32 %v5592_v24, 0.0 }
 0x5ce   :  { %v5593_v37 = vpop.f32.mrf.mxu3 }
 0x5cf   :  { %v5594_v57 = vadd.f32 %v5593_v37, %v5580_v33 }
 0x5d1   :  { %v5599_v39 = vmax.f32 %v5594_v57, 0.0 }
 0x5d3   :  { %v5601_v42 = vpack.c.bf16 %v5599_v39, %v5597_v34 }
 0x5d5   :  { %5753 = vmatmul.bf16.vlgmr.msrb.gmra.mxu1 %v5601_v42 }
 0x642   :  { %v5740_v15 = vpop.f32.mrf.mxu0 }
 0x643   :  { %v5741_v6 = vadd.f32 %v5740_v15, %v5634_v29 }
 0x64a   :  { %v5742_v19 = vpop.f32.mrf.mxu0 }
 0x64b   :  { %v5743_v8 = vadd.f32 %v5742_v19, %v5634_v29 }
 0x652   :  { %v5754_v50 = vpop.f32.mrf.mxu1 }
 0x653   :  { %v5755_v56 = vadd.f32 %v5754_v50, %v5741_v6 }
 0x655   :  { %v5759_v58 = vmax.f32 %v5755_v56, 0.0 }
 0x65a   :  { %v5756_v41 = vpop.f32.mrf.mxu1 }
 0x65b   :  { %v5757_v28 = vadd.f32 %v5756_v41, %v5743_v8 }
 0x65d   :  { %v5760_v35 = vmax.f32 %v5757_v28, 0.0 }
 0x65f   :  { %v5761_v60 = vpack.c.bf16 %v5760_v35, %v5759_v58 }
 0x661   :  { %5835 = vmatmul.bf16.vlgmr.msrb.gmra.mxu2 %v5761_v60 }
 0x6e4   :  { %v5836_v3 = vpop.f32.mrf.mxu2 }
 0x6e5   :  { %v5837_v10 = vadd.f32 %v5836_v3, %v5778_v7 }
 0x6e7   :  { %v5841_v12 = vmax.f32 %v5837_v10, 0.0 }
 0x6ec   :  { %v5838_v22 = vpop.f32.mrf.mxu2 }
 0x6ed   :  { %v5839_v45 = vadd.f32 %v5838_v22, %v5778_v7 }
 0x6ef   :  { %v5842_v59 = vmax.f32 %v5839_v45, 0.0 }
 0x6f1   :  { %v5843_v4 = vpack.c.bf16 %v5842_v59, %v5841_v12 }
 0x6f3   :  { %5917 = vmatmul.bf16.vlgmr.msrb.gmra.mxu3 %v5843_v4 }
 0x776   :  { %v5918_v11 = vpop.f32.mrf.mxu3 }
 0x777   :  { %v5919_v16 = vadd.f32 %v5918_v11, %v5860_v13 }
 0x779   :  { %5923 = vst [vmem:[#allocation22] sm:$0xff] %v5919_v16 }
 0x77e   :  { %v5920_v18 = vpop.f32.mrf.mxu3 }
 0x77f   :  { %v5921_v17 = vadd.f32 %v5920_v18, %v5860_v13 }
 0x781   :  { %5924 = vst [vmem:[#allocation22 + $0x8] sm:$0xff] %v5921_v17 }
 0x782   :  { %5937 = dma.vmem_to_hbm [thread:$0]  %s5930_s29, 256, %s5932_s2, [#allocation4], %s9829_s15, %s9829_s15, %s9830_s1  }
 0x783   :  { %9823 = dma.done.wait [#allocation4], 256  }
 0x784   :  { %9824 = vsyncadd [#allocation4], 4294967040 }
 0x785   :  { %5942 = vsyncpa [#allocation3], 1 }
 0x786   :  { %5943 = vsyncpa [#allocation6], 1 }
 0x787   :  { %5944 = vsyncpa [#allocation9], 1 }
 0x788   :  { %5945 = vsyncpa [#allocation12], 1 }
 0x789   :  { %5946 = vsyncpa [#allocation15], 1 }
 0x78a   :  { %5947 = vsyncpa [#allocation18], 1 }
 0x78b   :  { %5948 = vsyncpa [#allocation21], 1 }
 0x78c   :  { %5949 = vsyncpa [#allocation4], 1 }

</bundles_post_ra>
